<compile_context>
chip_gen: v7x
topology: tpu7x:2x2x1
jax: 0.10.0
libtpu: 0.0.40
codegen_flags: <defaults>
</compile_context>

<pallas_src>
import functools

import jax
import jax.numpy as jnp
from jax.experimental import pallas as pl
from jax.experimental.pallas import tpu as pltpu


# ---------------------------------------------------------------------------
# helpers (trace-time Python / wrapper-side JAX only)
# ---------------------------------------------------------------------------
def _adaptive_windows(in_size, out_size):
    """PyTorch AdaptiveMaxPool2d windows: [floor(i*I/O), ceil((i+1)*I/O))."""
    wins = []
    for i in range(out_size):
        s = (i * in_size) // out_size
        e = -(-((i + 1) * in_size) // out_size)
        wins.append((s, e))
    return wins


def _conv1_toeplitz(w1, w_img, w_pool):
    """(C1, Cin, K, K) -> (K, W*Cin, 2*Wp*C1) Toeplitz weights.

    Row index: wi*Cin + ci.  Column index: r*(Wp*C1) + owp*C1 + co with
    ow = 2*owp + r, so the even/odd halves directly feed the 2x2 W-pool.
    """
    c1, cin, k, _ = w1.shape
    wt = jnp.transpose(w1, (2, 3, 1, 0))                      # (di, dj, ci, co)
    wi = jnp.arange(w_img)
    r = jnp.arange(2)
    owp = jnp.arange(w_pool)
    dj = wi[:, None, None] - (2 * owp[None, None, :] + r[None, :, None])
    valid = (dj >= 0) & (dj < k)                              # (W, 2, Wp)
    djc = jnp.clip(dj, 0, k - 1)
    vals = wt[:, djc, :, :]                                   # (K, W, 2, Wp, Cin, C1)
    vals = jnp.where(valid[None, :, :, :, None, None], vals, 0.0)
    t = jnp.transpose(vals, (0, 1, 4, 2, 3, 5))               # (K, W, Cin, 2, Wp, C1)
    return t.reshape(k, w_img * cin, 2 * w_pool * c1)


def _conv2_toeplitz(w2, w_in, w_out):
    """(C2, C1, K, K) -> (K, Wp*C1, OW2*C2) Toeplitz weights."""
    c2, c1, k, _ = w2.shape
    wt = jnp.transpose(w2, (2, 3, 1, 0))                      # (di, dj, ci, co)
    wi = jnp.arange(w_in)
    ow = jnp.arange(w_out)
    dj = wi[:, None] - ow[None, :]                            # (Wp, OW2)
    valid = (dj >= 0) & (dj < k)
    djc = jnp.clip(dj, 0, k - 1)
    vals = wt[:, djc, :, :]                                   # (K, Wp, OW2, C1, C2)
    vals = jnp.where(valid[None, :, :, None, None], vals, 0.0)
    t = jnp.transpose(vals, (0, 1, 3, 2, 4))                  # (K, Wp, C1, OW2, C2)
    return t.reshape(k, w_in * c1, w_out * c2)


# ---------------------------------------------------------------------------
# Kernel 1: fused conv1 -> ReLU -> maxpool2x2 -> conv2 -> ReLU -> adaptive pool
# ---------------------------------------------------------------------------
def _feature_kernel(x_ref, w1_ref, b1_ref, w2_ref, b2_ref, o_ref, s1_ref, *,
                    H, W, C1, C2, K1, K2, OHA, OWA):
    OH1 = H - K1 + 1
    OW1 = W - K1 + 1
    Hp, Wp = OH1 // 2, OW1 // 2
    OH2 = Hp - K2 + 1
    OW2 = Wp - K2 + 1

    x = x_ref[0]                                              # (H, W*Cin)

    # ---- conv1 as K1 shifted matmuls (even/odd ow columns) + bias + ReLU ---
    acc = jnp.dot(x[0:OH1, :], w1_ref[0], preferred_element_type=jnp.float32)
    for di in range(1, K1):
        acc += jnp.dot(x[di:di + OH1, :], w1_ref[di],
                       preferred_element_type=jnp.float32)
    acc = jnp.maximum(acc + b1_ref[...], 0.0)                 # (OH1, 2*Wp*C1)

    # ---- 2x2 max pool: W via even/odd halves, H via stride-2 sublane reads --
    half = Wp * C1
    s1_ref[...] = jnp.maximum(acc[:, :half], acc[:, half:2 * half])
    h1 = jnp.maximum(s1_ref[pl.ds(0, Hp, 2), :],
                     s1_ref[pl.ds(1, Hp, 2), :])              # (Hp, Wp*C1)

    # ---- conv2 as K2 shifted matmuls + bias + ReLU --------------------------
    acc2 = jnp.dot(h1[0:OH2, :], w2_ref[0], preferred_element_type=jnp.float32)
    for di in range(1, K2):
        acc2 += jnp.dot(h1[di:di + OH2, :], w2_ref[di],
                        preferred_element_type=jnp.float32)
    acc2 = jnp.maximum(acc2 + b2_ref[...], 0.0)               # (OH2, OW2*C2)

    # ---- AdaptiveMaxPool2d((OHA, OWA)), vectorized over 16-lane groups ------
    hwin = _adaptive_windows(OH2, OHA)
    wwin = _adaptive_windows(OW2, OWA)
    for j, (ws, we) in enumerate(wwin):
        col = acc2[:, ws * C2:(ws + 1) * C2]                  # (OH2, C2)
        for q in range(ws + 1, we):
            col = jnp.maximum(col, acc2[:, q * C2:(q + 1) * C2])
        for i, (hs, he) in enumerate(hwin):
            r = col[hs:hs + 1, :]                             # (1, C2)
            for p in range(hs + 1, he):
                r = jnp.maximum(r, col[p:p + 1, :])
            o_ref[0, i:i + 1, j * C2:(j + 1) * C2] = r


def _extract_features(x_nchw, params):
    N, Cin, H, W = x_nchw.shape
    w1 = params["conv1_w"].astype(jnp.float32)
    w2 = params["conv2_w"].astype(jnp.float32)
    C1, _, K1, _ = w1.shape
    C2, _, K2, _ = w2.shape
    OH1, OW1 = H - K1 + 1, W - K1 + 1
    Hp, Wp = OH1 // 2, OW1 // 2
    OH2, OW2 = Hp - K2 + 1, Wp - K2 + 1
    OHA, OWA = 5, 7
    assert OH2 >= OHA and OW2 >= OWA, "input too small for AdaptiveMaxPool2d((5,7))"

    # single (H, W*C) layout used end-to-end inside the kernel
    xr = jnp.transpose(x_nchw.astype(jnp.float32), (0, 2, 3, 1)).reshape(N, H, W * Cin)
    w1t = _conv1_toeplitz(w1, W, Wp)                          # (K1, W*Cin, 2*Wp*C1)
    b1r = jnp.tile(params["conv1_b"].astype(jnp.float32), 2 * Wp).reshape(1, 2 * Wp * C1)
    w2t = _conv2_toeplitz(w2, Wp, OW2)                        # (K2, Wp*C1, OW2*C2)
    b2r = jnp.tile(params["conv2_b"].astype(jnp.float32), OW2).reshape(1, OW2 * C2)

    kernel = functools.partial(_feature_kernel, H=H, W=W, C1=C1, C2=C2,
                               K1=K1, K2=K2, OHA=OHA, OWA=OWA)
    feats = pl.pallas_call(
        kernel,
        grid=(N,),
        out_shape=jax.ShapeDtypeStruct((N, OHA, OWA * C2), jnp.float32),
        in_specs=[
            pl.BlockSpec((1, H, W * Cin), lambda n: (n, 0, 0)),
            pl.BlockSpec(w1t.shape, lambda n: (0, 0, 0)),
            pl.BlockSpec(b1r.shape, lambda n: (0, 0)),
            pl.BlockSpec(w2t.shape, lambda n: (0, 0, 0)),
            pl.BlockSpec(b2r.shape, lambda n: (0, 0)),
        ],
        out_specs=pl.BlockSpec((1, OHA, OWA * C2), lambda n: (n, 0, 0)),
        scratch_shapes=[pltpu.VMEM((OH1, Wp * C1), jnp.float32)],
        compiler_params=pltpu.CompilerParams(
            dimension_semantics=("parallel",)),
    )(xr, w1t, b1r, w2t, b2r)
    # flatten (i, j, co) -> i*(OWA*C2) + j*C2 + co; fc1 weights are permuted to match
    return feats.reshape(N, OHA * OWA * C2)


# ---------------------------------------------------------------------------
# Kernel 2: fused fc1 -> ReLU -> fc2 -> ReLU -> fc3
# ---------------------------------------------------------------------------
def _mlp_kernel(f_ref, w1_ref, b1_ref, w2_ref, b2_ref, w3_ref, b3_ref, o_ref):
    h = jnp.dot(f_ref[...], w1_ref[...], preferred_element_type=jnp.float32)
    h = jnp.maximum(h + b1_ref[...], 0.0)
    h = jnp.dot(h, w2_ref[...], preferred_element_type=jnp.float32)
    h = jnp.maximum(h + b2_ref[...], 0.0)
    o_ref[...] = jnp.dot(h, w3_ref[...],
                         preferred_element_type=jnp.float32) + b3_ref[...]


def _mlp(feats, params):
    N = feats.shape[0]
    C2 = params["conv2_w"].shape[0]
    OHA, OWA = 5, 7
    # permute fc1 columns from PyTorch's (co, i, j) flatten to our (i, j, co) layout
    wf1 = params["fc1_w"].astype(jnp.float32).reshape(-1, C2, OHA, OWA)
    wf1 = jnp.transpose(wf1, (2, 3, 1, 0)).reshape(OHA * OWA * C2, -1)   # (560, 120)
    bf1 = params["fc1_b"].astype(jnp.float32).reshape(1, -1)
    wf2 = params["fc2_w"].astype(jnp.float32).T                           # (120, 84)
    bf2 = params["fc2_b"].astype(jnp.float32).reshape(1, -1)
    wf3 = params["fc3_w"].astype(jnp.float32).T                           # (84, 2)
    bf3 = params["fc3_b"].astype(jnp.float32).reshape(1, -1)

    def fs(shape):
        nd = len(shape)
        return pl.BlockSpec(shape, lambda i, _nd=nd: (0,) * _nd)

    out_shape = (N, wf3.shape[1])
    return pl.pallas_call(
        _mlp_kernel,
        grid=(1,),
        out_shape=jax.ShapeDtypeStruct(out_shape, jnp.float32),
        in_specs=[fs(feats.shape), fs(wf1.shape), fs(bf1.shape),
                  fs(wf2.shape), fs(bf2.shape), fs(wf3.shape), fs(bf3.shape)],
        out_specs=fs(out_shape),
    )(feats, wf1, bf1, wf2, bf2, wf3, bf3)


# ---------------------------------------------------------------------------
# Forward pass + params
# ---------------------------------------------------------------------------
def net_forward(x, params):
    feats = _extract_features(x, params)      # (N, 560), VMEM-resident stage 1
    return _mlp(feats, params)                # (N, 2),   VMEM-resident stage 2


def init_params(key):
    """Deterministic synthetic init (PyTorch-style U(-1/sqrt(fan_in), 1/sqrt(fan_in)))."""
    def uniform(k, shape, fan_in):
        bound = 1.0 / (fan_in ** 0.5)
        return jax.random.uniform(k, shape, jnp.float32, -bound, bound)

    ks = jax.random.split(key, 10)
    return {
        "conv1_w": uniform(ks[0], (6, 3, 4, 4), 3 * 4 * 4),
        "conv1_b": uniform(ks[1], (6,), 3 * 4 * 4),
        "conv2_w": uniform(ks[2], (16, 6, 3, 3), 6 * 3 * 3),
        "conv2_b": uniform(ks[3], (16,), 6 * 3 * 3),
        "fc1_w": uniform(ks[4], (120, 560), 560),
        "fc1_b": uniform(ks[5], (120,), 560),
        "fc2_w": uniform(ks[6], (84, 120), 120),
        "fc2_b": uniform(ks[7], (84,), 120),
        "fc3_w": uniform(ks[8], (2, 84), 84),
        "fc3_b": uniform(ks[9], (2,), 84),
    }


if __name__ == "__main__":
    key = jax.random.PRNGKey(0)
    pkey, xkey = jax.random.split(key)
    params = init_params(pkey)
    x = jax.random.normal(xkey, (2, 3, 32, 32), jnp.float32)   # NCHW, like PyTorch
    out = jax.jit(net_forward)(x, params)
    jax.block_until_ready(out)
    assert out.shape == (2, 2) and out.dtype == jnp.float32
    print("KERNEL_OK")
</pallas_src>

<mosaic_0001>
module attributes {stable_mosaic.version = 11 : i64} {
  func.func @_feature_kernel(%arg0: i32, %arg1: memref<1x32x96xf32, #tpu.memory_space<vmem>>, %arg2: memref<4x96x168xf32, #tpu.memory_space<vmem>>, %arg3: memref<1x168xf32, #tpu.memory_space<vmem>>, %arg4: memref<3x84x192xf32, #tpu.memory_space<vmem>>, %arg5: memref<1x192xf32, #tpu.memory_space<vmem>>, %arg6: memref<1x5x112xf32, #tpu.memory_space<vmem>>, %arg7: memref<29x84xf32, #tpu.memory_space<vmem>>) attributes {dimension_semantics = [#tpu.dimension_semantics<parallel>], iteration_bounds = array<i64: 2>, scalar_prefetch = 0 : i64, scratch_operands = 1 : i64, tpu.core_type = #tpu.core_type<tc>, window_params = [{transform_indices = @transform_0, window_bounds = array<i64: 1, 32, 96>}, {pipeline_mode = #tpu.pipeline_mode<synchronous>, transform_indices = @transform_1, window_bounds = array<i64: 4, 96, 168>}, {pipeline_mode = #tpu.pipeline_mode<synchronous>, transform_indices = @transform_2, window_bounds = array<i64: 1, 168>}, {pipeline_mode = #tpu.pipeline_mode<synchronous>, transform_indices = @transform_3, window_bounds = array<i64: 3, 84, 192>}, {pipeline_mode = #tpu.pipeline_mode<synchronous>, transform_indices = @transform_4, window_bounds = array<i64: 1, 192>}, {transform_indices = @transform_5, window_bounds = array<i64: 1, 5, 112>}]} {
    %c0 = arith.constant 0 : index
    %c0_0 = arith.constant 0 : index
    %c0_1 = arith.constant 0 : index
    %0 = vector.load %arg1[%c0, %c0_0, %c0_1] : memref<1x32x96xf32, #tpu.memory_space<vmem>>, vector<1x32x96xf32>
    %1 = vector.shape_cast %0 : vector<1x32x96xf32> to vector<32x96xf32>
    %2 = vector.extract_strided_slice %1 {offsets = [0, 0], sizes = [29, 96], strides = [1, 1]} : vector<32x96xf32> to vector<29x96xf32>
    %c0_2 = arith.constant 0 : index
    %c0_3 = arith.constant 0 : index
    %c0_4 = arith.constant 0 : index
    %3 = vector.load %arg2[%c0_2, %c0_3, %c0_4] : memref<4x96x168xf32, #tpu.memory_space<vmem>>, vector<1x96x168xf32>
    %4 = vector.shape_cast %3 : vector<1x96x168xf32> to vector<96x168xf32>
    %cst = arith.constant dense<0.000000e+00> : vector<29x168xf32>
    %5 = tpu.matmul %2, %4, %cst {dimension_numbers = #tpu.dot_dimension_numbers<[1], [0], [0], [1], [0, 0, 1, 1], [], []>} : vector<29x96xf32>, vector<96x168xf32>, vector<29x168xf32> -> vector<29x168xf32>
    %6 = vector.extract_strided_slice %1 {offsets = [1, 0], sizes = [29, 96], strides = [1, 1]} : vector<32x96xf32> to vector<29x96xf32>
    %c1 = arith.constant 1 : index
    %c0_5 = arith.constant 0 : index
    %c0_6 = arith.constant 0 : index
    %7 = vector.load %arg2[%c1, %c0_5, %c0_6] : memref<4x96x168xf32, #tpu.memory_space<vmem>>, vector<1x96x168xf32>
    %8 = vector.shape_cast %7 : vector<1x96x168xf32> to vector<96x168xf32>
    %cst_7 = arith.constant dense<0.000000e+00> : vector<29x168xf32>
    %9 = tpu.matmul %6, %8, %cst_7 {dimension_numbers = #tpu.dot_dimension_numbers<[1], [0], [0], [1], [0, 0, 1, 1], [], []>} : vector<29x96xf32>, vector<96x168xf32>, vector<29x168xf32> -> vector<29x168xf32>
    %10 = arith.addf %5, %9 : vector<29x168xf32>
    %11 = vector.extract_strided_slice %1 {offsets = [2, 0], sizes = [29, 96], strides = [1, 1]} : vector<32x96xf32> to vector<29x96xf32>
    %c2 = arith.constant 2 : index
    %c0_8 = arith.constant 0 : index
    %c0_9 = arith.constant 0 : index
    %12 = vector.load %arg2[%c2, %c0_8, %c0_9] : memref<4x96x168xf32, #tpu.memory_space<vmem>>, vector<1x96x168xf32>
    %13 = vector.shape_cast %12 : vector<1x96x168xf32> to vector<96x168xf32>
    %cst_10 = arith.constant dense<0.000000e+00> : vector<29x168xf32>
    %14 = tpu.matmul %11, %13, %cst_10 {dimension_numbers = #tpu.dot_dimension_numbers<[1], [0], [0], [1], [0, 0, 1, 1], [], []>} : vector<29x96xf32>, vector<96x168xf32>, vector<29x168xf32> -> vector<29x168xf32>
    %15 = arith.addf %10, %14 : vector<29x168xf32>
    %16 = vector.extract_strided_slice %1 {offsets = [3, 0], sizes = [29, 96], strides = [1, 1]} : vector<32x96xf32> to vector<29x96xf32>
    %c3 = arith.constant 3 : index
    %c0_11 = arith.constant 0 : index
    %c0_12 = arith.constant 0 : index
    %17 = vector.load %arg2[%c3, %c0_11, %c0_12] : memref<4x96x168xf32, #tpu.memory_space<vmem>>, vector<1x96x168xf32>
    %18 = vector.shape_cast %17 : vector<1x96x168xf32> to vector<96x168xf32>
    %cst_13 = arith.constant dense<0.000000e+00> : vector<29x168xf32>
    %19 = tpu.matmul %16, %18, %cst_13 {dimension_numbers = #tpu.dot_dimension_numbers<[1], [0], [0], [1], [0, 0, 1, 1], [], []>} : vector<29x96xf32>, vector<96x168xf32>, vector<29x168xf32> -> vector<29x168xf32>
    %20 = arith.addf %15, %19 : vector<29x168xf32>
    %c0_14 = arith.constant 0 : index
    %c0_15 = arith.constant 0 : index
    %21 = vector.load %arg3[%c0_14, %c0_15] : memref<1x168xf32, #tpu.memory_space<vmem>>, vector<1x168xf32>
    %22 = vector.broadcast %21 : vector<1x168xf32> to vector<29x168xf32>
    %23 = arith.addf %20, %22 : vector<29x168xf32>
    %cst_16 = arith.constant 0.000000e+00 : f32
    %24 = vector.broadcast %cst_16 : f32 to vector<29x168xf32>
    %25 = arith.maximumf %23, %24 : vector<29x168xf32>
    %26 = vector.extract_strided_slice %25 {offsets = [0, 0], sizes = [29, 84], strides = [1, 1]} : vector<29x168xf32> to vector<29x84xf32>
    %27 = vector.extract_strided_slice %25 {offsets = [0, 84], sizes = [29, 84], strides = [1, 1]} : vector<29x168xf32> to vector<29x84xf32>
    %28 = arith.maximumf %26, %27 : vector<29x84xf32>
    %c0_17 = arith.constant 0 : index
    %c0_18 = arith.constant 0 : index
    %29 = vector.load %arg7[%c0_17, %c0_18] : memref<29x84xf32, #tpu.memory_space<vmem>>, vector<29x84xf32>
    tpu.vector_store %arg7[%c0_17, %c0_18], %28 {strides = array<i32>} : memref<29x84xf32, #tpu.memory_space<vmem>>, vector<29x84xf32>,
    %c0_19 = arith.constant 0 : index
    %c0_20 = arith.constant 0 : index
    %30 = tpu.strided_load %arg7[%c0_19, %c0_20] {strides = array<i32: 2, 1>} : memref<29x84xf32, #tpu.memory_space<vmem>>, vector<14x84xf32>
    %c1_21 = arith.constant 1 : index
    %c0_22 = arith.constant 0 : index
    %31 = tpu.strided_load %arg7[%c1_21, %c0_22] {strides = array<i32: 2, 1>} : memref<29x84xf32, #tpu.memory_space<vmem>>, vector<14x84xf32>
    %32 = arith.maximumf %30, %31 : vector<14x84xf32>
    %33 = vector.extract_strided_slice %32 {offsets = [0, 0], sizes = [12, 84], strides = [1, 1]} : vector<14x84xf32> to vector<12x84xf32>
    %c0_23 = arith.constant 0 : index
    %c0_24 = arith.constant 0 : index
    %c0_25 = arith.constant 0 : index
    %34 = vector.load %arg4[%c0_23, %c0_24, %c0_25] : memref<3x84x192xf32, #tpu.memory_space<vmem>>, vector<1x84x192xf32>
    %35 = vector.shape_cast %34 : vector<1x84x192xf32> to vector<84x192xf32>
    %cst_26 = arith.constant dense<0.000000e+00> : vector<12x192xf32>
    %36 = tpu.matmul %33, %35, %cst_26 {dimension_numbers = #tpu.dot_dimension_numbers<[1], [0], [0], [1], [0, 0, 1, 1], [], []>} : vector<12x84xf32>, vector<84x192xf32>, vector<12x192xf32> -> vector<12x192xf32>
    %37 = vector.extract_strided_slice %32 {offsets = [1, 0], sizes = [12, 84], strides = [1, 1]} : vector<14x84xf32> to vector<12x84xf32>
    %c1_27 = arith.constant 1 : index
    %c0_28 = arith.constant 0 : index
    %c0_29 = arith.constant 0 : index
    %38 = vector.load %arg4[%c1_27, %c0_28, %c0_29] : memref<3x84x192xf32, #tpu.memory_space<vmem>>, vector<1x84x192xf32>
    %39 = vector.shape_cast %38 : vector<1x84x192xf32> to vector<84x192xf32>
    %cst_30 = arith.constant dense<0.000000e+00> : vector<12x192xf32>
    %40 = tpu.matmul %37, %39, %cst_30 {dimension_numbers = #tpu.dot_dimension_numbers<[1], [0], [0], [1], [0, 0, 1, 1], [], []>} : vector<12x84xf32>, vector<84x192xf32>, vector<12x192xf32> -> vector<12x192xf32>
    %41 = arith.addf %36, %40 : vector<12x192xf32>
    %42 = vector.extract_strided_slice %32 {offsets = [2, 0], sizes = [12, 84], strides = [1, 1]} : vector<14x84xf32> to vector<12x84xf32>
    %c2_31 = arith.constant 2 : index
    %c0_32 = arith.constant 0 : index
    %c0_33 = arith.constant 0 : index
    %43 = vector.load %arg4[%c2_31, %c0_32, %c0_33] : memref<3x84x192xf32, #tpu.memory_space<vmem>>, vector<1x84x192xf32>
    %44 = vector.shape_cast %43 : vector<1x84x192xf32> to vector<84x192xf32>
    %cst_34 = arith.constant dense<0.000000e+00> : vector<12x192xf32>
    %45 = tpu.matmul %42, %44, %cst_34 {dimension_numbers = #tpu.dot_dimension_numbers<[1], [0], [0], [1], [0, 0, 1, 1], [], []>} : vector<12x84xf32>, vector<84x192xf32>, vector<12x192xf32> -> vector<12x192xf32>
    %46 = arith.addf %41, %45 : vector<12x192xf32>
    %c0_35 = arith.constant 0 : index
    %c0_36 = arith.constant 0 : index
    %47 = vector.load %arg5[%c0_35, %c0_36] : memref<1x192xf32, #tpu.memory_space<vmem>>, vector<1x192xf32>
    %48 = vector.broadcast %47 : vector<1x192xf32> to vector<12x192xf32>
    %49 = arith.addf %46, %48 : vector<12x192xf32>
    %cst_37 = arith.constant 0.000000e+00 : f32
    %50 = vector.broadcast %cst_37 : f32 to vector<12x192xf32>
    %51 = arith.maximumf %49, %50 : vector<12x192xf32>
    %52 = vector.extract_strided_slice %51 {offsets = [0, 0], sizes = [12, 16], strides = [1, 1]} : vector<12x192xf32> to vector<12x16xf32>
    %53 = vector.extract_strided_slice %51 {offsets = [0, 16], sizes = [12, 16], strides = [1, 1]} : vector<12x192xf32> to vector<12x16xf32>
    %54 = arith.maximumf %52, %53 : vector<12x16xf32>
    %55 = vector.extract_strided_slice %54 {offsets = [0, 0], sizes = [1, 16], strides = [1, 1]} : vector<12x16xf32> to vector<1x16xf32>
    %56 = vector.extract_strided_slice %54 {offsets = [1, 0], sizes = [1, 16], strides = [1, 1]} : vector<12x16xf32> to vector<1x16xf32>
    %57 = arith.maximumf %55, %56 : vector<1x16xf32>
    %58 = vector.extract_strided_slice %54 {offsets = [2, 0], sizes = [1, 16], strides = [1, 1]} : vector<12x16xf32> to vector<1x16xf32>
    %59 = arith.maximumf %57, %58 : vector<1x16xf32>
    %c0_38 = arith.constant 0 : index
    %c0_39 = arith.constant 0 : index
    %c0_40 = arith.constant 0 : index
    %60 = vector.load %arg6[%c0_38, %c0_39, %c0_40] : memref<1x5x112xf32, #tpu.memory_space<vmem>>, vector<1x1x16xf32>
    %61 = vector.shape_cast %60 : vector<1x1x16xf32> to vector<1x16xf32>
    %62 = vector.shape_cast %59 : vector<1x16xf32> to vector<1x1x16xf32>
    tpu.vector_store %arg6[%c0_38, %c0_39, %c0_40], %62 {strides = array<i32>} : memref<1x5x112xf32, #tpu.memory_space<vmem>>, vector<1x1x16xf32>,
    %63 = vector.extract_strided_slice %54 {offsets = [2, 0], sizes = [1, 16], strides = [1, 1]} : vector<12x16xf32> to vector<1x16xf32>
    %64 = vector.extract_strided_slice %54 {offsets = [3, 0], sizes = [1, 16], strides = [1, 1]} : vector<12x16xf32> to vector<1x16xf32>
    %65 = arith.maximumf %63, %64 : vector<1x16xf32>
    %66 = vector.extract_strided_slice %54 {offsets = [4, 0], sizes = [1, 16], strides = [1, 1]} : vector<12x16xf32> to vector<1x16xf32>
    %67 = arith.maximumf %65, %66 : vector<1x16xf32>
    %c0_41 = arith.constant 0 : index
    %c1_42 = arith.constant 1 : index
    %c0_43 = arith.constant 0 : index
    %68 = vector.load %arg6[%c0_41, %c1_42, %c0_43] : memref<1x5x112xf32, #tpu.memory_space<vmem>>, vector<1x1x16xf32>
    %69 = vector.shape_cast %68 : vector<1x1x16xf32> to vector<1x16xf32>
    %70 = vector.shape_cast %67 : vector<1x16xf32> to vector<1x1x16xf32>
    tpu.vector_store %arg6[%c0_41, %c1_42, %c0_43], %70 {strides = array<i32>} : memref<1x5x112xf32, #tpu.memory_space<vmem>>, vector<1x1x16xf32>,
    %71 = vector.extract_strided_slice %54 {offsets = [4, 0], sizes = [1, 16], strides = [1, 1]} : vector<12x16xf32> to vector<1x16xf32>
    %72 = vector.extract_strided_slice %54 {offsets = [5, 0], sizes = [1, 16], strides = [1, 1]} : vector<12x16xf32> to vector<1x16xf32>
    %73 = arith.maximumf %71, %72 : vector<1x16xf32>
    %74 = vector.extract_strided_slice %54 {offsets = [6, 0], sizes = [1, 16], strides = [1, 1]} : vector<12x16xf32> to vector<1x16xf32>
    %75 = arith.maximumf %73, %74 : vector<1x16xf32>
    %76 = vector.extract_strided_slice %54 {offsets = [7, 0], sizes = [1, 16], strides = [1, 1]} : vector<12x16xf32> to vector<1x16xf32>
    %77 = arith.maximumf %75, %76 : vector<1x16xf32>
    %c0_44 = arith.constant 0 : index
    %c2_45 = arith.constant 2 : index
    %c0_46 = arith.constant 0 : index
    %78 = vector.load %arg6[%c0_44, %c2_45, %c0_46] : memref<1x5x112xf32, #tpu.memory_space<vmem>>, vector<1x1x16xf32>
    %79 = vector.shape_cast %78 : vector<1x1x16xf32> to vector<1x16xf32>
    %80 = vector.shape_cast %77 : vector<1x16xf32> to vector<1x1x16xf32>
    tpu.vector_store %arg6[%c0_44, %c2_45, %c0_46], %80 {strides = array<i32>} : memref<1x5x112xf32, #tpu.memory_space<vmem>>, vector<1x1x16xf32>,
    %81 = vector.extract_strided_slice %54 {offsets = [7, 0], sizes = [1, 16], strides = [1, 1]} : vector<12x16xf32> to vector<1x16xf32>
    %82 = vector.extract_strided_slice %54 {offsets = [8, 0], sizes = [1, 16], strides = [1, 1]} : vector<12x16xf32> to vector<1x16xf32>
    %83 = arith.maximumf %81, %82 : vector<1x16xf32>
    %84 = vector.extract_strided_slice %54 {offsets = [9, 0], sizes = [1, 16], strides = [1, 1]} : vector<12x16xf32> to vector<1x16xf32>
    %85 = arith.maximumf %83, %84 : vector<1x16xf32>
    %c0_47 = arith.constant 0 : index
    %c3_48 = arith.constant 3 : index
    %c0_49 = arith.constant 0 : index
    %86 = vector.load %arg6[%c0_47, %c3_48, %c0_49] : memref<1x5x112xf32, #tpu.memory_space<vmem>>, vector<1x1x16xf32>
    %87 = vector.shape_cast %86 : vector<1x1x16xf32> to vector<1x16xf32>
    %88 = vector.shape_cast %85 : vector<1x16xf32> to vector<1x1x16xf32>
    tpu.vector_store %arg6[%c0_47, %c3_48, %c0_49], %88 {strides = array<i32>} : memref<1x5x112xf32, #tpu.memory_space<vmem>>, vector<1x1x16xf32>,
    %89 = vector.extract_strided_slice %54 {offsets = [9, 0], sizes = [1, 16], strides = [1, 1]} : vector<12x16xf32> to vector<1x16xf32>
    %90 = vector.extract_strided_slice %54 {offsets = [10, 0], sizes = [1, 16], strides = [1, 1]} : vector<12x16xf32> to vector<1x16xf32>
    %91 = arith.maximumf %89, %90 : vector<1x16xf32>
    %92 = vector.extract_strided_slice %54 {offsets = [11, 0], sizes = [1, 16], strides = [1, 1]} : vector<12x16xf32> to vector<1x16xf32>
    %93 = arith.maximumf %91, %92 : vector<1x16xf32>
    %c0_50 = arith.constant 0 : index
    %c4 = arith.constant 4 : index
    %c0_51 = arith.constant 0 : index
    %94 = vector.load %arg6[%c0_50, %c4, %c0_51] : memref<1x5x112xf32, #tpu.memory_space<vmem>>, vector<1x1x16xf32>
    %95 = vector.shape_cast %94 : vector<1x1x16xf32> to vector<1x16xf32>
    %96 = vector.shape_cast %93 : vector<1x16xf32> to vector<1x1x16xf32>
    tpu.vector_store %arg6[%c0_50, %c4, %c0_51], %96 {strides = array<i32>} : memref<1x5x112xf32, #tpu.memory_space<vmem>>, vector<1x1x16xf32>,
    %97 = vector.extract_strided_slice %51 {offsets = [0, 16], sizes = [12, 16], strides = [1, 1]} : vector<12x192xf32> to vector<12x16xf32>
    %98 = vector.extract_strided_slice %51 {offsets = [0, 32], sizes = [12, 16], strides = [1, 1]} : vector<12x192xf32> to vector<12x16xf32>
    %99 = arith.maximumf %97, %98 : vector<12x16xf32>
    %100 = vector.extract_strided_slice %51 {offsets = [0, 48], sizes = [12, 16], strides = [1, 1]} : vector<12x192xf32> to vector<12x16xf32>
    %101 = arith.maximumf %99, %100 : vector<12x16xf32>
    %102 = vector.extract_strided_slice %101 {offsets = [0, 0], sizes = [1, 16], strides = [1, 1]} : vector<12x16xf32> to vector<1x16xf32>
    %103 = vector.extract_strided_slice %101 {offsets = [1, 0], sizes = [1, 16], strides = [1, 1]} : vector<12x16xf32> to vector<1x16xf32>
    %104 = arith.maximumf %102, %103 : vector<1x16xf32>
    %105 = vector.extract_strided_slice %101 {offsets = [2, 0], sizes = [1, 16], strides = [1, 1]} : vector<12x16xf32> to vector<1x16xf32>
    %106 = arith.maximumf %104, %105 : vector<1x16xf32>
    %c0_52 = arith.constant 0 : index
    %c0_53 = arith.constant 0 : index
    %c16 = arith.constant 16 : index
    %107 = vector.load %arg6[%c0_52, %c0_53, %c16] : memref<1x5x112xf32, #tpu.memory_space<vmem>>, vector<1x1x16xf32>
    %108 = vector.shape_cast %107 : vector<1x1x16xf32> to vector<1x16xf32>
    %109 = vector.shape_cast %106 : vector<1x16xf32> to vector<1x1x16xf32>
    tpu.vector_store %arg6[%c0_52, %c0_53, %c16], %109 {strides = array<i32>} : memref<1x5x112xf32, #tpu.memory_space<vmem>>, vector<1x1x16xf32>,
    %110 = vector.extract_strided_slice %101 {offsets = [2, 0], sizes = [1, 16], strides = [1, 1]} : vector<12x16xf32> to vector<1x16xf32>
    %111 = vector.extract_strided_slice %101 {offsets = [3, 0], sizes = [1, 16], strides = [1, 1]} : vector<12x16xf32> to vector<1x16xf32>
    %112 = arith.maximumf %110, %111 : vector<1x16xf32>
    %113 = vector.extract_strided_slice %101 {offsets = [4, 0], sizes = [1, 16], strides = [1, 1]} : vector<12x16xf32> to vector<1x16xf32>
    %114 = arith.maximumf %112, %113 : vector<1x16xf32>
    %c0_54 = arith.constant 0 : index
    %c1_55 = arith.constant 1 : index
    %c16_56 = arith.constant 16 : index
    %115 = vector.load %arg6[%c0_54, %c1_55, %c16_56] : memref<1x5x112xf32, #tpu.memory_space<vmem>>, vector<1x1x16xf32>
    %116 = vector.shape_cast %115 : vector<1x1x16xf32> to vector<1x16xf32>
    %117 = vector.shape_cast %114 : vector<1x16xf32> to vector<1x1x16xf32>
    tpu.vector_store %arg6[%c0_54, %c1_55, %c16_56], %117 {strides = array<i32>} : memref<1x5x112xf32, #tpu.memory_space<vmem>>, vector<1x1x16xf32>,
    %118 = vector.extract_strided_slice %101 {offsets = [4, 0], sizes = [1, 16], strides = [1, 1]} : vector<12x16xf32> to vector<1x16xf32>
    %119 = vector.extract_strided_slice %101 {offsets = [5, 0], sizes = [1, 16], strides = [1, 1]} : vector<12x16xf32> to vector<1x16xf32>
    %120 = arith.maximumf %118, %119 : vector<1x16xf32>
    %121 = vector.extract_strided_slice %101 {offsets = [6, 0], sizes = [1, 16], strides = [1, 1]} : vector<12x16xf32> to vector<1x16xf32>
    %122 = arith.maximumf %120, %121 : vector<1x16xf32>
    %123 = vector.extract_strided_slice %101 {offsets = [7, 0], sizes = [1, 16], strides = [1, 1]} : vector<12x16xf32> to vector<1x16xf32>
    %124 = arith.maximumf %122, %123 : vector<1x16xf32>
    %c0_57 = arith.constant 0 : index
    %c2_58 = arith.constant 2 : index
    %c16_59 = arith.constant 16 : index
    %125 = vector.load %arg6[%c0_57, %c2_58, %c16_59] : memref<1x5x112xf32, #tpu.memory_space<vmem>>, vector<1x1x16xf32>
    %126 = vector.shape_cast %125 : vector<1x1x16xf32> to vector<1x16xf32>
    %127 = vector.shape_cast %124 : vector<1x16xf32> to vector<1x1x16xf32>
    tpu.vector_store %arg6[%c0_57, %c2_58, %c16_59], %127 {strides = array<i32>} : memref<1x5x112xf32, #tpu.memory_space<vmem>>, vector<1x1x16xf32>,
    %128 = vector.extract_strided_slice %101 {offsets = [7, 0], sizes = [1, 16], strides = [1, 1]} : vector<12x16xf32> to vector<1x16xf32>
    %129 = vector.extract_strided_slice %101 {offsets = [8, 0], sizes = [1, 16], strides = [1, 1]} : vector<12x16xf32> to vector<1x16xf32>
    %130 = arith.maximumf %128, %129 : vector<1x16xf32>
    %131 = vector.extract_strided_slice %101 {offsets = [9, 0], sizes = [1, 16], strides = [1, 1]} : vector<12x16xf32> to vector<1x16xf32>
    %132 = arith.maximumf %130, %131 : vector<1x16xf32>
    %c0_60 = arith.constant 0 : index
    %c3_61 = arith.constant 3 : index
    %c16_62 = arith.constant 16 : index
    %133 = vector.load %arg6[%c0_60, %c3_61, %c16_62] : memref<1x5x112xf32, #tpu.memory_space<vmem>>, vector<1x1x16xf32>
    %134 = vector.shape_cast %133 : vector<1x1x16xf32> to vector<1x16xf32>
    %135 = vector.shape_cast %132 : vector<1x16xf32> to vector<1x1x16xf32>
    tpu.vector_store %arg6[%c0_60, %c3_61, %c16_62], %135 {strides = array<i32>} : memref<1x5x112xf32, #tpu.memory_space<vmem>>, vector<1x1x16xf32>,
    %136 = vector.extract_strided_slice %101 {offsets = [9, 0], sizes = [1, 16], strides = [1, 1]} : vector<12x16xf32> to vector<1x16xf32>
    %137 = vector.extract_strided_slice %101 {offsets = [10, 0], sizes = [1, 16], strides = [1, 1]} : vector<12x16xf32> to vector<1x16xf32>
    %138 = arith.maximumf %136, %137 : vector<1x16xf32>
    %139 = vector.extract_strided_slice %101 {offsets = [11, 0], sizes = [1, 16], strides = [1, 1]} : vector<12x16xf32> to vector<1x16xf32>
    %140 = arith.maximumf %138, %139 : vector<1x16xf32>
    %c0_63 = arith.constant 0 : index
    %c4_64 = arith.constant 4 : index
    %c16_65 = arith.constant 16 : index
    %141 = vector.load %arg6[%c0_63, %c4_64, %c16_65] : memref<1x5x112xf32, #tpu.memory_space<vmem>>, vector<1x1x16xf32>
    %142 = vector.shape_cast %141 : vector<1x1x16xf32> to vector<1x16xf32>
    %143 = vector.shape_cast %140 : vector<1x16xf32> to vector<1x1x16xf32>
    tpu.vector_store %arg6[%c0_63, %c4_64, %c16_65], %143 {strides = array<i32>} : memref<1x5x112xf32, #tpu.memory_space<vmem>>, vector<1x1x16xf32>,
    %144 = vector.extract_strided_slice %51 {offsets = [0, 48], sizes = [12, 16], strides = [1, 1]} : vector<12x192xf32> to vector<12x16xf32>
    %145 = vector.extract_strided_slice %51 {offsets = [0, 64], sizes = [12, 16], strides = [1, 1]} : vector<12x192xf32> to vector<12x16xf32>
    %146 = arith.maximumf %144, %145 : vector<12x16xf32>
    %147 = vector.extract_strided_slice %51 {offsets = [0, 80], sizes = [12, 16], strides = [1, 1]} : vector<12x192xf32> to vector<12x16xf32>
    %148 = arith.maximumf %146, %147 : vector<12x16xf32>
    %149 = vector.extract_strided_slice %148 {offsets = [0, 0], sizes = [1, 16], strides = [1, 1]} : vector<12x16xf32> to vector<1x16xf32>
    %150 = vector.extract_strided_slice %148 {offsets = [1, 0], sizes = [1, 16], strides = [1, 1]} : vector<12x16xf32> to vector<1x16xf32>
    %151 = arith.maximumf %149, %150 : vector<1x16xf32>
    %152 = vector.extract_strided_slice %148 {offsets = [2, 0], sizes = [1, 16], strides = [1, 1]} : vector<12x16xf32> to vector<1x16xf32>
    %153 = arith.maximumf %151, %152 : vector<1x16xf32>
    %c0_66 = arith.constant 0 : index
    %c0_67 = arith.constant 0 : index
    %c32 = arith.constant 32 : index
    %154 = vector.load %arg6[%c0_66, %c0_67, %c32] : memref<1x5x112xf32, #tpu.memory_space<vmem>>, vector<1x1x16xf32>
    %155 = vector.shape_cast %154 : vector<1x1x16xf32> to vector<1x16xf32>
    %156 = vector.shape_cast %153 : vector<1x16xf32> to vector<1x1x16xf32>
    tpu.vector_store %arg6[%c0_66, %c0_67, %c32], %156 {strides = array<i32>} : memref<1x5x112xf32, #tpu.memory_space<vmem>>, vector<1x1x16xf32>,
    %157 = vector.extract_strided_slice %148 {offsets = [2, 0], sizes = [1, 16], strides = [1, 1]} : vector<12x16xf32> to vector<1x16xf32>
    %158 = vector.extract_strided_slice %148 {offsets = [3, 0], sizes = [1, 16], strides = [1, 1]} : vector<12x16xf32> to vector<1x16xf32>
    %159 = arith.maximumf %157, %158 : vector<1x16xf32>
    %160 = vector.extract_strided_slice %148 {offsets = [4, 0], sizes = [1, 16], strides = [1, 1]} : vector<12x16xf32> to vector<1x16xf32>
    %161 = arith.maximumf %159, %160 : vector<1x16xf32>
    %c0_68 = arith.constant 0 : index
    %c1_69 = arith.constant 1 : index
    %c32_70 = arith.constant 32 : index
    %162 = vector.load %arg6[%c0_68, %c1_69, %c32_70] : memref<1x5x112xf32, #tpu.memory_space<vmem>>, vector<1x1x16xf32>
    %163 = vector.shape_cast %162 : vector<1x1x16xf32> to vector<1x16xf32>
    %164 = vector.shape_cast %161 : vector<1x16xf32> to vector<1x1x16xf32>
    tpu.vector_store %arg6[%c0_68, %c1_69, %c32_70], %164 {strides = array<i32>} : memref<1x5x112xf32, #tpu.memory_space<vmem>>, vector<1x1x16xf32>,
    %165 = vector.extract_strided_slice %148 {offsets = [4, 0], sizes = [1, 16], strides = [1, 1]} : vector<12x16xf32> to vector<1x16xf32>
    %166 = vector.extract_strided_slice %148 {offsets = [5, 0], sizes = [1, 16], strides = [1, 1]} : vector<12x16xf32> to vector<1x16xf32>
    %167 = arith.maximumf %165, %166 : vector<1x16xf32>
    %168 = vector.extract_strided_slice %148 {offsets = [6, 0], sizes = [1, 16], strides = [1, 1]} : vector<12x16xf32> to vector<1x16xf32>
    %169 = arith.maximumf %167, %168 : vector<1x16xf32>
    %170 = vector.extract_strided_slice %148 {offsets = [7, 0], sizes = [1, 16], strides = [1, 1]} : vector<12x16xf32> to vector<1x16xf32>
    %171 = arith.maximumf %169, %170 : vector<1x16xf32>
    %c0_71 = arith.constant 0 : index
    %c2_72 = arith.constant 2 : index
    %c32_73 = arith.constant 32 : index
    %172 = vector.load %arg6[%c0_71, %c2_72, %c32_73] : memref<1x5x112xf32, #tpu.memory_space<vmem>>, vector<1x1x16xf32>
    %173 = vector.shape_cast %172 : vector<1x1x16xf32> to vector<1x16xf32>
    %174 = vector.shape_cast %171 : vector<1x16xf32> to vector<1x1x16xf32>
    tpu.vector_store %arg6[%c0_71, %c2_72, %c32_73], %174 {strides = array<i32>} : memref<1x5x112xf32, #tpu.memory_space<vmem>>, vector<1x1x16xf32>,
    %175 = vector.extract_strided_slice %148 {offsets = [7, 0], sizes = [1, 16], strides = [1, 1]} : vector<12x16xf32> to vector<1x16xf32>
    %176 = vector.extract_strided_slice %148 {offsets = [8, 0], sizes = [1, 16], strides = [1, 1]} : vector<12x16xf32> to vector<1x16xf32>
    %177 = arith.maximumf %175, %176 : vector<1x16xf32>
    %178 = vector.extract_strided_slice %148 {offsets = [9, 0], sizes = [1, 16], strides = [1, 1]} : vector<12x16xf32> to vector<1x16xf32>
    %179 = arith.maximumf %177, %178 : vector<1x16xf32>
    %c0_74 = arith.constant 0 : index
    %c3_75 = arith.constant 3 : index
    %c32_76 = arith.constant 32 : index
    %180 = vector.load %arg6[%c0_74, %c3_75, %c32_76] : memref<1x5x112xf32, #tpu.memory_space<vmem>>, vector<1x1x16xf32>
    %181 = vector.shape_cast %180 : vector<1x1x16xf32> to vector<1x16xf32>
    %182 = vector.shape_cast %179 : vector<1x16xf32> to vector<1x1x16xf32>
    tpu.vector_store %arg6[%c0_74, %c3_75, %c32_76], %182 {strides = array<i32>} : memref<1x5x112xf32, #tpu.memory_space<vmem>>, vector<1x1x16xf32>,
    %183 = vector.extract_strided_slice %148 {offsets = [9, 0], sizes = [1, 16], strides = [1, 1]} : vector<12x16xf32> to vector<1x16xf32>
    %184 = vector.extract_strided_slice %148 {offsets = [10, 0], sizes = [1, 16], strides = [1, 1]} : vector<12x16xf32> to vector<1x16xf32>
    %185 = arith.maximumf %183, %184 : vector<1x16xf32>
    %186 = vector.extract_strided_slice %148 {offsets = [11, 0], sizes = [1, 16], strides = [1, 1]} : vector<12x16xf32> to vector<1x16xf32>
    %187 = arith.maximumf %185, %186 : vector<1x16xf32>
    %c0_77 = arith.constant 0 : index
    %c4_78 = arith.constant 4 : index
    %c32_79 = arith.constant 32 : index
    %188 = vector.load %arg6[%c0_77, %c4_78, %c32_79] : memref<1x5x112xf32, #tpu.memory_space<vmem>>, vector<1x1x16xf32>
    %189 = vector.shape_cast %188 : vector<1x1x16xf32> to vector<1x16xf32>
    %190 = vector.shape_cast %187 : vector<1x16xf32> to vector<1x1x16xf32>
    tpu.vector_store %arg6[%c0_77, %c4_78, %c32_79], %190 {strides = array<i32>} : memref<1x5x112xf32, #tpu.memory_space<vmem>>, vector<1x1x16xf32>,
    %191 = vector.extract_strided_slice %51 {offsets = [0, 80], sizes = [12, 16], strides = [1, 1]} : vector<12x192xf32> to vector<12x16xf32>
    %192 = vector.extract_strided_slice %51 {offsets = [0, 96], sizes = [12, 16], strides = [1, 1]} : vector<12x192xf32> to vector<12x16xf32>
    %193 = arith.maximumf %191, %192 : vector<12x16xf32>
    %194 = vector.extract_strided_slice %193 {offsets = [0, 0], sizes = [1, 16], strides = [1, 1]} : vector<12x16xf32> to vector<1x16xf32>
    %195 = vector.extract_strided_slice %193 {offsets = [1, 0], sizes = [1, 16], strides = [1, 1]} : vector<12x16xf32> to vector<1x16xf32>
    %196 = arith.maximumf %194, %195 : vector<1x16xf32>
    %197 = vector.extract_strided_slice %193 {offsets = [2, 0], sizes = [1, 16], strides = [1, 1]} : vector<12x16xf32> to vector<1x16xf32>
    %198 = arith.maximumf %196, %197 : vector<1x16xf32>
    %c0_80 = arith.constant 0 : index
    %c0_81 = arith.constant 0 : index
    %c48 = arith.constant 48 : index
    %199 = vector.load %arg6[%c0_80, %c0_81, %c48] : memref<1x5x112xf32, #tpu.memory_space<vmem>>, vector<1x1x16xf32>
    %200 = vector.shape_cast %199 : vector<1x1x16xf32> to vector<1x16xf32>
    %201 = vector.shape_cast %198 : vector<1x16xf32> to vector<1x1x16xf32>
    tpu.vector_store %arg6[%c0_80, %c0_81, %c48], %201 {strides = array<i32>} : memref<1x5x112xf32, #tpu.memory_space<vmem>>, vector<1x1x16xf32>,
    %202 = vector.extract_strided_slice %193 {offsets = [2, 0], sizes = [1, 16], strides = [1, 1]} : vector<12x16xf32> to vector<1x16xf32>
    %203 = vector.extract_strided_slice %193 {offsets = [3, 0], sizes = [1, 16], strides = [1, 1]} : vector<12x16xf32> to vector<1x16xf32>
    %204 = arith.maximumf %202, %203 : vector<1x16xf32>
    %205 = vector.extract_strided_slice %193 {offsets = [4, 0], sizes = [1, 16], strides = [1, 1]} : vector<12x16xf32> to vector<1x16xf32>
    %206 = arith.maximumf %204, %205 : vector<1x16xf32>
    %c0_82 = arith.constant 0 : index
    %c1_83 = arith.constant 1 : index
    %c48_84 = arith.constant 48 : index
    %207 = vector.load %arg6[%c0_82, %c1_83, %c48_84] : memref<1x5x112xf32, #tpu.memory_space<vmem>>, vector<1x1x16xf32>
    %208 = vector.shape_cast %207 : vector<1x1x16xf32> to vector<1x16xf32>
    %209 = vector.shape_cast %206 : vector<1x16xf32> to vector<1x1x16xf32>
    tpu.vector_store %arg6[%c0_82, %c1_83, %c48_84], %209 {strides = array<i32>} : memref<1x5x112xf32, #tpu.memory_space<vmem>>, vector<1x1x16xf32>,
    %210 = vector.extract_strided_slice %193 {offsets = [4, 0], sizes = [1, 16], strides = [1, 1]} : vector<12x16xf32> to vector<1x16xf32>
    %211 = vector.extract_strided_slice %193 {offsets = [5, 0], sizes = [1, 16], strides = [1, 1]} : vector<12x16xf32> to vector<1x16xf32>
    %212 = arith.maximumf %210, %211 : vector<1x16xf32>
    %213 = vector.extract_strided_slice %193 {offsets = [6, 0], sizes = [1, 16], strides = [1, 1]} : vector<12x16xf32> to vector<1x16xf32>
    %214 = arith.maximumf %212, %213 : vector<1x16xf32>
    %215 = vector.extract_strided_slice %193 {offsets = [7, 0], sizes = [1, 16], strides = [1, 1]} : vector<12x16xf32> to vector<1x16xf32>
    %216 = arith.maximumf %214, %215 : vector<1x16xf32>
    %c0_85 = arith.constant 0 : index
    %c2_86 = arith.constant 2 : index
    %c48_87 = arith.constant 48 : index
    %217 = vector.load %arg6[%c0_85, %c2_86, %c48_87] : memref<1x5x112xf32, #tpu.memory_space<vmem>>, vector<1x1x16xf32>
    %218 = vector.shape_cast %217 : vector<1x1x16xf32> to vector<1x16xf32>
    %219 = vector.shape_cast %216 : vector<1x16xf32> to vector<1x1x16xf32>
    tpu.vector_store %arg6[%c0_85, %c2_86, %c48_87], %219 {strides = array<i32>} : memref<1x5x112xf32, #tpu.memory_space<vmem>>, vector<1x1x16xf32>,
    %220 = vector.extract_strided_slice %193 {offsets = [7, 0], sizes = [1, 16], strides = [1, 1]} : vector<12x16xf32> to vector<1x16xf32>
    %221 = vector.extract_strided_slice %193 {offsets = [8, 0], sizes = [1, 16], strides = [1, 1]} : vector<12x16xf32> to vector<1x16xf32>
    %222 = arith.maximumf %220, %221 : vector<1x16xf32>
    %223 = vector.extract_strided_slice %193 {offsets = [9, 0], sizes = [1, 16], strides = [1, 1]} : vector<12x16xf32> to vector<1x16xf32>
    %224 = arith.maximumf %222, %223 : vector<1x16xf32>
    %c0_88 = arith.constant 0 : index
    %c3_89 = arith.constant 3 : index
    %c48_90 = arith.constant 48 : index
    %225 = vector.load %arg6[%c0_88, %c3_89, %c48_90] : memref<1x5x112xf32, #tpu.memory_space<vmem>>, vector<1x1x16xf32>
    %226 = vector.shape_cast %225 : vector<1x1x16xf32> to vector<1x16xf32>
    %227 = vector.shape_cast %224 : vector<1x16xf32> to vector<1x1x16xf32>
    tpu.vector_store %arg6[%c0_88, %c3_89, %c48_90], %227 {strides = array<i32>} : memref<1x5x112xf32, #tpu.memory_space<vmem>>, vector<1x1x16xf32>,
    %228 = vector.extract_strided_slice %193 {offsets = [9, 0], sizes = [1, 16], strides = [1, 1]} : vector<12x16xf32> to vector<1x16xf32>
    %229 = vector.extract_strided_slice %193 {offsets = [10, 0], sizes = [1, 16], strides = [1, 1]} : vector<12x16xf32> to vector<1x16xf32>
    %230 = arith.maximumf %228, %229 : vector<1x16xf32>
    %231 = vector.extract_strided_slice %193 {offsets = [11, 0], sizes = [1, 16], strides = [1, 1]} : vector<12x16xf32> to vector<1x16xf32>
    %232 = arith.maximumf %230, %231 : vector<1x16xf32>
    %c0_91 = arith.constant 0 : index
    %c4_92 = arith.constant 4 : index
    %c48_93 = arith.constant 48 : index
    %233 = vector.load %arg6[%c0_91, %c4_92, %c48_93] : memref<1x5x112xf32, #tpu.memory_space<vmem>>, vector<1x1x16xf32>
    %234 = vector.shape_cast %233 : vector<1x1x16xf32> to vector<1x16xf32>
    %235 = vector.shape_cast %232 : vector<1x16xf32> to vector<1x1x16xf32>
    tpu.vector_store %arg6[%c0_91, %c4_92, %c48_93], %235 {strides = array<i32>} : memref<1x5x112xf32, #tpu.memory_space<vmem>>, vector<1x1x16xf32>,
    %236 = vector.extract_strided_slice %51 {offsets = [0, 96], sizes = [12, 16], strides = [1, 1]} : vector<12x192xf32> to vector<12x16xf32>
    %237 = vector.extract_strided_slice %51 {offsets = [0, 112], sizes = [12, 16], strides = [1, 1]} : vector<12x192xf32> to vector<12x16xf32>
    %238 = arith.maximumf %236, %237 : vector<12x16xf32>
    %239 = vector.extract_strided_slice %51 {offsets = [0, 128], sizes = [12, 16], strides = [1, 1]} : vector<12x192xf32> to vector<12x16xf32>
    %240 = arith.maximumf %238, %239 : vector<12x16xf32>
    %241 = vector.extract_strided_slice %240 {offsets = [0, 0], sizes = [1, 16], strides = [1, 1]} : vector<12x16xf32> to vector<1x16xf32>
    %242 = vector.extract_strided_slice %240 {offsets = [1, 0], sizes = [1, 16], strides = [1, 1]} : vector<12x16xf32> to vector<1x16xf32>
    %243 = arith.maximumf %241, %242 : vector<1x16xf32>
    %244 = vector.extract_strided_slice %240 {offsets = [2, 0], sizes = [1, 16], strides = [1, 1]} : vector<12x16xf32> to vector<1x16xf32>
    %245 = arith.maximumf %243, %244 : vector<1x16xf32>
    %c0_94 = arith.constant 0 : index
    %c0_95 = arith.constant 0 : index
    %c64 = arith.constant 64 : index
    %246 = vector.load %arg6[%c0_94, %c0_95, %c64] : memref<1x5x112xf32, #tpu.memory_space<vmem>>, vector<1x1x16xf32>
    %247 = vector.shape_cast %246 : vector<1x1x16xf32> to vector<1x16xf32>
    %248 = vector.shape_cast %245 : vector<1x16xf32> to vector<1x1x16xf32>
    tpu.vector_store %arg6[%c0_94, %c0_95, %c64], %248 {strides = array<i32>} : memref<1x5x112xf32, #tpu.memory_space<vmem>>, vector<1x1x16xf32>,
    %249 = vector.extract_strided_slice %240 {offsets = [2, 0], sizes = [1, 16], strides = [1, 1]} : vector<12x16xf32> to vector<1x16xf32>
    %250 = vector.extract_strided_slice %240 {offsets = [3, 0], sizes = [1, 16], strides = [1, 1]} : vector<12x16xf32> to vector<1x16xf32>
    %251 = arith.maximumf %249, %250 : vector<1x16xf32>
    %252 = vector.extract_strided_slice %240 {offsets = [4, 0], sizes = [1, 16], strides = [1, 1]} : vector<12x16xf32> to vector<1x16xf32>
    %253 = arith.maximumf %251, %252 : vector<1x16xf32>
    %c0_96 = arith.constant 0 : index
    %c1_97 = arith.constant 1 : index
    %c64_98 = arith.constant 64 : index
    %254 = vector.load %arg6[%c0_96, %c1_97, %c64_98] : memref<1x5x112xf32, #tpu.memory_space<vmem>>, vector<1x1x16xf32>
    %255 = vector.shape_cast %254 : vector<1x1x16xf32> to vector<1x16xf32>
    %256 = vector.shape_cast %253 : vector<1x16xf32> to vector<1x1x16xf32>
    tpu.vector_store %arg6[%c0_96, %c1_97, %c64_98], %256 {strides = array<i32>} : memref<1x5x112xf32, #tpu.memory_space<vmem>>, vector<1x1x16xf32>,
    %257 = vector.extract_strided_slice %240 {offsets = [4, 0], sizes = [1, 16], strides = [1, 1]} : vector<12x16xf32> to vector<1x16xf32>
    %258 = vector.extract_strided_slice %240 {offsets = [5, 0], sizes = [1, 16], strides = [1, 1]} : vector<12x16xf32> to vector<1x16xf32>
    %259 = arith.maximumf %257, %258 : vector<1x16xf32>
    %260 = vector.extract_strided_slice %240 {offsets = [6, 0], sizes = [1, 16], strides = [1, 1]} : vector<12x16xf32> to vector<1x16xf32>
    %261 = arith.maximumf %259, %260 : vector<1x16xf32>
    %262 = vector.extract_strided_slice %240 {offsets = [7, 0], sizes = [1, 16], strides = [1, 1]} : vector<12x16xf32> to vector<1x16xf32>
    %263 = arith.maximumf %261, %262 : vector<1x16xf32>
    %c0_99 = arith.constant 0 : index
    %c2_100 = arith.constant 2 : index
    %c64_101 = arith.constant 64 : index
    %264 = vector.load %arg6[%c0_99, %c2_100, %c64_101] : memref<1x5x112xf32, #tpu.memory_space<vmem>>, vector<1x1x16xf32>
    %265 = vector.shape_cast %264 : vector<1x1x16xf32> to vector<1x16xf32>
    %266 = vector.shape_cast %263 : vector<1x16xf32> to vector<1x1x16xf32>
    tpu.vector_store %arg6[%c0_99, %c2_100, %c64_101], %266 {strides = array<i32>} : memref<1x5x112xf32, #tpu.memory_space<vmem>>, vector<1x1x16xf32>,
    %267 = vector.extract_strided_slice %240 {offsets = [7, 0], sizes = [1, 16], strides = [1, 1]} : vector<12x16xf32> to vector<1x16xf32>
    %268 = vector.extract_strided_slice %240 {offsets = [8, 0], sizes = [1, 16], strides = [1, 1]} : vector<12x16xf32> to vector<1x16xf32>
    %269 = arith.maximumf %267, %268 : vector<1x16xf32>
    %270 = vector.extract_strided_slice %240 {offsets = [9, 0], sizes = [1, 16], strides = [1, 1]} : vector<12x16xf32> to vector<1x16xf32>
    %271 = arith.maximumf %269, %270 : vector<1x16xf32>
    %c0_102 = arith.constant 0 : index
    %c3_103 = arith.constant 3 : index
    %c64_104 = arith.constant 64 : index
    %272 = vector.load %arg6[%c0_102, %c3_103, %c64_104] : memref<1x5x112xf32, #tpu.memory_space<vmem>>, vector<1x1x16xf32>
    %273 = vector.shape_cast %272 : vector<1x1x16xf32> to vector<1x16xf32>
    %274 = vector.shape_cast %271 : vector<1x16xf32> to vector<1x1x16xf32>
    tpu.vector_store %arg6[%c0_102, %c3_103, %c64_104], %274 {strides = array<i32>} : memref<1x5x112xf32, #tpu.memory_space<vmem>>, vector<1x1x16xf32>,
    %275 = vector.extract_strided_slice %240 {offsets = [9, 0], sizes = [1, 16], strides = [1, 1]} : vector<12x16xf32> to vector<1x16xf32>
    %276 = vector.extract_strided_slice %240 {offsets = [10, 0], sizes = [1, 16], strides = [1, 1]} : vector<12x16xf32> to vector<1x16xf32>
    %277 = arith.maximumf %275, %276 : vector<1x16xf32>
    %278 = vector.extract_strided_slice %240 {offsets = [11, 0], sizes = [1, 16], strides = [1, 1]} : vector<12x16xf32> to vector<1x16xf32>
    %279 = arith.maximumf %277, %278 : vector<1x16xf32>
    %c0_105 = arith.constant 0 : index
    %c4_106 = arith.constant 4 : index
    %c64_107 = arith.constant 64 : index
    %280 = vector.load %arg6[%c0_105, %c4_106, %c64_107] : memref<1x5x112xf32, #tpu.memory_space<vmem>>, vector<1x1x16xf32>
    %281 = vector.shape_cast %280 : vector<1x1x16xf32> to vector<1x16xf32>
    %282 = vector.shape_cast %279 : vector<1x16xf32> to vector<1x1x16xf32>
    tpu.vector_store %arg6[%c0_105, %c4_106, %c64_107], %282 {strides = array<i32>} : memref<1x5x112xf32, #tpu.memory_space<vmem>>, vector<1x1x16xf32>,
    %283 = vector.extract_strided_slice %51 {offsets = [0, 128], sizes = [12, 16], strides = [1, 1]} : vector<12x192xf32> to vector<12x16xf32>
    %284 = vector.extract_strided_slice %51 {offsets = [0, 144], sizes = [12, 16], strides = [1, 1]} : vector<12x192xf32> to vector<12x16xf32>
    %285 = arith.maximumf %283, %284 : vector<12x16xf32>
    %286 = vector.extract_strided_slice %51 {offsets = [0, 160], sizes = [12, 16], strides = [1, 1]} : vector<12x192xf32> to vector<12x16xf32>
    %287 = arith.maximumf %285, %286 : vector<12x16xf32>
    %288 = vector.extract_strided_slice %287 {offsets = [0, 0], sizes = [1, 16], strides = [1, 1]} : vector<12x16xf32> to vector<1x16xf32>
    %289 = vector.extract_strided_slice %287 {offsets = [1, 0], sizes = [1, 16], strides = [1, 1]} : vector<12x16xf32> to vector<1x16xf32>
    %290 = arith.maximumf %288, %289 : vector<1x16xf32>
    %291 = vector.extract_strided_slice %287 {offsets = [2, 0], sizes = [1, 16], strides = [1, 1]} : vector<12x16xf32> to vector<1x16xf32>
    %292 = arith.maximumf %290, %291 : vector<1x16xf32>
    %c0_108 = arith.constant 0 : index
    %c0_109 = arith.constant 0 : index
    %c80 = arith.constant 80 : index
    %293 = vector.load %arg6[%c0_108, %c0_109, %c80] : memref<1x5x112xf32, #tpu.memory_space<vmem>>, vector<1x1x16xf32>
    %294 = vector.shape_cast %293 : vector<1x1x16xf32> to vector<1x16xf32>
    %295 = vector.shape_cast %292 : vector<1x16xf32> to vector<1x1x16xf32>
    tpu.vector_store %arg6[%c0_108, %c0_109, %c80], %295 {strides = array<i32>} : memref<1x5x112xf32, #tpu.memory_space<vmem>>, vector<1x1x16xf32>,
    %296 = vector.extract_strided_slice %287 {offsets = [2, 0], sizes = [1, 16], strides = [1, 1]} : vector<12x16xf32> to vector<1x16xf32>
    %297 = vector.extract_strided_slice %287 {offsets = [3, 0], sizes = [1, 16], strides = [1, 1]} : vector<12x16xf32> to vector<1x16xf32>
    %298 = arith.maximumf %296, %297 : vector<1x16xf32>
    %299 = vector.extract_strided_slice %287 {offsets = [4, 0], sizes = [1, 16], strides = [1, 1]} : vector<12x16xf32> to vector<1x16xf32>
    %300 = arith.maximumf %298, %299 : vector<1x16xf32>
    %c0_110 = arith.constant 0 : index
    %c1_111 = arith.constant 1 : index
    %c80_112 = arith.constant 80 : index
    %301 = vector.load %arg6[%c0_110, %c1_111, %c80_112] : memref<1x5x112xf32, #tpu.memory_space<vmem>>, vector<1x1x16xf32>
    %302 = vector.shape_cast %301 : vector<1x1x16xf32> to vector<1x16xf32>
    %303 = vector.shape_cast %300 : vector<1x16xf32> to vector<1x1x16xf32>
    tpu.vector_store %arg6[%c0_110, %c1_111, %c80_112], %303 {strides = array<i32>} : memref<1x5x112xf32, #tpu.memory_space<vmem>>, vector<1x1x16xf32>,
    %304 = vector.extract_strided_slice %287 {offsets = [4, 0], sizes = [1, 16], strides = [1, 1]} : vector<12x16xf32> to vector<1x16xf32>
    %305 = vector.extract_strided_slice %287 {offsets = [5, 0], sizes = [1, 16], strides = [1, 1]} : vector<12x16xf32> to vector<1x16xf32>
    %306 = arith.maximumf %304, %305 : vector<1x16xf32>
    %307 = vector.extract_strided_slice %287 {offsets = [6, 0], sizes = [1, 16], strides = [1, 1]} : vector<12x16xf32> to vector<1x16xf32>
    %308 = arith.maximumf %306, %307 : vector<1x16xf32>
    %309 = vector.extract_strided_slice %287 {offsets = [7, 0], sizes = [1, 16], strides = [1, 1]} : vector<12x16xf32> to vector<1x16xf32>
    %310 = arith.maximumf %308, %309 : vector<1x16xf32>
    %c0_113 = arith.constant 0 : index
    %c2_114 = arith.constant 2 : index
    %c80_115 = arith.constant 80 : index
    %311 = vector.load %arg6[%c0_113, %c2_114, %c80_115] : memref<1x5x112xf32, #tpu.memory_space<vmem>>, vector<1x1x16xf32>
    %312 = vector.shape_cast %311 : vector<1x1x16xf32> to vector<1x16xf32>
    %313 = vector.shape_cast %310 : vector<1x16xf32> to vector<1x1x16xf32>
    tpu.vector_store %arg6[%c0_113, %c2_114, %c80_115], %313 {strides = array<i32>} : memref<1x5x112xf32, #tpu.memory_space<vmem>>, vector<1x1x16xf32>,
    %314 = vector.extract_strided_slice %287 {offsets = [7, 0], sizes = [1, 16], strides = [1, 1]} : vector<12x16xf32> to vector<1x16xf32>
    %315 = vector.extract_strided_slice %287 {offsets = [8, 0], sizes = [1, 16], strides = [1, 1]} : vector<12x16xf32> to vector<1x16xf32>
    %316 = arith.maximumf %314, %315 : vector<1x16xf32>
    %317 = vector.extract_strided_slice %287 {offsets = [9, 0], sizes = [1, 16], strides = [1, 1]} : vector<12x16xf32> to vector<1x16xf32>
    %318 = arith.maximumf %316, %317 : vector<1x16xf32>
    %c0_116 = arith.constant 0 : index
    %c3_117 = arith.constant 3 : index
    %c80_118 = arith.constant 80 : index
    %319 = vector.load %arg6[%c0_116, %c3_117, %c80_118] : memref<1x5x112xf32, #tpu.memory_space<vmem>>, vector<1x1x16xf32>
    %320 = vector.shape_cast %319 : vector<1x1x16xf32> to vector<1x16xf32>
    %321 = vector.shape_cast %318 : vector<1x16xf32> to vector<1x1x16xf32>
    tpu.vector_store %arg6[%c0_116, %c3_117, %c80_118], %321 {strides = array<i32>} : memref<1x5x112xf32, #tpu.memory_space<vmem>>, vector<1x1x16xf32>,
    %322 = vector.extract_strided_slice %287 {offsets = [9, 0], sizes = [1, 16], strides = [1, 1]} : vector<12x16xf32> to vector<1x16xf32>
    %323 = vector.extract_strided_slice %287 {offsets = [10, 0], sizes = [1, 16], strides = [1, 1]} : vector<12x16xf32> to vector<1x16xf32>
    %324 = arith.maximumf %322, %323 : vector<1x16xf32>
    %325 = vector.extract_strided_slice %287 {offsets = [11, 0], sizes = [1, 16], strides = [1, 1]} : vector<12x16xf32> to vector<1x16xf32>
    %326 = arith.maximumf %324, %325 : vector<1x16xf32>
    %c0_119 = arith.constant 0 : index
    %c4_120 = arith.constant 4 : index
    %c80_121 = arith.constant 80 : index
    %327 = vector.load %arg6[%c0_119, %c4_120, %c80_121] : memref<1x5x112xf32, #tpu.memory_space<vmem>>, vector<1x1x16xf32>
    %328 = vector.shape_cast %327 : vector<1x1x16xf32> to vector<1x16xf32>
    %329 = vector.shape_cast %326 : vector<1x16xf32> to vector<1x1x16xf32>
    tpu.vector_store %arg6[%c0_119, %c4_120, %c80_121], %329 {strides = array<i32>} : memref<1x5x112xf32, #tpu.memory_space<vmem>>, vector<1x1x16xf32>,
    %330 = vector.extract_strided_slice %51 {offsets = [0, 160], sizes = [12, 16], strides = [1, 1]} : vector<12x192xf32> to vector<12x16xf32>
    %331 = vector.extract_strided_slice %51 {offsets = [0, 176], sizes = [12, 16], strides = [1, 1]} : vector<12x192xf32> to vector<12x16xf32>
    %332 = arith.maximumf %330, %331 : vector<12x16xf32>
    %333 = vector.extract_strided_slice %332 {offsets = [0, 0], sizes = [1, 16], strides = [1, 1]} : vector<12x16xf32> to vector<1x16xf32>
    %334 = vector.extract_strided_slice %332 {offsets = [1, 0], sizes = [1, 16], strides = [1, 1]} : vector<12x16xf32> to vector<1x16xf32>
    %335 = arith.maximumf %333, %334 : vector<1x16xf32>
    %336 = vector.extract_strided_slice %332 {offsets = [2, 0], sizes = [1, 16], strides = [1, 1]} : vector<12x16xf32> to vector<1x16xf32>
    %337 = arith.maximumf %335, %336 : vector<1x16xf32>
    %c0_122 = arith.constant 0 : index
    %c0_123 = arith.constant 0 : index
    %c96 = arith.constant 96 : index
    %338 = vector.load %arg6[%c0_122, %c0_123, %c96] : memref<1x5x112xf32, #tpu.memory_space<vmem>>, vector<1x1x16xf32>
    %339 = vector.shape_cast %338 : vector<1x1x16xf32> to vector<1x16xf32>
    %340 = vector.shape_cast %337 : vector<1x16xf32> to vector<1x1x16xf32>
    tpu.vector_store %arg6[%c0_122, %c0_123, %c96], %340 {strides = array<i32>} : memref<1x5x112xf32, #tpu.memory_space<vmem>>, vector<1x1x16xf32>,
    %341 = vector.extract_strided_slice %332 {offsets = [2, 0], sizes = [1, 16], strides = [1, 1]} : vector<12x16xf32> to vector<1x16xf32>
    %342 = vector.extract_strided_slice %332 {offsets = [3, 0], sizes = [1, 16], strides = [1, 1]} : vector<12x16xf32> to vector<1x16xf32>
    %343 = arith.maximumf %341, %342 : vector<1x16xf32>
    %344 = vector.extract_strided_slice %332 {offsets = [4, 0], sizes = [1, 16], strides = [1, 1]} : vector<12x16xf32> to vector<1x16xf32>
    %345 = arith.maximumf %343, %344 : vector<1x16xf32>
    %c0_124 = arith.constant 0 : index
    %c1_125 = arith.constant 1 : index
    %c96_126 = arith.constant 96 : index
    %346 = vector.load %arg6[%c0_124, %c1_125, %c96_126] : memref<1x5x112xf32, #tpu.memory_space<vmem>>, vector<1x1x16xf32>
    %347 = vector.shape_cast %346 : vector<1x1x16xf32> to vector<1x16xf32>
    %348 = vector.shape_cast %345 : vector<1x16xf32> to vector<1x1x16xf32>
    tpu.vector_store %arg6[%c0_124, %c1_125, %c96_126], %348 {strides = array<i32>} : memref<1x5x112xf32, #tpu.memory_space<vmem>>, vector<1x1x16xf32>,
    %349 = vector.extract_strided_slice %332 {offsets = [4, 0], sizes = [1, 16], strides = [1, 1]} : vector<12x16xf32> to vector<1x16xf32>
    %350 = vector.extract_strided_slice %332 {offsets = [5, 0], sizes = [1, 16], strides = [1, 1]} : vector<12x16xf32> to vector<1x16xf32>
    %351 = arith.maximumf %349, %350 : vector<1x16xf32>
    %352 = vector.extract_strided_slice %332 {offsets = [6, 0], sizes = [1, 16], strides = [1, 1]} : vector<12x16xf32> to vector<1x16xf32>
    %353 = arith.maximumf %351, %352 : vector<1x16xf32>
    %354 = vector.extract_strided_slice %332 {offsets = [7, 0], sizes = [1, 16], strides = [1, 1]} : vector<12x16xf32> to vector<1x16xf32>
    %355 = arith.maximumf %353, %354 : vector<1x16xf32>
    %c0_127 = arith.constant 0 : index
    %c2_128 = arith.constant 2 : index
    %c96_129 = arith.constant 96 : index
    %356 = vector.load %arg6[%c0_127, %c2_128, %c96_129] : memref<1x5x112xf32, #tpu.memory_space<vmem>>, vector<1x1x16xf32>
    %357 = vector.shape_cast %356 : vector<1x1x16xf32> to vector<1x16xf32>
    %358 = vector.shape_cast %355 : vector<1x16xf32> to vector<1x1x16xf32>
    tpu.vector_store %arg6[%c0_127, %c2_128, %c96_129], %358 {strides = array<i32>} : memref<1x5x112xf32, #tpu.memory_space<vmem>>, vector<1x1x16xf32>,
    %359 = vector.extract_strided_slice %332 {offsets = [7, 0], sizes = [1, 16], strides = [1, 1]} : vector<12x16xf32> to vector<1x16xf32>
    %360 = vector.extract_strided_slice %332 {offsets = [8, 0], sizes = [1, 16], strides = [1, 1]} : vector<12x16xf32> to vector<1x16xf32>
    %361 = arith.maximumf %359, %360 : vector<1x16xf32>
    %362 = vector.extract_strided_slice %332 {offsets = [9, 0], sizes = [1, 16], strides = [1, 1]} : vector<12x16xf32> to vector<1x16xf32>
    %363 = arith.maximumf %361, %362 : vector<1x16xf32>
    %c0_130 = arith.constant 0 : index
    %c3_131 = arith.constant 3 : index
    %c96_132 = arith.constant 96 : index
    %364 = vector.load %arg6[%c0_130, %c3_131, %c96_132] : memref<1x5x112xf32, #tpu.memory_space<vmem>>, vector<1x1x16xf32>
    %365 = vector.shape_cast %364 : vector<1x1x16xf32> to vector<1x16xf32>
    %366 = vector.shape_cast %363 : vector<1x16xf32> to vector<1x1x16xf32>
    tpu.vector_store %arg6[%c0_130, %c3_131, %c96_132], %366 {strides = array<i32>} : memref<1x5x112xf32, #tpu.memory_space<vmem>>, vector<1x1x16xf32>,
    %367 = vector.extract_strided_slice %332 {offsets = [9, 0], sizes = [1, 16], strides = [1, 1]} : vector<12x16xf32> to vector<1x16xf32>
    %368 = vector.extract_strided_slice %332 {offsets = [10, 0], sizes = [1, 16], strides = [1, 1]} : vector<12x16xf32> to vector<1x16xf32>
    %369 = arith.maximumf %367, %368 : vector<1x16xf32>
    %370 = vector.extract_strided_slice %332 {offsets = [11, 0], sizes = [1, 16], strides = [1, 1]} : vector<12x16xf32> to vector<1x16xf32>
    %371 = arith.maximumf %369, %370 : vector<1x16xf32>
    %c0_133 = arith.constant 0 : index
    %c4_134 = arith.constant 4 : index
    %c96_135 = arith.constant 96 : index
    %372 = vector.load %arg6[%c0_133, %c4_134, %c96_135] : memref<1x5x112xf32, #tpu.memory_space<vmem>>, vector<1x1x16xf32>
    %373 = vector.shape_cast %372 : vector<1x1x16xf32> to vector<1x16xf32>
    %374 = vector.shape_cast %371 : vector<1x16xf32> to vector<1x1x16xf32>
    tpu.vector_store %arg6[%c0_133, %c4_134, %c96_135], %374 {strides = array<i32>} : memref<1x5x112xf32, #tpu.memory_space<vmem>>, vector<1x1x16xf32>,
    return
  }
  func.func @transform_0(%arg0: i32) -> (i32, i32, i32) {
    %c0_i32 = arith.constant 0 : i32
    %c0_i32_0 = arith.constant 0 : i32
    %c0_i32_1 = arith.constant 0 : i32
    return %arg0, %c0_i32, %c0_i32_0 : i32, i32, i32
  }
  func.func @transform_1(%arg0: i32) -> (i32, i32, i32) {
    %c0_i32 = arith.constant 0 : i32
    %c0_i32_0 = arith.constant 0 : i32
    %c0_i32_1 = arith.constant 0 : i32
    %c0_i32_2 = arith.constant 0 : i32
    return %c0_i32, %c0_i32_0, %c0_i32_1 : i32, i32, i32
  }
  func.func @transform_2(%arg0: i32) -> (i32, i32) {
    %c0_i32 = arith.constant 0 : i32
    %c0_i32_0 = arith.constant 0 : i32
    %c0_i32_1 = arith.constant 0 : i32
    return %c0_i32, %c0_i32_0 : i32, i32
  }
  func.func @transform_3(%arg0: i32) -> (i32, i32, i32) {
    %c0_i32 = arith.constant 0 : i32
    %c0_i32_0 = arith.constant 0 : i32
    %c0_i32_1 = arith.constant 0 : i32
    %c0_i32_2 = arith.constant 0 : i32
    return %c0_i32, %c0_i32_0, %c0_i32_1 : i32, i32, i32
  }
  func.func @transform_4(%arg0: i32) -> (i32, i32) {
    %c0_i32 = arith.constant 0 : i32
    %c0_i32_0 = arith.constant 0 : i32
    %c0_i32_1 = arith.constant 0 : i32
    return %c0_i32, %c0_i32_0 : i32, i32
  }
  func.func @transform_5(%arg0: i32) -> (i32, i32, i32) {
    %c0_i32 = arith.constant 0 : i32
    %c0_i32_0 = arith.constant 0 : i32
    %c0_i32_1 = arith.constant 0 : i32
    return %arg0, %c0_i32, %c0_i32_0 : i32, i32, i32
  }
}

module attributes {stable_mosaic.version = 11 : i64} {
  func.func @_mlp_kernel(%arg0: i32, %arg1: memref<2x560xf32, #tpu.memory_space<vmem>>, %arg2: memref<560x120xf32, #tpu.memory_space<vmem>>, %arg3: memref<1x120xf32, #tpu.memory_space<vmem>>, %arg4: memref<120x84xf32, #tpu.memory_space<vmem>>, %arg5: memref<1x84xf32, #tpu.memory_space<vmem>>, %arg6: memref<84x2xf32, #tpu.memory_space<vmem>>, %arg7: memref<1x2xf32, #tpu.memory_space<vmem>>, %arg8: memref<2x2xf32, #tpu.memory_space<vmem>>) attributes {dimension_semantics = [#tpu.dimension_semantics<arbitrary>], iteration_bounds = array<i64: 1>, scalar_prefetch = 0 : i64, scratch_operands = 0 : i64, tpu.core_type = #tpu.core_type<tc>, window_params = [{pipeline_mode = #tpu.pipeline_mode<synchronous>, transform_indices = @transform_0, window_bounds = array<i64: 2, 560>}, {pipeline_mode = #tpu.pipeline_mode<synchronous>, transform_indices = @transform_1, window_bounds = array<i64: 560, 120>}, {pipeline_mode = #tpu.pipeline_mode<synchronous>, transform_indices = @transform_2, window_bounds = array<i64: 1, 120>}, {pipeline_mode = #tpu.pipeline_mode<synchronous>, transform_indices = @transform_3, window_bounds = array<i64: 120, 84>}, {pipeline_mode = #tpu.pipeline_mode<synchronous>, transform_indices = @transform_4, window_bounds = array<i64: 1, 84>}, {pipeline_mode = #tpu.pipeline_mode<synchronous>, transform_indices = @transform_5, window_bounds = array<i64: 84, 2>}, {pipeline_mode = #tpu.pipeline_mode<synchronous>, transform_indices = @transform_6, window_bounds = array<i64: 1, 2>}, {pipeline_mode = #tpu.pipeline_mode<synchronous>, transform_indices = @transform_7, window_bounds = array<i64: 2, 2>}]} {
    %c0 = arith.constant 0 : index
    %c0_0 = arith.constant 0 : index
    %0 = vector.load %arg1[%c0, %c0_0] : memref<2x560xf32, #tpu.memory_space<vmem>>, vector<2x560xf32>
    %c0_1 = arith.constant 0 : index
    %c0_2 = arith.constant 0 : index
    %1 = vector.load %arg2[%c0_1, %c0_2] : memref<560x120xf32, #tpu.memory_space<vmem>>, vector<560x120xf32>
    %cst = arith.constant dense<0.000000e+00> : vector<2x120xf32>
    %2 = tpu.matmul %0, %1, %cst {dimension_numbers = #tpu.dot_dimension_numbers<[1], [0], [0], [1], [0, 0, 1, 1], [], []>} : vector<2x560xf32>, vector<560x120xf32>, vector<2x120xf32> -> vector<2x120xf32>
    %c0_3 = arith.constant 0 : index
    %c0_4 = arith.constant 0 : index
    %3 = vector.load %arg3[%c0_3, %c0_4] : memref<1x120xf32, #tpu.memory_space<vmem>>, vector<1x120xf32>
    %4 = vector.broadcast %3 : vector<1x120xf32> to vector<2x120xf32>
    %5 = arith.addf %2, %4 : vector<2x120xf32>
    %cst_5 = arith.constant 0.000000e+00 : f32
    %6 = vector.broadcast %cst_5 : f32 to vector<2x120xf32>
    %7 = arith.maximumf %5, %6 : vector<2x120xf32>
    %c0_6 = arith.constant 0 : index
    %c0_7 = arith.constant 0 : index
    %8 = vector.load %arg4[%c0_6, %c0_7] : memref<120x84xf32, #tpu.memory_space<vmem>>, vector<120x84xf32>
    %cst_8 = arith.constant dense<0.000000e+00> : vector<2x84xf32>
    %9 = tpu.matmul %7, %8, %cst_8 {dimension_numbers = #tpu.dot_dimension_numbers<[1], [0], [0], [1], [0, 0, 1, 1], [], []>} : vector<2x120xf32>, vector<120x84xf32>, vector<2x84xf32> -> vector<2x84xf32>
    %c0_9 = arith.constant 0 : index
    %c0_10 = arith.constant 0 : index
    %10 = vector.load %arg5[%c0_9, %c0_10] : memref<1x84xf32, #tpu.memory_space<vmem>>, vector<1x84xf32>
    %11 = vector.broadcast %10 : vector<1x84xf32> to vector<2x84xf32>
    %12 = arith.addf %9, %11 : vector<2x84xf32>
    %cst_11 = arith.constant 0.000000e+00 : f32
    %13 = vector.broadcast %cst_11 : f32 to vector<2x84xf32>
    %14 = arith.maximumf %12, %13 : vector<2x84xf32>
    %c0_12 = arith.constant 0 : index
    %c0_13 = arith.constant 0 : index
    %15 = vector.load %arg6[%c0_12, %c0_13] : memref<84x2xf32, #tpu.memory_space<vmem>>, vector<84x2xf32>
    %cst_14 = arith.constant dense<0.000000e+00> : vector<2x2xf32>
    %16 = tpu.matmul %14, %15, %cst_14 {dimension_numbers = #tpu.dot_dimension_numbers<[1], [0], [0], [1], [0, 0, 1, 1], [], []>} : vector<2x84xf32>, vector<84x2xf32>, vector<2x2xf32> -> vector<2x2xf32>
    %c0_15 = arith.constant 0 : index
    %c0_16 = arith.constant 0 : index
    %17 = vector.load %arg7[%c0_15, %c0_16] : memref<1x2xf32, #tpu.memory_space<vmem>>, vector<1x2xf32>
    %18 = vector.broadcast %17 : vector<1x2xf32> to vector<2x2xf32>
    %19 = arith.addf %16, %18 : vector<2x2xf32>
    %c0_17 = arith.constant 0 : index
    %c0_18 = arith.constant 0 : index
    %20 = vector.load %arg8[%c0_17, %c0_18] : memref<2x2xf32, #tpu.memory_space<vmem>>, vector<2x2xf32>
    tpu.vector_store %arg8[%c0_17, %c0_18], %19 {strides = array<i32>} : memref<2x2xf32, #tpu.memory_space<vmem>>, vector<2x2xf32>,
    return
  }
  func.func @transform_0(%arg0: i32) -> (i32, i32) {
    %c0_i32 = arith.constant 0 : i32
    %c0_i32_0 = arith.constant 0 : i32
    %c0_i32_1 = arith.constant 0 : i32
    return %c0_i32, %c0_i32_0 : i32, i32
  }
  func.func @transform_1(%arg0: i32) -> (i32, i32) {
    %c0_i32 = arith.constant 0 : i32
    %c0_i32_0 = arith.constant 0 : i32
    %c0_i32_1 = arith.constant 0 : i32
    return %c0_i32, %c0_i32_0 : i32, i32
  }
  func.func @transform_2(%arg0: i32) -> (i32, i32) {
    %c0_i32 = arith.constant 0 : i32
    %c0_i32_0 = arith.constant 0 : i32
    %c0_i32_1 = arith.constant 0 : i32
    return %c0_i32, %c0_i32_0 : i32, i32
  }
  func.func @transform_3(%arg0: i32) -> (i32, i32) {
    %c0_i32 = arith.constant 0 : i32
    %c0_i32_0 = arith.constant 0 : i32
    %c0_i32_1 = arith.constant 0 : i32
    return %c0_i32, %c0_i32_0 : i32, i32
  }
  func.func @transform_4(%arg0: i32) -> (i32, i32) {
    %c0_i32 = arith.constant 0 : i32
    %c0_i32_0 = arith.constant 0 : i32
    %c0_i32_1 = arith.constant 0 : i32
    return %c0_i32, %c0_i32_0 : i32, i32
  }
  func.func @transform_5(%arg0: i32) -> (i32, i32) {
    %c0_i32 = arith.constant 0 : i32
    %c0_i32_0 = arith.constant 0 : i32
    %c0_i32_1 = arith.constant 0 : i32
    return %c0_i32, %c0_i32_0 : i32, i32
  }
  func.func @transform_6(%arg0: i32) -> (i32, i32) {
    %c0_i32 = arith.constant 0 : i32
    %c0_i32_0 = arith.constant 0 : i32
    %c0_i32_1 = arith.constant 0 : i32
    return %c0_i32, %c0_i32_0 : i32, i32
  }
  func.func @transform_7(%arg0: i32) -> (i32, i32) {
    %c0_i32 = arith.constant 0 : i32
    %c0_i32_0 = arith.constant 0 : i32
    %c0_i32_1 = arith.constant 0 : i32
    return %c0_i32, %c0_i32_0 : i32, i32
  }
}

</mosaic_0001>

<bundles_post_ra>
// kernel: tile.13
= control target key start
LH: loop header
LB: loop body
LE: loop exit
PB: predicated region body
PF: predicated region fallthrough
CT: control target
= control target key end

     0   :  { %s40_s0 = inlined_call_operand.vmem [shape: f32[6], index: 0, kind: input, shape index: {}]   ;;  %s41_s1 = inlined_call_operand.vmem [shape: f32[28,6], index: 1, kind: output, shape index: {}]  }
   0x1   :  { %v4_v0 = vld [vmem:[%s40_s0] ss:$0 sm:$0xff] }
   0x2   :  { %5 = vst [vmem:[%s41_s1] sm:$0xff] %v4_v0  ;;  %12 = vst [vmem:[%s41_s1 + $0x8] sm:$0xff] %v4_v0 }
   0x3   :  { %13 = vst [vmem:[%s41_s1 + $0x10] sm:$0xff] %v4_v0  ;;  %14 = vst [vmem:[%s41_s1 + $0x18] sm:$0xff] %v4_v0 }

// kernel: tile.14
= control target key start
LH: loop header
LB: loop body
LE: loop exit
PB: predicated region body
PF: predicated region fallthrough
CT: control target
= control target key end

     0   :  { %vm9_vm0 = vcmask 15360   ;;  %s247_s12 = smov 126   ;;  %s248_s13 = smov 114   ;;  %vm3_vm1 = vcmask 48128   ;;  %vm13_vm2 = vcmask 31744   ;;  %vm16_vm3 = vcmask 1048560   ;;  %s377_s0 = inlined_call_operand.vmem [shape: f32[28,6], index: 0, kind: input, shape index: {}]   ;;  %s378_s1 = inlined_call_operand.vmem [shape: f32[1,168], index: 1, kind: output, shape index: {}]  }
   0x1   :  { %v191_v0 = vld [vmem:[%s377_s0 + $0x15] sm:$0x1]   ;;  %v194_v3 = vld [vmem:[%s377_s0 + $0x13] sm:$0x1]   ;;  %v193_v4 = vld [vmem:[%s377_s0 + $0x14] sm:$0x1]  }
   0x2   :  { %v192_v1 = vld [vmem:[%s377_s0 + $0x15] sm:$0x1]   ;;  %26 = vrot.lane.b32.xlu1 %v194_v3, %s248_s13  ;;  %v195_v5 = vld [vmem:[%s377_s0 + $0x12] sm:$0x1]   ;;  %s249_s18 = smov 120   ;;  %s250_s19 = smov 108  }
   0x3   :  { %v10_v2 = vsel %vm9_vm0, %v192_v1, %v191_v0  ;;  %v196_v6 = vld [vmem:[%s377_s0 + $0x11] sm:$0x1]   ;;  %v197_v7 = vld [vmem:[%s377_s0 + $0x10] sm:$0x1]   ;;  %s251_s24 = smov 102   ;;  %s252_s25 = smov 96  }
   0x4   :  { %11 = vrot.lane.b32.xlu0 %v10_v2, %s247_s12  ;;  %v198_v8 = vld [vmem:[%s377_s0 + $0xf] sm:$0x1]   ;;  %v199_v9 = vld [vmem:[%s377_s0 + $0xe] sm:$0x1]   ;;  %s253_s30 = smov 90   ;;  %s254_s2 = smov 84  }
   0x5   :  { %v2_v10 = vld [vmem:[%s377_s0] sm:$0x1]   ;;  %v200_v11 = vld [vmem:[%s377_s0 + $0xd] sm:$0x1]   ;;  %v201_v12 = vld [vmem:[%s377_s0 + $0xc] sm:$0x1]  }
   0x6   :  { %32 = vrot.lane.b32.xlu1 %v195_v5, %s250_s19  ;;  %4 = vst.msk [vmem:[#allocation0] sm:$0x1] %vm3_vm1, %v2_v10   ;;  %s255_s9 = smov 78   ;;  %s256_s10 = smov 72   ;;  %v202_v13 = vld [vmem:[%s377_s0 + $0xb] sm:$0x1]  }
   0x7   :  { %v203_v14 = vld [vmem:[%s377_s0 + $0xa] sm:$0x1]   ;;  %s257_s15 = smov 66   ;;  %s258_s16 = smov 60   ;;  %v204_v15 = vld [vmem:[%s377_s0 + $0x9] sm:$0x1]  }
   0x8   :  { %20 = vrot.lane.b32.xlu0 %v193_v4, %s249_s18  ;;  %v205_v16 = vld [vmem:[%s377_s0 + $0x8] sm:$0x1]   ;;  %s259_s21 = smov 54   ;;  %s260_s22 = smov 48   ;;  %v206_v17 = vld [vmem:[%s377_s0 + $0x7] sm:$0x1]  }
   0x9   :  { %v207_v18 = vld [vmem:[%s377_s0 + $0x6] sm:$0x1]   ;;  %s261_s27 = smov 42   ;;  %s262_s28 = smov 36   ;;  %v208_v19 = vld [vmem:[%s377_s0 + $0x1b] sm:$0x1]  }
   0xa   :  { %44 = vrot.lane.b32.xlu1 %v197_v7, %s252_s25  ;;  %v209_v20 = vld [vmem:[%s377_s0 + $0x5] sm:$0x1]   ;;  %s263_s4 = smov 34   ;;  %s264_s5 = smov 30   ;;  %v210_v21 = vld [vmem:[%s377_s0 + $0x1a] sm:$0x1]  }
   0xb   :  { %v211_v22 = vld [vmem:[%s377_s0 + $0x4] sm:$0x1]   ;;  %s266_s11 = smov 24   ;;  %v212_v23 = vld [vmem:[%s377_s0 + $0x19] sm:$0x1]   ;;  %s268_s17 = smov 18  }
   0xc   :  { %38 = vrot.lane.b32.xlu0 %v196_v6, %s251_s24  ;;  %v213_v24 = vld [vmem:[%s377_s0 + $0x3] sm:$0x1]   ;;  %v214_v25 = vld [vmem:[%s377_s0 + $0x18] sm:$0x1]   ;;  %v215_v26 = vld [vmem:[%s377_s0 + $0x2] sm:$0x1]  }
   0xd   :  { %s270_s23 = smov 12   ;;  %v216_v27 = vld [vmem:[%s377_s0 + $0x17] sm:$0x1]   ;;  %v217_v28 = vld [vmem:[%s377_s0 + $0x1] sm:$0x1]   ;;  %s272_s29 = smov 6  }
   0xe   :  { %56 = vrot.lane.b32.xlu1 %v199_v9, %s254_s2  ;;  %v218_v29 = vld [vmem:[%s377_s0 + $0x16] sm:$0x1]   ;;  %s273_s0 = smov 4   ;;  %vm22_vm4 = vcmask 1032128   ;;  %vm28_vm5 = vcmask 982928   ;;  %vm34_vm6 = vcmask 933728  }
   0xf   :  { %vm40_vm7 = vcmask 884528   ;;  %vm46_vm8 = vcmask 835328   ;;  %vm52_vm9 = vcmask 786128   ;;  %vm58_vm10 = vcmask 736928  }
  0x10   :  { %50 = vrot.lane.b32.xlu0 %v198_v8, %s253_s30  ;;  %vm64_vm11 = vcmask 687728   ;;  %vm70_vm12 = vcmask 638528   ;;  %vm76_vm13 = vcmask 589328   ;;  %vm82_vm14 = vcmask 540128  }
  0x11   :  { %vm88_vm15 = vcmask 490928   ;;  %vm94_vm0 = vcmask 441728   ;;  %vm100_vm1 = vcmask 392528  }
  0x12   :  { %68 = vrot.lane.b32.xlu1 %v201_v12, %s256_s10  ;;  %s265_s10 = smov 28  }
  0x14   :  { %62 = vrot.lane.b32.xlu0 %v200_v11, %s255_s9 }
  0x16   :  { %80 = vrot.lane.b32.xlu1 %v203_v14, %s258_s16  ;;  %s267_s16 = smov 22  }
  0x18   :  { %74 = vrot.lane.b32.xlu0 %v202_v13, %s257_s15 }
  0x1a   :  { %92 = vrot.lane.b32.xlu1 %v205_v16, %s260_s22  ;;  %s269_s22 = smov 16  }
  0x1c   :  { %86 = vrot.lane.b32.xlu0 %v204_v15, %s259_s21 }
  0x1e   :  { %104 = vrot.lane.b32.xlu1 %v207_v18, %s262_s28  ;;  %s271_s28 = smov 10  }
  0x20   :  { %98 = vrot.lane.b32.xlu0 %v206_v17, %s261_s27 }
  0x22   :  { %117 = vrot.lane.b32.xlu1 %v209_v20, %s264_s5 }
  0x24   :  { %110 = vrot.lane.b32.xlu0 %v208_v19, %s263_s4 }
  0x26   :  { %130 = vrot.lane.b32.xlu1 %v211_v22, %s266_s11 }
  0x28   :  { %123 = vrot.lane.b32.xlu0 %v210_v21, %s265_s10 }
  0x2a   :  { %143 = vrot.lane.b32.xlu1 %v213_v24, %s268_s17 }
  0x2c   :  { %136 = vrot.lane.b32.xlu0 %v212_v23, %s267_s16 }
  0x2e   :  { %156 = vrot.lane.b32.xlu1 %v215_v26, %s270_s23 }
  0x30   :  { %149 = vrot.lane.b32.xlu0 %v214_v25, %s269_s22 }
  0x32   :  { %169 = vrot.lane.b32.xlu1 %v217_v28, %s272_s29 }
  0x34   :  { %162 = vrot.lane.b32.xlu0 %v216_v27, %s271_s28 }
  0x38   :  { %175 = vrot.lane.b32.xlu0 %v218_v29, %s273_s0 }
  0x74   :  { %v27_v31 = vpop.permute.xlu1 %26  }
  0x76   :  { %v12_v30 = vpop.permute.xlu0 %11  }
  0x77   :  { %15 = vst.msk [vmem:[#allocation0 + $0x8] sm:$0x1] %vm13_vm2, %v12_v30   ;;  %vm106_vm2 = vcmask 343328  }
  0x78   :  { %17 = vst.msk [vmem:[#allocation0] sm:$0x1] %vm16_vm3, %v12_v30   ;;  %v33_v33 = vpop.permute.xlu1 %32   ;;  %vm112_vm3 = vcmask 326928  }
  0x7a   :  { %v21_v32 = vpop.permute.xlu0 %20  }
  0x7b   :  { %23 = vst.msk [vmem:[#allocation0] sm:$0x1] %vm22_vm4, %v21_v32   ;;  %vm119_vm4 = vcmask 294128  }
  0x7c   :  { %29 = vst.msk [vmem:[#allocation0] sm:$0x1] %vm28_vm5, %v27_v31   ;;  %v45_v35 = vpop.permute.xlu1 %44   ;;  %vm125_vm5 = vcmask 277728  }
  0x7d   :  { %35 = vst.msk [vmem:[#allocation0] sm:$0x1] %vm34_vm6, %v33_v33   ;;  %vm132_vm6 = vcmask 244928  }
  0x7e   :  { %v39_v34 = vpop.permute.xlu0 %38  }
  0x7f   :  { %41 = vst.msk [vmem:[#allocation0] sm:$0x1] %vm40_vm7, %v39_v34   ;;  %vm138_vm7 = vcmask 228528  }
  0x80   :  { %47 = vst.msk [vmem:[#allocation0] sm:$0x1] %vm46_vm8, %v45_v35   ;;  %v57_v37 = vpop.permute.xlu1 %56   ;;  %vm145_vm8 = vcmask 195728  }
  0x82   :  { %v51_v36 = vpop.permute.xlu0 %50  }
  0x83   :  { %53 = vst.msk [vmem:[#allocation0] sm:$0x1] %vm52_vm9, %v51_v36   ;;  %vm151_vm9 = vcmask 179328  }
  0x84   :  { %59 = vst.msk [vmem:[#allocation0] sm:$0x1] %vm58_vm10, %v57_v37   ;;  %v69_v39 = vpop.permute.xlu1 %68   ;;  %vm158_vm10 = vcmask 146528  }
  0x86   :  { %v63_v38 = vpop.permute.xlu0 %62  }
  0x87   :  { %65 = vst.msk [vmem:[#allocation0] sm:$0x1] %vm64_vm11, %v63_v38   ;;  %vm164_vm11 = vcmask 130128  }
  0x88   :  { %71 = vst.msk [vmem:[#allocation0] sm:$0x1] %vm70_vm12, %v69_v39   ;;  %v81_v41 = vpop.permute.xlu1 %80   ;;  %vm171_vm12 = vcmask 97328  }
  0x8a   :  { %v75_v40 = vpop.permute.xlu0 %74  }
  0x8b   :  { %77 = vst.msk [vmem:[#allocation0] sm:$0x1] %vm76_vm13, %v75_v40   ;;  %vm177_vm13 = vcmask 80928  }
  0x8c   :  { %83 = vst.msk [vmem:[#allocation0] sm:$0x1] %vm82_vm14, %v81_v41   ;;  %v93_v43 = vpop.permute.xlu1 %92  }
  0x8e   :  { %v87_v42 = vpop.permute.xlu0 %86  }
  0x8f   :  { %89 = vst.msk [vmem:[#allocation0] sm:$0x1] %vm88_vm15, %v87_v42  }
  0x90   :  { %95 = vst.msk [vmem:[#allocation0] sm:$0x1] %vm94_vm0, %v93_v43   ;;  %v105_v45 = vpop.permute.xlu1 %104  }
  0x92   :  { %v99_v44 = vpop.permute.xlu0 %98  }
  0x93   :  { %101 = vst.msk [vmem:[#allocation0] sm:$0x1] %vm100_vm1, %v99_v44  }
  0x94   :  { %107 = vst.msk [vmem:[#allocation0] sm:$0x1] %vm106_vm2, %v105_v45   ;;  %v118_v47 = vpop.permute.xlu1 %117  }
  0x95   :  { %120 = vst.msk [vmem:[#allocation0] sm:$0x1] %vm119_vm4, %v118_v47  }
  0x96   :  { %v111_v46 = vpop.permute.xlu0 %110  }
  0x97   :  { %114 = vst.msk [vmem:[#allocation0 + $0x8] sm:$0x1] %vm112_vm3, %v111_v46  }
  0x98   :  { %v131_v49 = vpop.permute.xlu1 %130  }
  0x99   :  { %133 = vst.msk [vmem:[#allocation0] sm:$0x1] %vm132_vm6, %v131_v49  }
  0x9a   :  { %v124_v48 = vpop.permute.xlu0 %123  }
  0x9b   :  { %127 = vst.msk [vmem:[#allocation0 + $0x8] sm:$0x1] %vm125_vm5, %v124_v48  }
  0x9c   :  { %v144_v51 = vpop.permute.xlu1 %143  }
  0x9d   :  { %146 = vst.msk [vmem:[#allocation0] sm:$0x1] %vm145_vm8, %v144_v51  }
  0x9e   :  { %v137_v50 = vpop.permute.xlu0 %136  }
  0x9f   :  { %140 = vst.msk [vmem:[#allocation0 + $0x8] sm:$0x1] %vm138_vm7, %v137_v50  }
  0xa0   :  { %v157_v53 = vpop.permute.xlu1 %156  }
  0xa1   :  { %159 = vst.msk [vmem:[#allocation0] sm:$0x1] %vm158_vm10, %v157_v53  }
  0xa2   :  { %v150_v52 = vpop.permute.xlu0 %149  }
  0xa3   :  { %153 = vst.msk [vmem:[#allocation0 + $0x8] sm:$0x1] %vm151_vm9, %v150_v52  }
  0xa4   :  { %v170_v55 = vpop.permute.xlu1 %169  }
  0xa5   :  { %172 = vst.msk [vmem:[#allocation0] sm:$0x1] %vm171_vm12, %v170_v55  }
  0xa6   :  { %v163_v54 = vpop.permute.xlu0 %162  }
  0xa7   :  { %166 = vst.msk [vmem:[#allocation0 + $0x8] sm:$0x1] %vm164_vm11, %v163_v54  }
  0xaa   :  { %v176_v56 = vpop.permute.xlu0 %175  }
  0xab   :  { %179 = vst.msk [vmem:[#allocation0 + $0x8] sm:$0x1] %vm177_vm13, %v176_v56  }
  0xac   :  { %v183_v57 = vld [vmem:[#allocation0] sm:$0x1] }
  0xad   :  { %185 = vst [vmem:[%s378_s1] sm:$0x1] %v183_v57 }
  0xb2   :  { %v187_v58 = vld [vmem:[#allocation0 + $0x8] sm:$0x1] }
  0xb3   :  { %219 = vst [vmem:[%s378_s1 + $0x1] sm:$0x1] %v187_v58 }

// kernel: tile.18
= control target key start
LH: loop header
LB: loop body
LE: loop exit
PB: predicated region body
PF: predicated region fallthrough
CT: control target
= control target key end

     0   :  { %s28_s0 = inlined_call_operand.vmem [shape: f32[16], index: 0, kind: input, shape index: {}]   ;;  %s29_s1 = inlined_call_operand.vmem [shape: f32[12,16], index: 1, kind: output, shape index: {}]  }
   0x1   :  { %v4_v0 = vld [vmem:[%s28_s0] ss:$0 sm:$0xff] }
   0x2   :  { %5 = vst [vmem:[%s29_s1] sm:$0xff] %v4_v0  ;;  %8 = vst [vmem:[%s29_s1 + $0x8] sm:$0xff] %v4_v0 }

// kernel: tile.19
= control target key start
LH: loop header
LB: loop body
LE: loop exit
PB: predicated region body
PF: predicated region fallthrough
CT: control target
= control target key end

     0   :  { %s77_s10 = smov 112   ;;  %s78_s11 = smov 80   ;;  %vm4_vm0 = vcmask 130048   ;;  %vm10_vm1 = vcmask 1048448   ;;  %vm16_vm2 = vcmask 917248   ;;  %vm22_vm3 = vcmask 786048   ;;  %s124_s0 = inlined_call_operand.vmem [shape: f32[12,16], index: 0, kind: input, shape index: {}]   ;;  %s125_s1 = inlined_call_operand.vmem [shape: f32[1,192], index: 1, kind: output, shape index: {}]  }
   0x1   :  { %v62_v0 = vld [vmem:[%s124_s0 + $0x7] sm:$0x1]   ;;  %v64_v1 = vld [vmem:[%s124_s0 + $0x5] sm:$0x1]   ;;  %v63_v2 = vld [vmem:[%s124_s0 + $0x6] sm:$0x1]  }
   0x2   :  { %8 = vrot.lane.b32.xlu0 %v62_v0, %s77_s10  ;;  %20 = vrot.lane.b32.xlu1 %v64_v1, %s78_s11  ;;  %v65_v3 = vld [vmem:[%s124_s0 + $0x4] sm:$0x1]   ;;  %s31_s16 = smov 3  ;;  %s38_s17 = smov 3  ;;  %vm28_vm4 = vcmask 654848   ;;  %vm35_vm5 = vcmask 523648  }
   0x3   :  { %s79_s18 = smov 96   ;;  %s80_s19 = smov 64   ;;  %v66_v4 = vld [vmem:[%s124_s0 + $0x3] ss:$8 sm:%s31_s16]   ;;  %v67_v5 = vld [vmem:[%s124_s0 + $0x2] ss:$8 sm:%s38_s17]  }
   0x4   :  { %s2_s22 = smov 3  ;;  %s45_s27 = smov 3  ;;  %vm42_vm6 = vcmask 392448   ;;  %vm49_vm7 = vcmask 261248  }
   0x5   :  { %v3_v6 = vld [vmem:[%s124_s0] ss:$8 sm:%s2_s22]   ;;  %s81_s28 = smov 48   ;;  %s82_s29 = smov 32   ;;  %v68_v7 = vld [vmem:[%s124_s0 + $0x1] ss:$8 sm:%s45_s27]  }
   0x6   :  { %14 = vrot.lane.b32.xlu0 %v63_v2, %s79_s18  ;;  %26 = vrot.lane.b32.xlu1 %v65_v3, %s80_s19  ;;  %5 = vst.msk [vmem:[#allocation0] ss:$8 sm:$0x3] %vm4_vm0, %v3_v6   ;;  %s83_s0 = smov 16  }
   0xa   :  { %33 = vrot.lane.b32.xlu0 %v66_v4, %s81_s28  ;;  %40 = vrot.lane.b32.xlu1 %v67_v5, %s82_s29 }
   0xe   :  { %47 = vrot.lane.b32.xlu0 %v68_v7, %s83_s0 }
  0x74   :  { %v9_v8 = vpop.permute.xlu0 %8   ;;  %v21_v9 = vpop.permute.xlu1 %20  }
  0x75   :  { %11 = vst.msk [vmem:[#allocation0] sm:$0x1] %vm10_vm1, %v9_v8  }
  0x78   :  { %v15_v10 = vpop.permute.xlu0 %14   ;;  %v27_v11 = vpop.permute.xlu1 %26  }
  0x79   :  { %17 = vst.msk [vmem:[#allocation0] sm:$0x1] %vm16_vm2, %v15_v10  }
  0x7a   :  { %23 = vst.msk [vmem:[#allocation0] sm:$0x1] %vm22_vm3, %v21_v9  }
  0x7b   :  { %29 = vst.msk [vmem:[#allocation0] sm:$0x1] %vm28_vm4, %v27_v11  }
  0x7c   :  { %v34_v12 = vpop.permute.xlu0 %33   ;;  %v41_v13 = vpop.permute.xlu1 %40  }
  0x7d   :  { %36 = vst.msk [vmem:[#allocation0] ss:$8 sm:$0x3] %vm35_vm5, %v34_v12  }
  0x7e   :  { %43 = vst.msk [vmem:[#allocation0] ss:$8 sm:$0x3] %vm42_vm6, %v41_v13  }
  0x80   :  { %v48_v14 = vpop.permute.xlu0 %47  }
  0x81   :  { %50 = vst.msk [vmem:[#allocation0] ss:$8 sm:$0x3] %vm49_vm7, %v48_v14  }
  0x88   :  { %v54_v15 = vld [vmem:[#allocation0] sm:$0x1]  ;;  %v58_v16 = vld [vmem:[#allocation0 + $0x8] sm:$0x1] }
  0x89   :  { %56 = vst [vmem:[%s125_s1] sm:$0x1] %v54_v15  ;;  %69 = vst [vmem:[%s125_s1 + $0x1] sm:$0x1] %v58_v16 }

// kernel: net_forward.2
= control target key start
LH: loop header
LB: loop body
LE: loop exit
PB: predicated region body
PF: predicated region fallthrough
CT: control target
= control target key end

     0   :  { %s1938_s18 = smov 0   ;;  %s2703_s0 = inlined_call_operand.vmem [shape: f32[2,32,96], index: 0, kind: input, shape index: {}]   ;;  %s2704_s1 = inlined_call_operand.vmem [shape: f32[4,96,168], index: 1, kind: input, shape index: {}]   ;;  %s2705_s2 = inlined_call_operand.vmem [shape: f32[1,168], index: 2, kind: input, shape index: {}]   ;;  %s2706_s3 = inlined_call_operand.vmem [shape: f32[3,84,192], index: 3, kind: input, shape index: {}]   ;;  %s2707_s4 = inlined_call_operand.vmem [shape: f32[1,192], index: 4, kind: input, shape index: {}]   ;;  %s2708_s5 = inlined_call_operand.vmem [shape: f32[2,5,112], index: 5, kind: output, shape index: {}]  }
   0x1 LB: > { %s1537_s19 = sadd.s32 4294967295, %s1900_s18   ;;  %p1541_p0 = scmp.ge.s32.totalorder %s1900_s18, 1  ;;  %s1900_s18 = sphi %s1938_s18, %s15_s18  }
   0x2   : > { %p187_p1 = scmp.lt.s32.totalorder %s1900_s18, 3 }
   0x4   : > { %p188_p2 = pnand %p1541_p0, %p187_p1 }
   0x5   : > { %v228_v0 = vld [vmem:[%s2704_s1 + $0x8] sm:$0xff] (!%p188_p2)  ;;  %v230_v1 = vld [vmem:[%s2704_s1 + $0x18] sm:$0xff] (!%p188_p2)  ;;  %v227_v2 = vld [vmem:[%s2704_s1] sm:$0xff] (!%p188_p2)  ;;  %v1902_v7 = vmov (!%p188_p2), 0.0   ;;  %p214_p3 = scmp.lt.s32.totalorder (!%p188_p2), %s1537_s19, 1  ;;  %vm288_vm0 = vcmask (!%p188_p2), 785408  }
   0x6   : > { %191 = sbr.rel (%p188_p2) target bundleno = 982 (0x3d6), region = 40  ;;  %v1716_v3 = vpack.c.bf16 (!%p188_p2), %v230_v1, %v228_v0  ;;  %v229_v4 = vld [vmem:[%s2704_s1 + $0x10] sm:$0xff] (!%p188_p2)  ;;  %v232_v5 = vld [vmem:[%s2704_s1 + $0x28] sm:$0xff] (!%p188_p2)  ;;  %v234_v6 = vld [vmem:[%s2704_s1 + $0x38] sm:$0xff] (!%p188_p2)  ;;  %458 = vmatprep.mubr.f32.mxu0 (!%p188_p2), %v1902_v7  ;;  %361 = vmatprep.mubr.f32.mxu1 (!%p188_p2), %v1902_v7  ;;  %vm280_vm1 = vcmask (!%p188_p2), 1046528   ;;  %vm508_vm2 = vcmask (!%p188_p2), 1045504  }
   0x7   : > { %v1718_v8 = vpack.c.bf16 (!%p188_p2), %v229_v4, %v227_v2  ;;  %v1720_v9 = vpack.c.bf16 (!%p188_p2), %v234_v6, %v232_v5  ;;  %v231_v10 = vld [vmem:[%s2704_s1 + $0x20] sm:$0xff] (!%p188_p2)  ;;  %v233_v11 = vld [vmem:[%s2704_s1 + $0x30] sm:$0xff] (!%p188_p2)  ;;  %v236_v12 = vld [vmem:[%s2704_s1 + $0x48] sm:$0xff] (!%p188_p2)  ;;  %vm646_vm3 = vcmask (!%p188_p2), 1044480   ;;  %s1903_s29 = smov (!%p188_p2), 44   ;;  %vm893_vm4 = vcmask (!%p188_p2), 1043456  }
   0x8   : > { %1717 = vmatprep.subr.bf16.mxu0 (!%p188_p2), %v1716_v3  ;;  %v238_v13 = vld [vmem:[%s2704_s1 + $0x58] sm:$0xff] (!%p188_p2)  ;;  %v1722_v14 = vpack.c.bf16 (!%p188_p2), %v233_v11, %v231_v10  ;;  %v235_v16 = vld [vmem:[%s2704_s1 + $0x40] sm:$0xff] (!%p188_p2)  ;;  %v237_v17 = vld [vmem:[%s2704_s1 + $0x50] sm:$0xff] (!%p188_p2)  ;;  %vm811_vm5 = vcmask (!%p188_p2), 359424   ;;  %vm824_vm6 = vcmask (!%p188_p2), 687104   ;;  %vm828_vm7 = vcmask (!%p188_p2), 684032  }
   0x9   : > { %1719 = vmatpush1.bf16.msra.mxu0 (!%p188_p2), %v1718_v8  ;;  %v1724_v15 = vpack.c.bf16 (!%p188_p2), %v238_v13, %v236_v12  ;;  %v240_v18 = vld [vmem:[%s2704_s1 + $0x68] sm:$0xff] (!%p188_p2)  ;;  %v242_v19 = vld [vmem:[%s2704_s1 + $0x78] sm:$0xff] (!%p188_p2)  ;;  %v1726_v20 = vpack.c.bf16 (!%p188_p2), %v237_v17, %v235_v16  ;;  %v239_v22 = vld [vmem:[%s2704_s1 + $0x60] sm:$0xff] (!%p188_p2)  ;;  %s1904_s9 = smov (!%p188_p2), 112   ;;  %s1905_s10 = smov (!%p188_p2), 96   ;;  %vm1218_vm8 = vcmask (!%p188_p2), 122880  }
   0xa   : > { %1721 = vmatprep.subr.bf16.mxu0 (!%p188_p2), %v1720_v9  ;;  %v1728_v21 = vpack.c.bf16 (!%p188_p2), %v242_v19, %v240_v18  ;;  %v241_v23 = vld [vmem:[%s2704_s1 + $0x70] sm:$0xff] (!%p188_p2)  ;;  %v244_v24 = vld [vmem:[%s2704_s1 + $0x88] sm:$0xff] (!%p188_p2)  ;;  %v246_v25 = vld [vmem:[%s2704_s1 + $0x98] sm:$0xff] (!%p188_p2)  ;;  %vm1220_vm9 = vcmask (!%p188_p2), 124930   ;;  %vm1225_vm10 = vcmask (!%p188_p2), 126980   ;;  %vm1255_vm11 = vcmask (!%p188_p2), 254080  }
   0xb   : > { %v1730_v26 = vpack.c.bf16 (!%p188_p2), %v241_v23, %v239_v22  ;;  %v1732_v27 = vpack.c.bf16 (!%p188_p2), %v246_v25, %v244_v24  ;;  %v243_v28 = vld [vmem:[%s2704_s1 + $0x80] sm:$0xff] (!%p188_p2)  ;;  %v245_v29 = vld [vmem:[%s2704_s1 + $0x90] sm:$0xff] (!%p188_p2)  ;;  %v248_v30 = vld [vmem:[%s2704_s1 + $0xa8] sm:$0xff] (!%p188_p2)  ;;  %vm1257_vm12 = vcmask (!%p188_p2), 256130   ;;  %vm1262_vm13 = vcmask (!%p188_p2), 258180  }
   0xc   : > { %v250_v31 = vld [vmem:[%s2704_s1 + $0xb8] sm:$0xff] (!%p188_p2)  ;;  %v1734_v32 = vpack.c.bf16 (!%p188_p2), %v245_v29, %v243_v28  ;;  %v247_v33 = vld [vmem:[%s2704_s1 + $0xa0] sm:$0xff] (!%p188_p2)  ;;  %v249_v34 = vld [vmem:[%s2704_s1 + $0xb0] sm:$0xff] (!%p188_p2)  ;;  %vm1238_vm14 = vcmask (!%p188_p2), 123905   ;;  %vm1234_vm15 = vcmask (!%p188_p2), 130055  }
   0xd   : > { %1723 = vmatpush1.bf16.msra.mxu0 %v1722_v14  ;;  %s2710_s19 = smov (!%p214_p3, %s1537_s19), 1  ;;  %v1736_v35 = vpack.c.bf16 %v250_v31, %v248_v30  ;;  %v1578_v36 = vld [vmem:[%s2704_s1 + $0x188] sm:$0xff]  ;;  %v1548_v38 = vld [vmem:[%s2704_s1 + $0xd8] sm:$0xff]  ;;  %v1545_v41 = vld [vmem:[%s2704_s1 + $0xc0] sm:$0xff]  ;;  %v1738_v44 = vpack.c.bf16 %v249_v34, %v247_v33 }
   0xe   : > { %1725 = vmatprep.subr.bf16.mxu0 %v1724_v15  ;;  %v1546_v37 = vld [vmem:[%s2704_s1 + $0xc8] sm:$0xff]  ;;  %v1580_v39 = vld [vmem:[%s2704_s1 + $0x198] sm:$0xff]  ;;  %s1691_s30 = sshll.u32 %s2710_s19, 5  ;;  %v1547_v42 = vld [vmem:[%s2704_s1 + $0xd0] sm:$0xff]  ;;  %s1544_s11 = sshll.u32 %s2710_s19, 3 }
   0xf   : > { %v1692_v40 = vpack.c.bf16 %v1548_v38, %v1546_v37  ;;  %v1694_v43 = vpack.c.bf16 %v1547_v42, %v1545_v41  ;;  %v1550_v45 = vld [vmem:[%s2704_s1 + $0xe8] sm:$0xff]  ;;  %v1552_v46 = vld [vmem:[%s2704_s1 + $0xf8] sm:$0xff]  ;;  %v1549_v47 = vld [vmem:[%s2704_s1 + $0xe0] sm:$0xff]  ;;  %v1740_v48 = vpack.c.bf16 %v1580_v39, %v1578_v36  ;;  %s2057_s20 = scalar_lea.vmem %s2703_s0, %s1691_s30  ;;  %s2624_s14 = scalar_lea.vmem %s2708_s5, %s1544_s11 }
  0x10   : > { %v1577_v49 = vld [vmem:[%s2704_s1 + $0x180] sm:$0xff]  ;;  %v1579_v50 = vld [vmem:[%s2704_s1 + $0x190] sm:$0xff]  ;;  %v1696_v51 = vpack.c.bf16 %v1552_v46, %v1550_v45  ;;  %v1582_v53 = vld [vmem:[%s2704_s1 + $0x1a8] sm:$0xff]  ;;  %s1906_s19 = smov 64  }
  0x11   : > { %1727 = vmatpush1.bf16.msra.mxu0 %v1726_v20  ;;  %1693 = vmatprep.subr.bf16.mxu1 %v1692_v40  ;;  %v1551_v52 = vld [vmem:[%s2704_s1 + $0xf0] sm:$0xff]  ;;  %v1584_v54 = vld [vmem:[%s2704_s1 + $0x1b8] sm:$0xff]  ;;  %v1554_v56 = vld [vmem:[%s2704_s1 + $0x108] sm:$0xff]  ;;  %v1742_v61 = vpack.c.bf16 %v1579_v50, %v1577_v49 }
  0x12   : > { %1729 = vmatprep.subr.bf16.mxu0 %v1728_v21  ;;  %1695 = vmatpush1.bf16.msra.mxu1 %v1694_v43  ;;  %v1698_v55 = vpack.c.bf16 %v1551_v52, %v1549_v47  ;;  %v1556_v57 = vld [vmem:[%s2704_s1 + $0x118] sm:$0xff]  ;;  %v1553_v58 = vld [vmem:[%s2704_s1 + $0x100] sm:$0xff]  ;;  %v1555_v59 = vld [vmem:[%s2704_s1 + $0x110] sm:$0xff]  ;;  %v1744_v1 = vpack.c.bf16 %v1584_v54, %v1582_v53 }
  0x13   : > { %1697 = vmatprep.subr.bf16.mxu1 %v1696_v51  ;;  %v2087_v60 = vld [vmem:[%s2057_s20] sm:$0xff]  ;;  %v1583_v63 = vld [vmem:[%s2704_s1 + $0x1b0] sm:$0xff]  ;;  %v1700_v0 = vpack.c.bf16 %v1556_v57, %v1554_v56  ;;  %v1586_v2 = vld [vmem:[%s2704_s1 + $0x1c8] sm:$0xff]  ;;  %v1702_v3 = vpack.c.bf16 %v1555_v59, %v1553_v58 }
  0x14   : > { %v1581_v62 = vld [vmem:[%s2704_s1 + $0x1a0] sm:$0xff]  ;;  %v1558_v4 = vld [vmem:[%s2704_s1 + $0x128] sm:$0xff]  ;;  %v1560_v5 = vld [vmem:[%s2704_s1 + $0x138] sm:$0xff]  ;;  %v281_v39 = vrot.slane %v2087_v60, 1 }
  0x15   : > { %1731 = vmatpush1.bf16.msra.mxu0 %v1730_v26  ;;  %v1588_v6 = vld [vmem:[%s2704_s1 + $0x1d8] sm:$0xff]  ;;  %v1704_v8 = vpack.c.bf16 %v1560_v5, %v1558_v4  ;;  %v1557_v9 = vld [vmem:[%s2704_s1 + $0x120] sm:$0xff]  ;;  %v1559_v10 = vld [vmem:[%s2704_s1 + $0x130] sm:$0xff]  ;;  %v1746_v11 = vpack.c.bf16 %v1583_v63, %v1581_v62 }
  0x16   : > { %1733 = vmatprep.subr.bf16.mxu0 %v1732_v27  ;;  %1699 = vmatpush1.bf16.msra.mxu1 %v1698_v55  ;;  %v2117_v12 = vld [vmem:[%s2057_s20 + $0x8] sm:$0xff]  ;;  %v1564_v14 = vld [vmem:[%s2704_s1 + $0x158] sm:$0xff]  ;;  %v1748_v15 = vpack.c.bf16 %v1588_v6, %v1586_v2  ;;  %v1585_v16 = vld [vmem:[%s2704_s1 + $0x1c0] sm:$0xff]  ;;  %v1706_v19 = vpack.c.bf16 %v1559_v10, %v1557_v9  ;;  %v509_v55 = vrot.slane %v2087_v60, 2 }
  0x17   : > { %1701 = vmatprep.subr.bf16.mxu1 %v1700_v0  ;;  %v1562_v13 = vld [vmem:[%s2704_s1 + $0x148] sm:$0xff]  ;;  %v1587_v17 = vld [vmem:[%s2704_s1 + $0x1d0] sm:$0xff]  ;;  %v1592_v20 = vld [vmem:[%s2704_s1 + $0x1f8] sm:$0xff]  ;;  %v282_v40 = vrot.slane %v2117_v12, 1  ;;  %v510_v56 = vrot.slane %v2117_v12, 2 }
  0x18   : > { %v1590_v18 = vld [vmem:[%s2704_s1 + $0x1e8] sm:$0xff]  ;;  %v1708_v21 = vpack.c.bf16 %v1564_v14, %v1562_v13  ;;  %v1561_v22 = vld [vmem:[%s2704_s1 + $0x140] sm:$0xff]  ;;  %v1563_v23 = vld [vmem:[%s2704_s1 + $0x150] sm:$0xff]  ;;  %v1750_v26 = vpack.c.bf16 %v1587_v17, %v1585_v16 }
  0x19   : > { %1735 = vmatpush1.bf16.msra.mxu0 %v1734_v32  ;;  %v1566_v24 = vld [vmem:[%s2704_s1 + $0x168] sm:$0xff]  ;;  %v1568_v25 = vld [vmem:[%s2704_s1 + $0x178] sm:$0xff]  ;;  %v2153_v27 = vld [vmem:[%s2057_s20 + $0x10] sm:$0xff]  ;;  %v1752_v28 = vpack.c.bf16 %v1592_v20, %v1590_v18  ;;  %v1710_v32 = vpack.c.bf16 %v1563_v23, %v1561_v22  ;;  %v283_v52 = vsel %vm280_vm1, %v281_v39, %v282_v40 }
  0x1a   : > { %1737 = vmatprep.subr.bf16.mxu0 %v1736_v35  ;;  %1703 = vmatpush1.bf16.msra.mxu1 %v1702_v3  ;;  %v1589_v29 = vld [vmem:[%s2704_s1 + $0x1e0] sm:$0xff]  ;;  %v1591_v30 = vld [vmem:[%s2704_s1 + $0x1f0] sm:$0xff]  ;;  %v1594_v31 = vld [vmem:[%s2704_s1 + $0x208] sm:$0xff]  ;;  %v1712_v34 = vpack.c.bf16 %v1568_v25, %v1566_v24  ;;  %v512_v2 = vrot.slane %v2153_v27, 2  ;;  %v511_v3 = vsel %vm508_vm2, %v509_v55, %v510_v56 }
  0x1b   : > { %1705 = vmatprep.subr.bf16.mxu1 %v1704_v8  ;;  %v1596_v33 = vld [vmem:[%s2704_s1 + $0x218] sm:$0xff]  ;;  %v1565_v35 = vld [vmem:[%s2704_s1 + $0x160] sm:$0xff]  ;;  %v1567_v36 = vld [vmem:[%s2704_s1 + $0x170] sm:$0xff]  ;;  %v1754_v37 = vpack.c.bf16 %v1591_v30, %v1589_v29 }
  0x1c   : > { %v2177_v38 = vld [vmem:[%s2057_s20 + $0x18] sm:$0xff]  ;;  %v1756_v41 = vpack.c.bf16 %v1596_v33, %v1594_v31  ;;  %v1593_v42 = vld [vmem:[%s2704_s1 + $0x200] sm:$0xff]  ;;  %v1595_v43 = vld [vmem:[%s2704_s1 + $0x210] sm:$0xff] }
  0x1d   : > { %1739 = vmatpush1.bf16.msra.mxu0 %v1738_v44  ;;  %v1714_v44 = vpack.c.bf16 %v1567_v36, %v1565_v35  ;;  %v1598_v45 = vld [vmem:[%s2704_s1 + $0x228] sm:$0xff]  ;;  %v1600_v46 = vld [vmem:[%s2704_s1 + $0x238] sm:$0xff]  ;;  %v1758_v47 = vpack.c.bf16 %v1595_v43, %v1593_v42  ;;  %v1597_v50 = vld [vmem:[%s2704_s1 + $0x220] sm:$0xff]  ;;  %v286_v63 = vrot.slane %v2177_v38, 1  ;;  %v514_v13 = vrot.slane %v2177_v38, 2 }
  0x1e   : > { %1741 = vmatprep.subr.bf16.mxu0 %v1740_v48  ;;  %1707 = vmatpush1.bf16.msra.mxu1 %v1706_v19  ;;  %v284_v48 = vrot.slane %v2153_v27, 1  ;;  %v1760_v49 = vpack.c.bf16 %v1600_v46, %v1598_v45  ;;  %v1599_v51 = vld [vmem:[%s2704_s1 + $0x230] sm:$0xff]  ;;  %v1606_v53 = vld [vmem:[%s2704_s1 + $0x248] sm:$0xff]  ;;  %v1608_v54 = vld [vmem:[%s2704_s1 + $0x258] sm:$0xff]  ;;  %v650_v43 = vrot.slane %v2153_v27, 3  ;;  %v652_v45 = vrot.slane %v2177_v38, 3 }
  0x1f   : > { %1709 = vmatprep.subr.bf16.mxu1 %v1708_v21  ;;  %v1762_v57 = vpack.c.bf16 %v1599_v51, %v1597_v50  ;;  %v1764_v58 = vpack.c.bf16 %v1608_v54, %v1606_v53  ;;  %v1605_v59 = vld [vmem:[%s2704_s1 + $0x240] sm:$0xff]  ;;  %v1610_v0 = vld [vmem:[%s2704_s1 + $0x268] sm:$0xff]  ;;  %v1611_v8 = vld [vmem:[%s2704_s1 + $0x270] sm:$0xff]  ;;  %v515_v22 = vsel %vm508_vm2, %v512_v2, %v514_v13 }
  0x20   : > { %1573 = vmatmul.mubr.msk.f32.vlgmr.msra.gmra.mrb[0].mxu0 %vm288_vm0, %v2087_v60  ;;  %v285_v62 = vsel %vm280_vm1, %v282_v40, %v284_v48  ;;  %v1609_v6 = vld [vmem:[%s2704_s1 + $0x260] sm:$0xff]  ;;  %v1614_v9 = vld [vmem:[%s2704_s1 + $0x288] sm:$0xff]  ;;  %v1616_v10 = vld [vmem:[%s2704_s1 + $0x298] sm:$0xff]  ;;  %v647_v40 = vrot.slane %v2087_v60, 3  ;;  %v653_v60 = vsel %vm646_vm3, %v650_v43, %v652_v45 }
  0x21   : > { %1743 = vmatpush1.bf16.msra.mxu0 %v1742_v61  ;;  %464 = vmatprep.mubr.f32.mxu0 %v1902_v7  ;;  %v1607_v61 = vld [vmem:[%s2704_s1 + $0x250] sm:$0xff]  ;;  %v1770_v14 = vpack.c.bf16 %v1611_v8, %v1609_v6  ;;  %v1772_v16 = vpack.c.bf16 %v1616_v10, %v1614_v9  ;;  %v1613_v17 = vld [vmem:[%s2704_s1 + $0x280] sm:$0xff]  ;;  %v1618_v19 = vld [vmem:[%s2704_s1 + $0x2a8] sm:$0xff] }
  0x22   : > { %1745 = vmatprep.subr.bf16.mxu0 %v1744_v1  ;;  %1711 = vmatpush1.bf16.msra.mxu1 %v1710_v32  ;;  %v1612_v1 = vld [vmem:[%s2704_s1 + $0x278] sm:$0xff]  ;;  %v1766_v4 = vpack.c.bf16 %v1607_v61, %v1605_v59  ;;  %v1615_v18 = vld [vmem:[%s2704_s1 + $0x290] sm:$0xff]  ;;  %v1617_v24 = vld [vmem:[%s2704_s1 + $0x2a0] sm:$0xff] }
  0x23   : > { %1713 = vmatprep.subr.bf16.mxu1 %v1712_v34  ;;  %v1768_v5 = vpack.c.bf16 %v1612_v1, %v1610_v0  ;;  %v1620_v20 = vld [vmem:[%s2704_s1 + $0x2b8] sm:$0xff]  ;;  %v1774_v21 = vpack.c.bf16 %v1615_v18, %v1613_v17  ;;  %v1619_v25 = vld [vmem:[%s2704_s1 + $0x2b0] sm:$0xff]  ;;  %v1621_v31 = vld [vmem:[%s2704_s1 + $0x2c0] sm:$0xff] }
  0x24   : > { %1574 = vmatmul.mubr.msk.f32.gmra.mrb[2].mxu0 %vm288_vm0, %v2117_v12  ;;  %v1776_v23 = vpack.c.bf16 %v1620_v20, %v1618_v19  ;;  %v1778_v29 = vpack.c.bf16 %v1619_v25, %v1617_v24  ;;  %v1623_v32 = vld [vmem:[%s2704_s1 + $0x2d0] sm:$0xff]  ;;  %v1626_v33 = vld [vmem:[%s2704_s1 + $0x2e8] sm:$0xff]  ;;  %v1628_v34 = vld [vmem:[%s2704_s1 + $0x2f8] sm:$0xff] }
  0x25   : > { %1747 = vmatpush1.bf16.msra.mxu0 %v1746_v11  ;;  %470 = vmatprep.mubr.f32.mxu0 %v1902_v7  ;;  %v287_v11 = vsel %vm280_vm1, %v284_v48, %v286_v63  ;;  %v1782_v35 = vpack.c.bf16 %v1623_v32, %v1621_v31  ;;  %v1784_v36 = vpack.c.bf16 %v1628_v34, %v1626_v33  ;;  %v1627_v39 = vld [vmem:[%s2704_s1 + $0x2f0] sm:$0xff]  ;;  %v759_v55 = vld [vmem:[%s2705_s2] sm:$0x3]  ;;  %v1634_v59 = vld [vmem:[%s2706_s3 + $0xb8] sm:$0xff] }
  0x26   : > { %1749 = vmatprep.subr.bf16.mxu0 %v1748_v15  ;;  %1715 = vmatpush1.bf16.msra.mxu1 %v1714_v44  ;;  %v513_v15 = vsel %vm508_vm2, %v510_v56, %v512_v2  ;;  %v1636_v61 = vld [vmem:[%s2706_s3 + $0xc8] sm:$0xff]  ;;  %v1633_v2 = vld [vmem:[%s2706_s3 + $0xb0] sm:$0xff]  ;;  %v1638_v9 = vld [vmem:[%s2706_s3 + $0xd8] sm:$0xff] }
  0x27   : > { %v1788_v1 = vpack.c.bf16 %v1636_v61, %v1634_v59  ;;  %v1640_v10 = vld [vmem:[%s2706_s3 + $0xe8] sm:$0xff]  ;;  %v1637_v17 = vld [vmem:[%s2706_s3 + $0xd0] sm:$0xff]  ;;  %v1639_v18 = vld [vmem:[%s2706_s3 + $0xe0] sm:$0xff] }
  0x28   : > { %1575 = vmatmul.mubr.msk.f32.gmra.mrb[4].mxu0 %vm288_vm0, %v2153_v27  ;;  %v1794_v20 = vpack.c.bf16 %v1639_v18, %v1637_v17  ;;  %v1642_v24 = vld [vmem:[%s2706_s3 + $0xf8] sm:$0xff]  ;;  %v1644_v25 = vld [vmem:[%s2706_s3 + $0x108] sm:$0xff]  ;;  %v1641_v32 = vld [vmem:[%s2706_s3 + $0xf0] sm:$0xff] }
  0x29   : > { %1751 = vmatpush1.bf16.msra.mxu0 %v1750_v26  ;;  %476 = vmatprep.mubr.f32.mxu0 %v1902_v7  ;;  %v1622_v26 = vld [vmem:[%s2704_s1 + $0x2c8] sm:$0xff]  ;;  %v1796_v31 = vpack.c.bf16 %v1644_v25, %v1642_v24  ;;  %v1643_v33 = vld [vmem:[%s2706_s3 + $0x100] sm:$0xff]  ;;  %v841_v25 = vld [vmem:[%s2706_s3 + $0x10] sm:$0xff] }
  0x2a   : > { %1753 = vmatprep.subr.bf16.mxu0 %v1752_v28  ;;  %1569 = vmatmul.mubr.msk.f32.vlgmr.msra.gmra.mrb[0].mxu1 %vm288_vm0, %v283_v52  ;;  %v1624_v28 = vld [vmem:[%s2704_s1 + $0x2d8] sm:$0xff]  ;;  %v761_v52 = vlaneseq  ;;  %v839_v24 = vld [vmem:[%s2706_s3] sm:$0xff] }
  0x2b   : > { %367 = vmatprep.mubr.f32.mxu1 %v1902_v7  ;;  %v1780_v30 = vpack.c.bf16 %v1624_v28, %v1622_v26  ;;  %1789 = vmatprep.subr.bf16.mxu1 %v1788_v1  ;;  %v1653_v1 = vld [vmem:[%s2706_s3 + $0x150] sm:$0xf] }
  0x2c   : > { %1576 = vmatmul.mubr.msk.f32.gmra.mrb[6].mxu0 %vm288_vm0, %v2177_v38  ;;  %v2315_v53 = vshrl.u32 %v761_v52, 7 }
  0x2d   : > { %1755 = vmatpush1.bf16.msra.mxu0 %v1754_v37  ;;  %588 = vmatprep.mubr.f32.mxu0 %v1902_v7  ;;  %v1625_v37 = vld [vmem:[%s2704_s1 + $0x2e0] sm:$0xff] }
  0x2e   : > { %1757 = vmatprep.subr.bf16.mxu0 %v1756_v41  ;;  %1570 = vmatmul.mubr.msk.f32.gmra.mrb[2].mxu1 %vm288_vm0, %v285_v62  ;;  %v648_v41 = vrot.slane %v2117_v12, 3  ;;  %v1786_v42 = vpack.c.bf16 %v1627_v39, %v1625_v37  ;;  %v763_v54 = vsub.s32 0, %v2315_v53  ;;  %v767_v56 = vsub.s32 1, %v2315_v53 }
  0x2f   : > { %373 = vmatprep.mubr.f32.mxu1 %v1902_v7 }
  0x30   : > { %v649_v44 = vsel %vm646_vm3, %v647_v40, %v648_v41  ;;  %v651_v46 = vsel %vm646_vm3, %v648_v41, %v650_v43  ;;  %v2334_v0 = vrot.slane %v759_v55, %v767_v56  ;;  %v1646_v40 = vld [vmem:[%s2706_s3 + $0x118] sm:$0xff]  ;;  %v1648_v41 = vld [vmem:[%s2706_s3 + $0x128] sm:$0xff]  ;;  %vm1283_vm3 = vcmask 387330  }
  0x31   : > { %1759 = vmatpush1.bf16.msra.mxu0 %v1758_v47 }
  0x32   : > { %1761 = vmatprep.subr.bf16.mxu0 %v1760_v49  ;;  %1571 = vmatmul.mubr.msk.f32.gmra.mrb[4].mxu1 %vm288_vm0, %v287_v11 }
  0x33   : > { %379 = vmatprep.mubr.f32.mxu1 %v1902_v7 }
  0x35   : > { %1763 = vmatpush1.bf16.msra.mxu0 %v1762_v57  ;;  %v2324_v57 = vrot.slane %v759_v55, %v763_v54 }
  0x36   : > { %1765 = vmatprep.subr.bf16.mxu0 %v1764_v58  ;;  %1572 = vmatmul.mubr.msk.f32.gmra.mrb[6].mxu1 %vm288_vm0, %v286_v63 }
  0x37   : > { %964 = vmatprep.mubr.f32.mxu1 %v1902_v7 }
  0x38   : > { %1601 = vmatmul.mubr.msk.f32.vlgmr.msra.gmra.mrb[0].mxu0 %vm288_vm0, %v511_v3  ;;  %v1635_v3 = vld [vmem:[%s2706_s3 + $0xc0] sm:$0xff] }
  0x39   : > { %1767 = vmatpush1.bf16.msra.mxu0 %v1766_v4  ;;  %594 = vmatprep.mubr.f32.mxu0 %v1902_v7 }
  0x3a   : > { %1769 = vmatprep.subr.bf16.mxu0 %v1768_v5  ;;  %v1790_v5 = vpack.c.bf16 %v1635_v3, %v1633_v2 }
  0x3c   : > { %1602 = vmatmul.mubr.msk.f32.gmra.mrb[2].mxu0 %vm288_vm0, %v513_v15  ;;  %1791 = vmatpush1.bf16.msra.mxu1 %v1790_v5 }
  0x3d   : > { %1771 = vmatpush1.bf16.msra.mxu0 %v1770_v14  ;;  %600 = vmatprep.mubr.f32.mxu0 %v1902_v7 }
  0x3e   : > { %1773 = vmatprep.subr.bf16.mxu0 %v1772_v16  ;;  %v1792_v16 = vpack.c.bf16 %v1640_v10, %v1638_v9 }
  0x40   : > { %1603 = vmatmul.mubr.msk.f32.gmra.mrb[4].mxu0 %vm288_vm0, %v515_v22  ;;  %1793 = vmatprep.subr.bf16.mxu1 %v1792_v16 }
  0x41   : > { %1775 = vmatpush1.bf16.msra.mxu0 %v1774_v21  ;;  %606 = vmatprep.mubr.f32.mxu0 %v1902_v7 }
  0x42   : > { %1777 = vmatprep.subr.bf16.mxu0 %v1776_v23  ;;  %1795 = vmatpush1.bf16.msra.mxu1 %v1794_v20 }
  0x43   : > { %1797 = vmatprep.subr.bf16.mxu1 %v1796_v31  ;;  %v846_v31 = vld [vmem:[%s2706_s3 + $0x38] sm:$0xff] }
  0x44   : > { %1604 = vmatmul.mubr.msk.f32.gmra.mrb[6].mxu0 %vm288_vm0, %v514_v13 }
  0x45   : > { %1779 = vmatpush1.bf16.msra.mxu0 %v1778_v29  ;;  %726 = vmatprep.mubr.f32.mxu0 %v1902_v7 }
  0x46   : > { %1781 = vmatprep.subr.bf16.mxu0 %v1780_v30 }
  0x49   : > { %1783 = vmatpush1.bf16.msra.mxu0 %v1782_v35  ;;  %v1798_v35 = vpack.c.bf16 %v1643_v33, %v1641_v32 }
  0x4a   : > { %1785 = vmatprep.subr.bf16.mxu0 %v1784_v36 }
  0x4b   : > { %1799 = vmatpush1.bf16.msra.mxu1 %v1798_v35 }
  0x4d   : > { %1787 = vmatpush1.bf16.msra.mxu0 %v1786_v42 }
  0x50   : > { %1629 = vmatmul.mubr.msk.f32.vlgmr.msra.gmra.mrb[0].mxu0 %vm288_vm0, %v649_v44 }
  0x51   : > { %732 = vmatprep.mubr.f32.mxu0 %v1902_v7 }
  0x54   : > { %1630 = vmatmul.mubr.msk.f32.gmra.mrb[2].mxu0 %vm288_vm0, %v651_v46  ;;  %v1800_v46 = vpack.c.bf16 %v1648_v41, %v1646_v40  ;;  %v848_v40 = vld [vmem:[%s2706_s3 + $0x48] sm:$0xff]  ;;  %v850_v41 = vld [vmem:[%s2706_s3 + $0x58] sm:$0xff] }
  0x55   : > { %738 = vmatprep.mubr.f32.mxu0 %v1902_v7 }
  0x56   : > { %1801 = vmatprep.subr.bf16.mxu1 %v1800_v46  ;;  %v852_v46 = vld [vmem:[%s2706_s3 + $0x68] sm:$0xff] }
  0x58   : > { %1631 = vmatmul.mubr.msk.f32.gmra.mrb[4].mxu0 %vm288_vm0, %v653_v60  ;;  %v1645_v60 = vld [vmem:[%s2706_s3 + $0x110] sm:$0xff] }
  0x59   : > { %744 = vmatprep.mubr.f32.mxu0 %v1902_v7 }
  0x5c   : > { %1632 = vmatmul.mubr.msk.f32.gmra.mrb[6].mxu0 %vm288_vm0, %v652_v45  ;;  %vm1271_vm0 = vcmask 261255  }
  0xfd   : > { %v363_v12 = vpop.f32.mrb[0].mxu1 }
  0xfe   : > { %v365_v27 = vpop.f32.mrb[1].mxu1 }
 0x101   : > { %v369_v47 = vpop.f32.mrb[2].mxu1 }
 0x102   : > { %v371_v48 = vpop.f32.mrb[3].mxu1 }
 0x105   : > { %v375_v49 = vpop.f32.mrb[4].mxu1 }
 0x106   : > { %v377_v38 = vpop.f32.mrb[5].mxu1 }
 0x109   : > { %v381_v50 = vpop.f32.mrb[6].mxu1 }
 0x10a   : > { %v2313_v51 = vpop.f32.mrb[7].mxu1 }
 0x123   : > { %v728_v58 = vpop.f32.mrb[0].mxu0 }
 0x124   : > { %v1848_v62 = vadd.f32 %v728_v58, %v363_v12  ;;  %v730_v63 = vpop.f32.mrb[1].mxu0  ;;  %v1647_v12 = vld [vmem:[%s2706_s3 + $0x120] sm:$0xff] }
 0x125   : > { %v1849_v4 = vadd.f32 %v730_v63, %v365_v27  ;;  %v1650_v27 = vld [vmem:[%s2706_s3 + $0x138] sm:$0xff] }
 0x126   : > { %v2343_v6 = vadd.f32 %v1848_v62, %v2324_v57  ;;  %v1654_v62 = vld [vmem:[%s2706_s3 + $0x158] sm:$0xf] }
 0x127   : > { %v734_v8 = vpop.f32.mrb[2].mxu0  ;;  %v772_v11 = vadd.f32 %v1849_v4, %v2334_v0  ;;  %v842_v63 = vld [vmem:[%s2706_s3 + $0x18] sm:$0xff] }
 0x128   : > { %v1850_v13 = vadd.f32 %v734_v8, %v369_v47  ;;  %v736_v14 = vpop.f32.mrb[3].mxu0  ;;  %v779_v15 = vmax.f32 %v2343_v6, 0.0 }
 0x129   : > { %v1851_v19 = vadd.f32 %v736_v14, %v371_v48  ;;  %v780_v26 = vmax.f32 %v772_v11, 0.0  ;;  %v1802_v48 = vpack.c.bf16 %v1647_v12, %v1645_v60  ;;  %v854_v60 = vld [vmem:[%s2706_s3 + $0x78] sm:$0xff] }
 0x12a   : > { %795 = vrot.lane.b32.xlu0 %v779_v15, %s1903_s29  ;;  %v2363_v21 = vadd.f32 %v1850_v13, %v2324_v57 }
 0x12b   : > { %v774_v22 = vadd.f32 %v1851_v19, %v2334_v0  ;;  %v740_v23 = vpop.f32.mrb[4].mxu0  ;;  %1803 = vmatpush1.bf16.msra.mxu1 %v1802_v48  ;;  %v853_v48 = vld [vmem:[%s2706_s3 + $0x70] sm:$0xff] }
 0x12c   : > { %v1852_v28 = vadd.f32 %v740_v23, %v375_v49  ;;  %v742_v29 = vpop.f32.mrb[5].mxu0  ;;  %v781_v30 = vmax.f32 %v2363_v21, 0.0  ;;  %v1652_v49 = vld [vmem:[%s2706_s3 + $0x148] sm:$0xff] }
 0x12d   : > { %v1853_v34 = vadd.f32 %v742_v29, %v377_v38  ;;  %v782_v37 = vmax.f32 %v774_v22, 0.0  ;;  %v1649_v38 = vld [vmem:[%s2706_s3 + $0x130] sm:$0xff] }
 0x12e   : > { %v2380_v36 = vadd.f32 %v1852_v28, %v2324_v57  ;;  %797 = vrot.lane.b32.xlu0 %v780_v26, %s1903_s29  ;;  %799 = vrot.lane.b32.xlu1 %v781_v30, %s1903_s29 }
 0x12f   : > { %v746_v39 = vpop.f32.mrb[6].mxu0  ;;  %v776_v43 = vadd.f32 %v1853_v34, %v2334_v0  ;;  %v1810_v34 = vpack.c.bf16 %v841_v25, %v839_v24  ;;  %v1682_v24 = vld [vmem:[%s2706_s3 + $0x1f8] sm:$0xff] }
 0x130   : > { %v783_v42 = vmax.f32 %v2380_v36, 0.0  ;;  %v1854_v44 = vadd.f32 %v746_v39, %v381_v50  ;;  %v748_v45 = vpop.f32.mrb[7].mxu0  ;;  %v1651_v50 = vld [vmem:[%s2706_s3 + $0x140] sm:$0xff] }
 0x131   : > { %v1855_v47 = vadd.f32 %v748_v45, %v2313_v51  ;;  %v1804_v51 = vpack.c.bf16 %v1652_v49, %v1650_v27  ;;  %v784_v55 = vmax.f32 %v776_v43, 0.0  ;;  %v1806_v61 = vpack.c.bf16 %v1651_v50, %v1649_v38  ;;  %v843_v36 = vld [vmem:[%s2706_s3 + $0x20] sm:$0xff]  ;;  %v849_v45 = vld [vmem:[%s2706_s3 + $0x50] sm:$0xff]  ;;  %v856_v49 = vld [vmem:[%s2706_s3 + $0x88] sm:$0xff] }
 0x132   : > { %v777_v52 = vadd.f32 %v1854_v44, %v2324_v57  ;;  %801 = vrot.lane.b32.xlu1 %v782_v37, %s1903_s29  ;;  %803 = vrot.lane.b32.xlu0 %v783_v42, %s1903_s29  ;;  %v840_v57 = vld [vmem:[%s2706_s3 + $0x8] sm:$0xff]  ;;  %v845_v37 = vld [vmem:[%s2706_s3 + $0x30] sm:$0xff]  ;;  %v1816_v43 = vpack.c.bf16 %v850_v41, %v848_v40  ;;  %v1820_v27 = vpack.c.bf16 %v854_v60, %v852_v46 }
 0x133   : > { %v778_v59 = vadd.f32 %v1855_v47, %v2334_v0  ;;  %1805 = vmatprep.subr.bf16.mxu1 %v1804_v51  ;;  %v1808_v2 = vpack.c.bf16 %v842_v63, %v840_v57  ;;  %v847_v44 = vld [vmem:[%s2706_s3 + $0x40] sm:$0xff]  ;;  %v858_v38 = vld [vmem:[%s2706_s3 + $0x98] sm:$0xff]  ;;  %v1665_v63 = vld [vmem:[%s2706_s3 + $0x170] sm:$0xff] }
 0x134   : > { %v785_v58 = vmax.f32 %v777_v52, 0.0  ;;  %1807 = vmatpush1.bf16.msra.mxu1 %v1806_v61  ;;  %v1818_v12 = vpack.c.bf16 %v849_v45, %v847_v44  ;;  %v851_v47 = vld [vmem:[%s2706_s3 + $0x60] sm:$0xff]  ;;  %v1824_v52 = vpack.c.bf16 %v858_v38, %v856_v49  ;;  %v1664_v61 = vld [vmem:[%s2706_s3 + $0x168] sm:$0xff] }
 0x135   : > { %v786_v0 = vmax.f32 %v778_v59, 0.0  ;;  %1655 = vmatprep.subr.msk.mxu1 %vm893_vm4, %v1654_v62  ;;  %v1822_v50 = vpack.c.bf16 %v853_v48, %v851_v47  ;;  %v855_v51 = vld [vmem:[%s2706_s3 + $0x80] sm:$0xff]  ;;  %v860_v59 = vld [vmem:[%s2706_s3 + $0xa8] sm:$0xf]  ;;  %v1666_v62 = vld [vmem:[%s2706_s3 + $0x178] sm:$0xff] }
 0x136   : > { %805 = vrot.lane.b32.xlu1 %v784_v55, %s1903_s29  ;;  %807 = vrot.lane.b32.xlu0 %v785_v58, %s1903_s29  ;;  %v857_v55 = vld [vmem:[%s2706_s3 + $0x90] sm:$0xff]  ;;  %v1663_v57 = vld [vmem:[%s2706_s3 + $0x160] sm:$0xff] }
 0x138   : > { %1656 = vmatpush1.msk.msra.mxu1 %vm893_vm4, %v1653_v1  ;;  %v1670_v1 = vld [vmem:[%s2706_s3 + $0x198] sm:$0xff] }
 0x139   : > { %1809 = vmatprep.subr.bf16.mxu1 %v1808_v2  ;;  %v859_v2 = vld [vmem:[%s2706_s3 + $0xa0] sm:$0xf] }
 0x13a   : > { %809 = vrot.lane.b32.xlu1 %v786_v0, %s1903_s29  ;;  %v1668_v0 = vld [vmem:[%s2706_s3 + $0x188] sm:$0xff]  ;;  %s1907_s29 = smov 80  }
 0x19c   : > { %v796_v3 = vpop.permute.xlu0 %795 }
 0x1a0   : > { %v798_v4 = vpop.permute.xlu0 %797  ;;  %v800_v5 = vpop.permute.xlu1 %799 }
 0x1a1   : > { %v812_v8 = vsel %vm811_vm5, %v796_v3, %v798_v4  ;;  %v1828_v3 = vpack.c.bf16 %v1666_v62, %v1664_v61  ;;  %v1830_v4 = vpack.c.bf16 %v1665_v63, %v1663_v57 }
 0x1a2   : > { %v820_v9 = vmax.f32 %v779_v15, %v812_v8  ;;  %v1667_v8 = vld [vmem:[%s2706_s3 + $0x180] sm:$0xff] }
 0x1a4   : > { %825 = vst.msk [vmem:[#allocation2] sm:$0xff] %vm824_vm6, %v820_v9  ;;  %v802_v10 = vpop.permute.xlu1 %801  ;;  %v804_v14 = vpop.permute.xlu0 %803  ;;  %v1669_v9 = vld [vmem:[%s2706_s3 + $0x190] sm:$0xff] }
 0x1a5   : > { %v813_v11 = vsel %vm811_vm5, %v800_v5, %v802_v10  ;;  %v1832_v5 = vpack.c.bf16 %v1670_v1, %v1668_v0  ;;  %v1672_v10 = vld [vmem:[%s2706_s3 + $0x1a8] sm:$0xff] }
 0x1a6   : > { %v821_v13 = vmax.f32 %v781_v30, %v813_v11  ;;  %v844_v30 = vld [vmem:[%s2706_s3 + $0x28] sm:$0xff]  ;;  %v1674_v11 = vld [vmem:[%s2706_s3 + $0x1b8] sm:$0xff] }
 0x1a7   : > { %v1812_v35 = vpack.c.bf16 %v846_v31, %v844_v30  ;;  %v1681_v30 = vld [vmem:[%s2706_s3 + $0x1f0] sm:$0xff] }
 0x1a8   : > { %826 = vst.msk [vmem:[#allocation2 + $0x8] sm:$0xff] %vm824_vm6, %v821_v13  ;;  %v806_v16 = vpop.permute.xlu1 %805  ;;  %v808_v19 = vpop.permute.xlu0 %807  ;;  %v1834_v13 = vpack.c.bf16 %v1669_v9, %v1667_v8 }
 0x1a9   : > { %v814_v17 = vsel %vm811_vm5, %v804_v14, %v806_v16  ;;  %v1836_v14 = vpack.c.bf16 %v1674_v11, %v1672_v10  ;;  %v1671_v16 = vld [vmem:[%s2706_s3 + $0x1a0] sm:$0xff] }
 0x1aa   : > { %v822_v18 = vmax.f32 %v783_v42, %v814_v17  ;;  %v1814_v42 = vpack.c.bf16 %v845_v37, %v843_v36  ;;  %v1673_v17 = vld [vmem:[%s2706_s3 + $0x1b0] sm:$0xff] }
 0x1ac   : > { %827 = vst.msk [vmem:[#allocation2 + $0x10] sm:$0xff] %vm824_vm6, %v822_v18  ;;  %v810_v6 = vpop.permute.xlu1 %809  ;;  %v1676_v18 = vld [vmem:[%s2706_s3 + $0x1c8] sm:$0xff] }
 0x1ad   : > { %v815_v15 = vsel %vm811_vm5, %v808_v19, %v810_v6  ;;  %v1678_v19 = vld [vmem:[%s2706_s3 + $0x1d8] sm:$0xff]  ;;  %v1838_v6 = vpack.c.bf16 %v1673_v17, %v1671_v16  ;;  %vm1309_vm5 = vcmask 518530  }
 0x1ae   : > { %v823_v20 = vmax.f32 %v785_v58, %v815_v15  ;;  %v1826_v58 = vpack.c.bf16 %v857_v55, %v855_v51  ;;  %v1840_v15 = vpack.c.bf16 %v1678_v19, %v1676_v18 }
 0x1af   : > { %v830_v22 = vld [vmem:[#allocation2] ss:$2 sm:$0xff]  ;;  %v834_v23 = vld [vmem:[#allocation2 + $0x1] ss:$2 sm:$0xff] }
 0x1b0   : > { %829 = vst.msk [vmem:[#allocation2 + $0x18] sm:$0x1f] %vm828_vm7, %v823_v20  ;;  %v2445_v21 = vmax.f32 %v830_v22, %v834_v23  ;;  %v1675_v20 = vld [vmem:[%s2706_s3 + $0x1c0] sm:$0xff]  ;;  %v1677_v22 = vld [vmem:[%s2706_s3 + $0x1d0] sm:$0xff]  ;;  %v1680_v23 = vld [vmem:[%s2706_s3 + $0x1e8] sm:$0xff]  ;;  %vm1315_vm7 = vcmask 520580  }
 0x1b1   : > { %v1842_v25 = vpack.c.bf16 %v1677_v22, %v1675_v20 }
 0x1b2   : > { %v886_v32 = vrot.slane %v2445_v21, 1 }
 0x1b7   : > { %v832_v26 = vld [vmem:[#allocation2 + $0x10] ss:$2 sm:$0x3f]  ;;  %v836_v28 = vld [vmem:[#allocation2 + $0x11] ss:$2 sm:$0x3f] }
 0x1b8   : > { %v2453_v29 = vmax.f32 %v832_v26, %v836_v28  ;;  %v1844_v26 = vpack.c.bf16 %v1682_v24, %v1680_v23  ;;  %v1679_v28 = vld [vmem:[%s2706_s3 + $0x1e0] sm:$0xff] }
 0x1b9   : > { %v1846_v31 = vpack.c.bf16 %v1681_v30, %v1679_v28 }
 0x1ba   : > { %v887_v33 = vrot.slane %v2453_v29, 1 }
 0x1bc   : > { %v888_v39 = vsel %vm280_vm1, %v886_v32, %v887_v33  ;;  %v1684_v32 = vld [vmem:[%s2706_s3 + $0x208] sm:$0xf]  ;;  %vm1275_vm1 = vcmask 255105  }
 0x1bd   : > { %1657 = vmatmul.mubr.msk.f32.vlgmr.msra.gmra.mrb[8].mxu1 %vm824_vm6, %v888_v39 }
 0x1be   : > { %1811 = vmatpush1.bf16.msra.mxu1 %v1810_v34  ;;  %970 = vmatprep.mubr.f32.mxu1 %v1902_v7  ;;  %v1683_v34 = vld [vmem:[%s2706_s3 + $0x200] sm:$0xf] }
 0x1bf   : > { %1813 = vmatprep.subr.bf16.mxu1 %v1812_v35  ;;  %v1087_v35 = vrot.slane %v2445_v21, 2 }
 0x1c1   : > { %1658 = vmatmul.mubr.msk.f32.gmra.mrb[10].mxu1 %vm824_vm6, %v887_v33  ;;  %v1088_v33 = vrot.slane %v2453_v29, 2 }
 0x1c2   : > { %1815 = vmatpush1.bf16.msra.mxu1 %v1814_v42  ;;  %1051 = vmatprep.mubr.f32.mxu1 %v1902_v7 }
 0x1c3   : > { %1817 = vmatprep.subr.bf16.mxu1 %v1816_v43  ;;  %v1089_v36 = vsel %vm508_vm2, %v1087_v35, %v1088_v33  ;;  %vm1281_vm2 = vcmask 385280  }
 0x1c6   : > { %1819 = vmatpush1.bf16.msra.mxu1 %v1818_v12 }
 0x1c7   : > { %1821 = vmatprep.subr.bf16.mxu1 %v1820_v27 }
 0x1ca   : > { %1823 = vmatpush1.bf16.msra.mxu1 %v1822_v50 }
 0x1cb   : > { %1825 = vmatprep.subr.bf16.mxu1 %v1824_v52 }
 0x1ce   : > { %1827 = vmatpush1.bf16.msra.mxu1 %v1826_v58 }
 0x1cf   : > { %1659 = vmatprep.subr.msk.mxu1 %vm893_vm4, %v860_v59 }
 0x1d2   : > { %1660 = vmatpush1.msk.msra.mxu1 %vm893_vm4, %v859_v2 }
 0x1d3   : > { %1661 = vmatmul.mubr.msk.f32.vlgmr.msra.gmra.mrb[8].mxu1 %vm824_vm6, %v2445_v21  ;;  %1829 = vmatprep.subr.bf16.mxu1 %v1828_v3 }
 0x1d4   : > { %1831 = vmatpush1.bf16.msra.mxu1 %v1830_v4  ;;  %1057 = vmatprep.mubr.f32.mxu1 %v1902_v7 }
 0x1d5   : > { %1833 = vmatprep.subr.bf16.mxu1 %v1832_v5 }
 0x1d7   : > { %1662 = vmatmul.mubr.msk.f32.gmra.mrb[10].mxu1 %vm824_vm6, %v2453_v29  ;;  %v1181_v29 = vld [vmem:[%s2707_s4] sm:$0x3] }
 0x1d8   : > { %1835 = vmatpush1.bf16.msra.mxu1 %v1834_v13  ;;  %1164 = vmatprep.mubr.f32.mxu1 %v1902_v7  ;;  %v1186_v37 = vrot.slane %v1181_v29, %v763_v54  ;;  %v1190_v21 = vrot.slane %v1181_v29, %v767_v56 }
 0x1d9   : > { %1837 = vmatprep.subr.bf16.mxu1 %v1836_v14 }
 0x1dc   : > { %1839 = vmatpush1.bf16.msra.mxu1 %v1838_v6 }
 0x1dd   : > { %1841 = vmatprep.subr.bf16.mxu1 %v1840_v15 }
 0x1e0   : > { %1843 = vmatpush1.bf16.msra.mxu1 %v1842_v25 }
 0x1e1   : > { %1845 = vmatprep.subr.bf16.mxu1 %v1844_v26 }
 0x1e4   : > { %1847 = vmatpush1.bf16.msra.mxu1 %v1846_v31 }
 0x1e5   : > { %1685 = vmatprep.subr.msk.mxu1 %vm893_vm4, %v1684_v32 }
 0x1e8   : > { %1686 = vmatpush1.msk.msra.mxu1 %vm893_vm4, %v1683_v34  ;;  %vm1307_vm4 = vcmask 516480  }
 0x1e9   : > { %1687 = vmatmul.mubr.msk.f32.vlgmr.msra.gmra.mrb[8].mxu1 %vm824_vm6, %v1089_v36 }
 0x1ea   : > { %1170 = vmatprep.mubr.f32.mxu1 %v1902_v7 }
 0x1ed   : > { %1688 = vmatmul.mubr.msk.f32.gmra.mrb[10].mxu1 %vm824_vm6, %v1088_v33  ;;  %vm1289_vm6 = vcmask 389380  }
 0x2bc   : > { %v1166_v39 = vpop.f32.mrb[8].mxu1 }
 0x2bd   : > { %v1193_v40 = vadd.f32 %v1186_v37, %v1166_v39  ;;  %v1168_v41 = vpop.f32.mrb[9].mxu1 }
 0x2be   : > { %v1194_v42 = vadd.f32 %v1190_v21, %v1168_v41 }
 0x2bf   : > { %v1197_v43 = vmax.f32 %v1193_v40, 0.0 }
 0x2c0   : > { %v1198_v44 = vmax.f32 %v1194_v42, 0.0  ;;  %v1172_v45 = vpop.f32.mrb[10].mxu1 }
 0x2c1   : > { %1203 = vrot.lane.b32.xlu0 %v1197_v43, %s1904_s9  ;;  %v1174_v7 = vpop.f32.mrb[11].mxu1  ;;  %v1195_v46 = vadd.f32 %v1186_v37, %v1172_v45 }
 0x2c2   : > { %1384 = vrot.lane.b32.xlu1 %v1198_v44, %s1904_s9  ;;  %v1196_v54 = vadd.f32 %v1190_v21, %v1174_v7 }
 0x2c3   : > { %v1199_v53 = vmax.f32 %v1195_v46, 0.0 }
 0x2c4   : > { %v2611_v56 = vmax.f32 %v1196_v54, 0.0 }
 0x2c5   : > { %1240 = vrot.lane.b32.xlu0 %v1197_v43, %s1905_s10 }
 0x2c6   : > { %1331 = vrot.lane.b32.xlu1 %v1198_v44, %s1905_s10 }
 0x2c9   : > { %1242 = vrot.lane.b32.xlu0 %v1199_v53, %s1905_s10 }
 0x2ca   : > { %1205 = vrot.lane.b32.xlu1 %v1199_v53, %s1904_s9 }
 0x2cd   : > { %1386 = vrot.lane.b32.xlu0 %v2611_v56, %s1904_s9 }
 0x2ce   : > { %1333 = vrot.lane.b32.xlu1 %v2611_v56, %s1905_s10 }
 0x333   : > { %v1204_v60 = vpop.permute.xlu0 %1203 }
 0x334   : > { %v1209_v12 = vmax.f32 %v1197_v43, %v1204_v60  ;;  %v1385_v27 = vpop.permute.xlu1 %1384 }
 0x335   : > { %v2617_v47 = vmax.f32 %v1198_v44, %v1385_v27 }
 0x336   : > { %v1212_v48 = vrot.slane %v1209_v12, 1  ;;  %v1215_v55 = vrot.slane %v1209_v12, 2  ;;  %v1222_v58 = vrot.slane %v1209_v12, 3 }
 0x337   : > { %v1241_v49 = vpop.permute.xlu0 %1240  ;;  %v1440_v38 = vrot.slane %v2617_v47, 1  ;;  %v1443_v57 = vrot.slane %v2617_v47, 2  ;;  %v1454_v8 = vrot.slane %v2617_v47, 3 }
 0x338   : > { %v1246_v50 = vmax.f32 %v1209_v12, %v1241_v49  ;;  %v1332_v52 = vpop.permute.xlu1 %1331  ;;  %v1214_v51 = vmax.f32 %v1209_v12, %v1212_v48 }
 0x339   : > { %v1442_v59 = vmax.f32 %v2617_v47, %v1440_v38  ;;  %v2627_v61 = vmax.f32 %v1209_v12, %v1332_v52  ;;  %v2635_v9 = vmax.f32 %v2617_v47, %v1332_v52 }
 0x33a   : > { %v1217_v62 = vmax.f32 %v1214_v51, %v1215_v55  ;;  %v1249_v63 = vrot.slane %v1246_v50, 1  ;;  %v1252_v4 = vrot.slane %v1246_v50, 2  ;;  %v1259_v11 = vrot.slane %v1246_v50, 3 }
 0x33b   : > { %v1445_v2 = vmax.f32 %v1442_v59, %v1443_v57  ;;  %v1340_v13 = vrot.slane %v2627_v61, 1  ;;  %v1243_v14 = vpop.permute.xlu0 %1242  ;;  %v1395_v23 = vrot.slane %v2635_v9, 1  ;;  %v1343_v28 = vrot.slane %v2627_v61, 2 }
 0x33c   : > { %v1206_v0 = vpop.permute.xlu1 %1205  ;;  %1304 = vrot.lane.b32.xlu0 %v1217_v62, %s1905_s10  ;;  %v1224_v1 = vmax.f32 %v1217_v62, %v1222_v58  ;;  %v1251_v3 = vmax.f32 %v1246_v50, %v1249_v63  ;;  %1219 = vst.msk [vmem:[%s2624_s14] sm:$0x1] %vm1218_vm8, %v1217_v62  ;;  %v1398_v21 = vrot.slane %v2635_v9, 2  ;;  %v1354_v42 = vrot.slane %v2627_v61, 3 }
 0x33d   : > { %1221 = vst.msk [vmem:[%s2624_s14 - $0x1] sm:$0x4] %vm1220_vm9, %v1217_v62  ;;  %v1210_v5 = vmax.f32 %v1199_v53, %v1206_v0  ;;  %v1456_v17 = vmax.f32 %v1445_v2, %v1454_v8  ;;  %v1342_v22 = vmax.f32 %v2627_v61, %v1340_v13  ;;  %v1397_v34 = vmax.f32 %v2635_v9, %v1395_v23 }
 0x33e   : > { %1226 = vst.msk [vmem:[%s2624_s14 - $0x2] sm:$0x10] %vm1225_vm10, %v1224_v1  ;;  %1312 = vrot.lane.b32.xlu1 %v1224_v1, %s1905_s10  ;;  %v1254_v10 = vmax.f32 %v1251_v3, %v1252_v4  ;;  %v1409_v7 = vrot.slane %v2635_v9, 3  ;;  %vm1350_vm8 = vcmask 647680   ;;  %vm1352_vm9 = vcmask 649730  }
 0x33f   : > { %v1228_v16 = vrot.slane %v1210_v5, 1  ;;  %v1247_v19 = vmax.f32 %v1210_v5, %v1243_v14  ;;  %v1231_v6 = vrot.slane %v1210_v5, 2  ;;  %v1345_v33 = vmax.f32 %v1342_v22, %v1343_v28  ;;  %v1387_v29 = vpop.permute.xlu0 %1386 }
 0x340   : > { %1447 = vrot.lane.b32.xlu0 %v1445_v2, %s1906_s19  ;;  %v1261_v18 = vmax.f32 %v1254_v10, %v1259_v11  ;;  %1256 = vst.msk [vmem:[%s2624_s14] sm:$0x1] %vm1255_vm11, %v1254_v10  ;;  %v1334_v37 = vpop.permute.xlu1 %1333  ;;  %v1391_v39 = vmax.f32 %v2611_v56, %v1387_v29  ;;  %v1400_v41 = vmax.f32 %v1397_v34, %v1398_v21  ;;  %vm1405_vm10 = vcmask 778880  }
 0x341   : > { %1258 = vst.msk [vmem:[%s2624_s14 - $0x1] sm:$0x4] %vm1257_vm12, %v1254_v10  ;;  %v1236_v15 = vmax.f32 %v1210_v5, %v1228_v16  ;;  %v1230_v20 = vmax.f32 %v1209_v12, %v1228_v16  ;;  %v1265_v24 = vrot.slane %v1247_v19, 1  ;;  %v1268_v31 = vrot.slane %v1247_v19, 2 }
 0x342   : > { %1458 = vrot.lane.b32.xlu1 %v1456_v17, %s1906_s19  ;;  %1263 = vst.msk [vmem:[%s2624_s14 - $0x2] sm:$0x10] %vm1262_vm13, %v1261_v18  ;;  %v1338_v40 = vmax.f32 %v1210_v5, %v1334_v37  ;;  %v1356_v43 = vmax.f32 %v1345_v33, %v1354_v42  ;;  %v1393_v45 = vmax.f32 %v1391_v39, %v1334_v37  ;;  %v1464_v48 = vrot.slane %v1391_v39, 1 }
 0x343   : > { %v1237_v25 = vmax.f32 %v1236_v15, %v1231_v6  ;;  %v1233_v26 = vmax.f32 %v1230_v20, %v1231_v6  ;;  %v1267_v30 = vmax.f32 %v1246_v50, %v1265_v24  ;;  %v1273_v32 = vmax.f32 %v1247_v19, %v1265_v24 }
 0x344   : > { %1278 = vrot.lane.b32.xlu0 %v1254_v10, %s1904_s9  ;;  %v1364_v44 = vrot.slane %v1338_v40, 1  ;;  %v1411_v46 = vmax.f32 %v1400_v41, %v1409_v7  ;;  %v1419_v53 = vrot.slane %v1393_v45, 1  ;;  %v1367_v56 = vrot.slane %v1338_v40, 2 }
 0x345   : > { %1239 = vst.msk [vmem:[%s2624_s14 + $0x3] sm:$0x2] %vm1238_vm14, %v1237_v25  ;;  %v1270_v35 = vmax.f32 %v1267_v30, %v1268_v31  ;;  %v1274_v36 = vmax.f32 %v1273_v32, %v1268_v31  ;;  %v1422_v38 = vrot.slane %v1393_v45, 2  ;;  %v1466_v51 = vmax.f32 %v2617_v47, %v1464_v48 }
 0x346   : > { %1235 = vst.msk [vmem:[%s2624_s14 - $0x4] sm:$0x80] %vm1234_vm15, %v1233_v26  ;;  %1286 = vrot.lane.b32.xlu1 %v1261_v18, %s1904_s9  ;;  %v1366_v54 = vmax.f32 %v2627_v61, %v1364_v44  ;;  %v1376_v60 = vmax.f32 %v1338_v40, %v1364_v44  ;;  %v1421_v27 = vmax.f32 %v2635_v9, %v1419_v53  ;;  %v1467_v58 = vrot.slane %v1391_v39, 2 }
 0x347   : > { %1272 = vst.msk [vmem:[%s2624_s14 - $0x4] sm:$0x80] %vm1271_vm0, %v1270_v35  ;;  %v1431_v50 = vmax.f32 %v1393_v45, %v1419_v53  ;;  %v1476_v59 = vmax.f32 %v1391_v39, %v1464_v48  ;;  %vm1407_vm11 = vcmask 780930   ;;  %vm1450_vm12 = vcmask 910080  }
 0x348   : > { %1347 = vrot.lane.b32.xlu0 %v1345_v33, %s1905_s10  ;;  %1276 = vst.msk [vmem:[%s2624_s14 + $0x3] sm:$0x2] %vm1275_vm1, %v1274_v36  ;;  %v1369_v12 = vmax.f32 %v1366_v54, %v1367_v56  ;;  %v1377_v49 = vmax.f32 %v1376_v60, %v1367_v56  ;;  %v1424_v52 = vmax.f32 %v1421_v27, %v1422_v38  ;;  %vm1452_vm13 = vcmask 912130  }
 0x349   : > { %v1432_v55 = vmax.f32 %v1431_v50, %v1422_v38  ;;  %v1469_v61 = vmax.f32 %v1466_v51, %v1467_v58  ;;  %v1477_v62 = vmax.f32 %v1476_v59, %v1467_v58  ;;  %vm1361_vm14 = vcmask 651780  }
 0x34a   : > { %1324 = vrot.lane.b32.xlu1 %v1237_v25, %s1905_s10  ;;  %vm1416_vm15 = vcmask 782980   ;;  %vm1461_vm0 = vcmask 914180   ;;  %vm1295_vm1 = vcmask 392455  }
 0x34c   : > { %1402 = vrot.lane.b32.xlu0 %v1400_v41, %s1907_s29 }
 0x34e   : > { %1358 = vrot.lane.b32.xlu1 %v1356_v43, %s1905_s10 }
 0x350   : > { %1318 = vrot.lane.b32.xlu0 %v1233_v26, %s1905_s10 }
 0x352   : > { %1413 = vrot.lane.b32.xlu1 %v1411_v46, %s1907_s29 }
 0x354   : > { %1292 = vrot.lane.b32.xlu0 %v1270_v35, %s1904_s9 }
 0x356   : > { %1298 = vrot.lane.b32.xlu1 %v1274_v36, %s1904_s9 }
 0x358   : > { %1371 = vrot.lane.b32.xlu0 %v1369_v12, %s1905_s10 }
 0x35a   : > { %1379 = vrot.lane.b32.xlu1 %v1377_v49, %s1905_s10 }
 0x35c   : > { %1426 = vrot.lane.b32.xlu0 %v1424_v52, %s1907_s29 }
 0x35e   : > { %1434 = vrot.lane.b32.xlu1 %v1432_v55, %s1907_s29 }
 0x360   : > { %1471 = vrot.lane.b32.xlu0 %v1469_v61, %s1906_s19 }
 0x362   : > { %1479 = vrot.lane.b32.xlu1 %v1477_v62, %s1906_s19 }
 0x3ae   : > { %v1305_v57 = vpop.permute.xlu0 %1304 }
 0x3b0   : > { %v1313_v63 = vpop.permute.xlu1 %1312 }
 0x3b2   : > { %v1448_v0 = vpop.permute.xlu0 %1447 }
 0x3b4   : > { %v1459_v47 = vpop.permute.xlu1 %1458 }
 0x3b6   : > { %v1279_v1 = vpop.permute.xlu0 %1278 }
 0x3b7   : > { %1282 = vst.msk [vmem:[%s2624_s14] sm:$0x1] %vm1281_vm2, %v1279_v1  ;;  %vm1321_vm2 = vcmask 523655  }
 0x3b8   : > { %1284 = vst.msk [vmem:[%s2624_s14 - $0x1] sm:$0x4] %vm1283_vm3, %v1279_v1  ;;  %v1287_v2 = vpop.permute.xlu1 %1286  ;;  %vm1301_vm3 = vcmask 386305  }
 0x3b9   : > { %1308 = vst.msk [vmem:[%s2624_s14] sm:$0x1] %vm1307_vm4, %v1305_v57  ;;  %vm1327_vm4 = vcmask 517505  }
 0x3ba   : > { %1310 = vst.msk [vmem:[%s2624_s14 - $0x1] sm:$0x4] %vm1309_vm5, %v1305_v57  ;;  %v1348_v3 = vpop.permute.xlu0 %1347  ;;  %vm1374_vm5 = vcmask 654855  }
 0x3bb   : > { %1290 = vst.msk [vmem:[%s2624_s14 - $0x2] sm:$0x10] %vm1289_vm6, %v1287_v2  ;;  %vm1382_vm6 = vcmask 648705  }
 0x3bc   : > { %1316 = vst.msk [vmem:[%s2624_s14 - $0x2] sm:$0x10] %vm1315_vm7, %v1313_v63  ;;  %v1325_v4 = vpop.permute.xlu1 %1324  ;;  %vm1429_vm7 = vcmask 786055  }
 0x3bd   : > { %1351 = vst.msk [vmem:[%s2624_s14] sm:$0x1] %vm1350_vm8, %v1348_v3  ;;  %vm1437_vm8 = vcmask 779905  }
 0x3be   : > { %1353 = vst.msk [vmem:[%s2624_s14 - $0x1] sm:$0x4] %vm1352_vm9, %v1348_v3  ;;  %v1403_v5 = vpop.permute.xlu0 %1402  ;;  %vm1474_vm9 = vcmask 917255  }
 0x3bf   : > { %1406 = vst.msk [vmem:[%s2624_s14] sm:$0x1] %vm1405_vm10, %v1403_v5  ;;  %vm1482_vm10 = vcmask 911105  }
 0x3c0   : > { %1408 = vst.msk [vmem:[%s2624_s14 - $0x1] sm:$0x4] %vm1407_vm11, %v1403_v5  ;;  %v1359_v8 = vpop.permute.xlu1 %1358 }
 0x3c1   : > { %1451 = vst.msk [vmem:[%s2624_s14] sm:$0x1] %vm1450_vm12, %v1448_v0 }
 0x3c2   : > { %1453 = vst.msk [vmem:[%s2624_s14 - $0x1] sm:$0x4] %vm1452_vm13, %v1448_v0  ;;  %v1319_v9 = vpop.permute.xlu0 %1318 }
 0x3c3   : > { %1362 = vst.msk [vmem:[%s2624_s14 - $0x2] sm:$0x10] %vm1361_vm14, %v1359_v8 }
 0x3c4   : > { %v1414_v10 = vpop.permute.xlu1 %1413 }
 0x3c5   : > { %1417 = vst.msk [vmem:[%s2624_s14 - $0x2] sm:$0x10] %vm1416_vm15, %v1414_v10 }
 0x3c6   : > { %1462 = vst.msk [vmem:[%s2624_s14 - $0x2] sm:$0x10] %vm1461_vm0, %v1459_v47  ;;  %v1293_v11 = vpop.permute.xlu0 %1292 }
 0x3c7   : > { %1296 = vst.msk [vmem:[%s2624_s14 - $0x4] sm:$0x80] %vm1295_vm1, %v1293_v11 }
 0x3c8   : > { %v1299_v13 = vpop.permute.xlu1 %1298  ;;  %1322 = vst.msk [vmem:[%s2624_s14 - $0x4] sm:$0x80] %vm1321_vm2, %v1319_v9 }
 0x3c9   : > { %1302 = vst.msk [vmem:[%s2624_s14 + $0x3] sm:$0x2] %vm1301_vm3, %v1299_v13 }
 0x3ca   : > { %v1372_v14 = vpop.permute.xlu0 %1371  ;;  %1328 = vst.msk [vmem:[%s2624_s14 + $0x3] sm:$0x2] %vm1327_vm4, %v1325_v4 }
 0x3cb   : > { %1375 = vst.msk [vmem:[%s2624_s14 - $0x4] sm:$0x80] %vm1374_vm5, %v1372_v14 }
 0x3cc   : > { %v1380_v16 = vpop.permute.xlu1 %1379 }
 0x3cd   : > { %1383 = vst.msk [vmem:[%s2624_s14 + $0x3] sm:$0x2] %vm1382_vm6, %v1380_v16 }
 0x3ce   : > { %v1427_v17 = vpop.permute.xlu0 %1426 }
 0x3cf   : > { %1430 = vst.msk [vmem:[%s2624_s14 - $0x4] sm:$0x80] %vm1429_vm7, %v1427_v17 }
 0x3d0   : > { %v1435_v18 = vpop.permute.xlu1 %1434 }
 0x3d1   : > { %1438 = vst.msk [vmem:[%s2624_s14 + $0x3] sm:$0x2] %vm1437_vm8, %v1435_v18 }
 0x3d2   : > { %v1472_v19 = vpop.permute.xlu0 %1471 }
 0x3d3   : > { %1475 = vst.msk [vmem:[%s2624_s14 - $0x4] sm:$0x80] %vm1474_vm9, %v1472_v19 }
 0x3d4   : > { %v1480_v6 = vpop.permute.xlu1 %1479 }
 0x3d5   : > { %1483 = vst.msk [vmem:[%s2624_s14 + $0x3] sm:$0x2] %vm1482_vm10, %v1480_v6 }
 0x3d6 PF: > { %s15_s18 = sadd.s32 1, %s1900_s18  }
 0x3d7   : > { %p12_p4 = scmp.ge.s32.totalorder %s15_s18, 4  }
 0x3d9   :  { %14 = sbr.rel (!%p12_p4) target bundleno = 1 (0x1), region = 78 }

// kernel: net_forward.3
= control target key start
LH: loop header
LB: loop body
LE: loop exit
PB: predicated region body
PF: predicated region fallthrough
CT: control target
= control target key end

     0   :  { %v884_v43 = vmov 1983009808   ;;  %v112_v45 = vlaneseq  ;;  %s1267_s0 = inlined_call_operand.vmem [shape: f32[2,560], index: 0, kind: input, shape index: {}]   ;;  %s1268_s1 = inlined_call_operand.vmem [shape: f32[560,120], index: 1, kind: input, shape index: {}]   ;;  %s1269_s2 = inlined_call_operand.vmem [shape: f32[1,120], index: 2, kind: input, shape index: {}]   ;;  %s1270_s3 = inlined_call_operand.vmem [shape: f32[120,84], index: 3, kind: input, shape index: {}]   ;;  %s1271_s4 = inlined_call_operand.vmem [shape: f32[1,84], index: 4, kind: input, shape index: {}]   ;;  %s1272_s5 = inlined_call_operand.vmem [shape: f32[84,2], index: 5, kind: input, shape index: {}]   ;;  %s1273_s6 = inlined_call_operand.vmem [shape: f32[1,2], index: 6, kind: input, shape index: {}]   ;;  %s1274_s7 = inlined_call_operand.hbm [shape: f32[2,2], index: 7, kind: output, shape index: {}]  }
   0x1   :  { %v45_v0 = vld [vmem:[%s1268_s1 + $0x80] sm:$0xff]  ;;  %v46_v1 = vld [vmem:[%s1268_s1 + $0x88] sm:$0xff]  ;;  %v47_v11 = vld [vmem:[%s1268_s1 + $0x90] sm:$0xff]  ;;  %v110_v44 = vunpack.c.l.s4 %v884_v43 }
   0x2   :  { %v29_v2 = vld [vmem:[%s1268_s1] sm:$0xff]  ;;  %v745_v3 = vpack.c.bf16 %v46_v1, %v45_v0  ;;  %v30_v4 = vld [vmem:[%s1268_s1 + $0x8] sm:$0xff]  ;;  %v48_v13 = vld [vmem:[%s1268_s1 + $0x98] sm:$0xff]  ;;  %v113_v60 = vshrl.u32 %v112_v45, 7 }
   0x3   :  { %v77_v5 = vld [vmem:[%s1268_s1 + $0x180] sm:$0xff]  ;;  %v78_v6 = vld [vmem:[%s1268_s1 + $0x188] sm:$0xff]  ;;  %v747_v7 = vpack.c.bf16 %v30_v4, %v29_v2  ;;  %v31_v14 = vld [vmem:[%s1268_s1 + $0x10] sm:$0xff]  ;;  %v749_v16 = vpack.c.bf16 %v48_v13, %v47_v11  ;;  %v111_v59 = vunpack.c.0.s8 %v110_v44 }
   0x4   :  { %v777_v8 = vpack.c.bf16 %v78_v6, %v77_v5  ;;  %v61_v9 = vld [vmem:[%s1268_s1 + $0x100] sm:$0xff]  ;;  %v62_v10 = vld [vmem:[%s1268_s1 + $0x108] sm:$0xff]  ;;  %746 = vmatprep.subr.bf16.mxu0 %v745_v3  ;;  %v32_v15 = vld [vmem:[%s1268_s1 + $0x18] sm:$0xff] }
   0x5   :  { %v779_v12 = vpack.c.bf16 %v62_v10, %v61_v9  ;;  %748 = vmatpush3.bf16.msra.mxu0 %v747_v7  ;;  %v751_v17 = vpack.c.bf16 %v32_v15, %v31_v14  ;;  %v79_v18 = vld [vmem:[%s1268_s1 + $0x190] sm:$0xff]  ;;  %v80_v19 = vld [vmem:[%s1268_s1 + $0x198] sm:$0xff]  ;;  %v49_v23 = vld [vmem:[%s1268_s1 + $0xa0] sm:$0xff]  ;;  %v114_v10 = vsub.s32 %v111_v59, %v113_v60 }
   0x6   :  { %778 = vmatprep.subr.bf16.mxu1 %v777_v8  ;;  %v63_v20 = vld [vmem:[%s1268_s1 + $0x110] sm:$0xff]  ;;  %v781_v21 = vpack.c.bf16 %v80_v19, %v79_v18  ;;  %v64_v22 = vld [vmem:[%s1268_s1 + $0x118] sm:$0xff]  ;;  %v50_v24 = vld [vmem:[%s1268_s1 + $0xa8] sm:$0xff]  ;;  %750 = vmatprep.subr.bf16.mxu0 %v749_v16 }
   0x7   :  { %780 = vmatpush3.bf16.msra.mxu1 %v779_v12  ;;  %v783_v25 = vpack.c.bf16 %v64_v22, %v63_v20  ;;  %v753_v26 = vpack.c.bf16 %v50_v24, %v49_v23  ;;  %v33_v27 = vld [vmem:[%s1268_s1 + $0x20] sm:$0xff]  ;;  %v34_v28 = vld [vmem:[%s1268_s1 + $0x28] sm:$0xff]  ;;  %v51_v35 = vld [vmem:[%s1268_s1 + $0xb0] sm:$0xff] }
   0x8   :  { %v81_v29 = vld [vmem:[%s1268_s1 + $0x1a0] sm:$0xff]  ;;  %782 = vmatprep.subr.bf16.mxu1 %v781_v21  ;;  %v82_v30 = vld [vmem:[%s1268_s1 + $0x1a8] sm:$0xff]  ;;  %v755_v33 = vpack.c.bf16 %v34_v28, %v33_v27  ;;  %v52_v36 = vld [vmem:[%s1268_s1 + $0xb8] sm:$0xff] }
   0x9   :  { %v65_v31 = vld [vmem:[%s1268_s1 + $0x120] sm:$0xff]  ;;  %v66_v32 = vld [vmem:[%s1268_s1 + $0x128] sm:$0xff]  ;;  %752 = vmatpush3.bf16.msra.mxu0 %v751_v17  ;;  %v785_v34 = vpack.c.bf16 %v82_v30, %v81_v29  ;;  %v35_v37 = vld [vmem:[%s1268_s1 + $0x30] sm:$0xff]  ;;  %v757_v39 = vpack.c.bf16 %v52_v36, %v51_v35 }
   0xa   :  { %754 = vmatprep.subr.bf16.mxu0 %v753_v26  ;;  %v787_v38 = vpack.c.bf16 %v66_v32, %v65_v31  ;;  %v36_v40 = vld [vmem:[%s1268_s1 + $0x38] sm:$0xff]  ;;  %v83_v41 = vld [vmem:[%s1268_s1 + $0x1b0] sm:$0xff]  ;;  %v53_v49 = vld [vmem:[%s1268_s1 + $0xc0] sm:$0xff] }
   0xb   :  { %784 = vmatpush3.bf16.msra.mxu1 %v783_v25  ;;  %v84_v42 = vld [vmem:[%s1268_s1 + $0x1b8] sm:$0xff]  ;;  %v67_v47 = vld [vmem:[%s1268_s1 + $0x130] sm:$0xff]  ;;  %v54_v50 = vld [vmem:[%s1268_s1 + $0xc8] sm:$0xff]  ;;  %v759_v51 = vpack.c.bf16 %v36_v40, %v35_v37 }
   0xc   :  { %786 = vmatprep.subr.bf16.mxu1 %v785_v34  ;;  %v789_v46 = vpack.c.bf16 %v84_v42, %v83_v41  ;;  %v68_v48 = vld [vmem:[%s1268_s1 + $0x138] sm:$0xff]  ;;  %v85_v52 = vld [vmem:[%s1268_s1 + $0x1c0] sm:$0xff]  ;;  %v86_v53 = vld [vmem:[%s1268_s1 + $0x1c8] sm:$0xff]  ;;  %v761_v55 = vpack.c.bf16 %v54_v50, %v53_v49 }
   0xd   :  { %756 = vmatpush3.bf16.msra.mxu0 %v755_v33  ;;  %v791_v54 = vpack.c.bf16 %v68_v48, %v67_v47  ;;  %v37_v56 = vld [vmem:[%s1268_s1 + $0x40] sm:$0xff]  ;;  %v38_v57 = vld [vmem:[%s1268_s1 + $0x48] sm:$0xff]  ;;  %v793_v61 = vpack.c.bf16 %v86_v53, %v85_v52  ;;  %v55_v63 = vld [vmem:[%s1268_s1 + $0xd0] sm:$0xff] }
   0xe   :  { %758 = vmatprep.subr.bf16.mxu0 %v757_v39  ;;  %v69_v58 = vld [vmem:[%s1268_s1 + $0x140] sm:$0xff]  ;;  %v70_v62 = vld [vmem:[%s1268_s1 + $0x148] sm:$0xff]  ;;  %v56_v0 = vld [vmem:[%s1268_s1 + $0xd8] sm:$0xff]  ;;  %v763_v3 = vpack.c.bf16 %v38_v57, %v37_v56 }
   0xf   :  { %788 = vmatpush3.bf16.msra.mxu1 %v787_v38  ;;  %v87_v1 = vld [vmem:[%s1268_s1 + $0x1d0] sm:$0xff]  ;;  %v88_v2 = vld [vmem:[%s1268_s1 + $0x1d8] sm:$0xff]  ;;  %v795_v5 = vpack.c.bf16 %v70_v62, %v69_v58  ;;  %v765_v6 = vpack.c.bf16 %v56_v0, %v55_v63  ;;  %v57_v12 = vld [vmem:[%s1268_s1 + $0xe0] sm:$0xff] }
  0x10   :  { %790 = vmatprep.subr.bf16.mxu1 %v789_v46  ;;  %v39_v4 = vld [vmem:[%s1268_s1 + $0x50] sm:$0xff]  ;;  %v40_v7 = vld [vmem:[%s1268_s1 + $0x58] sm:$0xff]  ;;  %v797_v11 = vpack.c.bf16 %v88_v2, %v87_v1  ;;  %v58_v13 = vld [vmem:[%s1268_s1 + $0xe8] sm:$0xff] }
  0x11   :  { %760 = vmatpush3.bf16.msra.mxu0 %v759_v51  ;;  %v71_v8 = vld [vmem:[%s1268_s1 + $0x150] sm:$0xff]  ;;  %v72_v9 = vld [vmem:[%s1268_s1 + $0x158] sm:$0xff]  ;;  %v89_v14 = vld [vmem:[%s1268_s1 + $0x1e0] sm:$0xff]  ;;  %v767_v16 = vpack.c.bf16 %v40_v7, %v39_v4  ;;  %v769_v19 = vpack.c.bf16 %v58_v13, %v57_v12 }
  0x12   :  { %762 = vmatprep.subr.bf16.mxu0 %v761_v55  ;;  %v90_v15 = vld [vmem:[%s1268_s1 + $0x1e8] sm:$0xff]  ;;  %v799_v17 = vpack.c.bf16 %v72_v9, %v71_v8  ;;  %v27_v18 = vld [vmem:[%s1267_s0] sm:$0xff]  ;;  %v59_v27 = vld [vmem:[%s1268_s1 + $0xf0] sm:$0xff] }
  0x13   :  { %792 = vmatpush3.bf16.msra.mxu1 %v791_v54  ;;  %v41_v20 = vld [vmem:[%s1268_s1 + $0x60] sm:$0xff]  ;;  %v42_v21 = vld [vmem:[%s1268_s1 + $0x68] sm:$0xff]  ;;  %v115_v23 = vrot.slane %v27_v18, %v114_v10  ;;  %v108_v24 = vcombine.high %v27_v18, %v27_v18  ;;  %v801_v25 = vpack.c.bf16 %v90_v15, %v89_v14  ;;  %v60_v28 = vld [vmem:[%s1268_s1 + $0xf8] sm:$0xff] }
  0x14   :  { %794 = vmatprep.subr.bf16.mxu1 %v793_v61  ;;  %v73_v22 = vld [vmem:[%s1268_s1 + $0x160] sm:$0xff]  ;;  %v74_v26 = vld [vmem:[%s1268_s1 + $0x168] sm:$0xff]  ;;  %v91_v29 = vld [vmem:[%s1268_s1 + $0x1f0] sm:$0xff]  ;;  %v771_v33 = vpack.c.bf16 %v42_v21, %v41_v20  ;;  %v773_v35 = vpack.c.bf16 %v60_v28, %v59_v27 }
  0x15   :  { %764 = vmatpush3.bf16.msra.mxu0 %v763_v3  ;;  %v92_v30 = vld [vmem:[%s1268_s1 + $0x1f8] sm:$0xff]  ;;  %v123_v31 = vcombine.high %v115_v23, %v115_v23  ;;  %v122_v32 = vrot.slane %v108_v24, %v114_v10  ;;  %v803_v34 = vpack.c.bf16 %v74_v26, %v73_v22  ;;  %v43_v36 = vld [vmem:[%s1268_s1 + $0x70] sm:$0xff] }
  0x16   :  { %766 = vmatprep.subr.bf16.mxu0 %v765_v6  ;;  %v44_v37 = vld [vmem:[%s1268_s1 + $0x78] sm:$0xff]  ;;  %v805_v39 = vpack.c.bf16 %v92_v30, %v91_v29  ;;  %v75_v40 = vld [vmem:[%s1268_s1 + $0x170] sm:$0xff] }
  0x17   :  { %796 = vmatpush3.bf16.msra.mxu1 %v795_v5  ;;  %v124_v38 = vcombine.high %v122_v32, %v122_v32  ;;  %203 = vmatprep.mubr.f32.mxu0 %v123_v31  ;;  %v76_v41 = vld [vmem:[%s1268_s1 + $0x178] sm:$0xff] }
  0x18   :  { %798 = vmatprep.subr.bf16.mxu1 %v797_v11 }
  0x19   :  { %768 = vmatpush3.bf16.msra.mxu0 %v767_v16 }
  0x1a   :  { %770 = vmatprep.subr.bf16.mxu0 %v769_v19 }
  0x1b   :  { %800 = vmatpush3.bf16.msra.mxu1 %v799_v17 }
  0x1c   :  { %802 = vmatprep.subr.bf16.mxu1 %v801_v25 }
  0x1d   :  { %12 = vsyncpa [#allocation3], 0  ;;  %273 = vmatprep.mubr.f32.mxu1 %v124_v38  ;;  %772 = vmatpush3.bf16.msra.mxu0 %v771_v33  ;;  %v775_v42 = vpack.c.bf16 %v44_v37, %v43_v36  ;;  %v807_v43 = vpack.c.bf16 %v76_v41, %v75_v40  ;;  %v93_v44 = vld [vmem:[%s1268_s1 + $0x200] sm:$0xff]  ;;  %v94_v45 = vld [vmem:[%s1268_s1 + $0x208] sm:$0xff]  ;;  %v885_v49 = vmov 0.0|0.0   ;;  %vm886_vm0 = vmmov 0  }
  0x1e   :  { %774 = vmatprep.subr.bf16.mxu0 %v773_v35  ;;  %v350_v46 = vld [vmem:[%s1270_s3] sm:$0xff]  ;;  %v351_v47 = vld [vmem:[%s1270_s3 + $0x8] sm:$0xff]  ;;  %v810_v48 = vpack.c.bf16 %v94_v45, %v93_v44  ;;  %v95_v50 = vld [vmem:[%s1268_s1 + $0x210] sm:$0xff]  ;;  %v887_v58 = vmov 0.0   ;;  %vm136_vm1 = vcmask 392192   ;;  %vm372_vm2 = vcmask 982016  }
  0x1f   :  { %804 = vmatpush3.bf16.msra.mxu1 %v803_v34  ;;  %v96_v51 = vld [vmem:[%s1268_s1 + $0x218] sm:$0xff]  ;;  %v819_v52 = vpack.c.bf16 %v351_v47, %v350_v46  ;;  %v352_v53 = vld [vmem:[%s1270_s3 + $0x10] sm:$0xff]  ;;  %v97_v56 = vld [vmem:[%s1268_s1 + $0x220] sm:$0xff]  ;;  %vm469_vm3 = vcmask 1043456   ;;  %vm465_vm4 = vcmask 687104   ;;  %s888_s13 = smov [#allocation2]  }
  0x20   :  { %806 = vmatprep.subr.bf16.mxu1 %v805_v39  ;;  %v353_v54 = vld [vmem:[%s1270_s3 + $0x18] sm:$0xff]  ;;  %v813_v55 = vpack.c.bf16 %v96_v51, %v95_v50  ;;  %v98_v57 = vld [vmem:[%s1268_s1 + $0x228] sm:$0xff]  ;;  %v354_v60 = vld [vmem:[%s1270_s3 + $0x20] sm:$0xff]  ;;  %s551_s14 = sshll.u32 %s888_s13, 4  ;;  %vm543_vm5 = vcmask 9216   ;;  %s552_s14 = int_to_ptr.vmem [resolvable:$true] %s551_s14 }
  0x21   :  { %776 = vmatpush3.bf16.msra.mxu0 %v775_v42  ;;  %v822_v59 = vpack.c.bf16 %v353_v54, %v352_v53  ;;  %v355_v61 = vld [vmem:[%s1270_s3 + $0x28] sm:$0xff]  ;;  %v816_v62 = vpack.c.bf16 %v98_v57, %v97_v56  ;;  %v356_v1 = vld [vmem:[%s1270_s3 + $0x30] sm:$0xff]  ;;  %v357_v2 = vld [vmem:[%s1270_s3 + $0x38] sm:$0xff]  ;;  %p865_p1 = scmp.lt.s32.totalorder %s552_s14, %s552_s14 }
  0x22   :  { %809 = vmatprep.subr.bf16.mxu0 %v885_v49  ;;  %v825_v63 = vpack.c.bf16 %v355_v61, %v354_v60  ;;  %v560_v0 = vld.sshfl [vmem:[%s1267_s0 + $0x8] sm:$0x3 pattern:$0x76325410]  ;;  %v828_v3 = vpack.c.bf16 %v357_v2, %v356_v1  ;;  %v358_v4 = vld [vmem:[%s1270_s3 + $0x40] sm:$0xff]  ;;  %v360_v7 = vld [vmem:[%s1270_s3 + $0x50] sm:$0xff] }
  0x23   :  { %808 = vmatpush3.bf16.msra.mxu1 %v807_v43  ;;  %v359_v5 = vld [vmem:[%s1270_s3 + $0x48] sm:$0xff]  ;;  %v361_v8 = vld [vmem:[%s1270_s3 + $0x58] sm:$0xff]  ;;  %v362_v10 = vld [vmem:[%s1270_s3 + $0x60] sm:$0xff] }
  0x24   :  { %818 = vmatprep.subr.bf16.mxu1 %v885_v49  ;;  %204 = vmatmul.mubr.f32.vlgmr.msra.gmra.mrb[0].mxu0 %v115_v23  ;;  %v831_v6 = vpack.c.bf16 %v359_v5, %v358_v4  ;;  %v834_v9 = vpack.c.bf16 %v361_v8, %v360_v7  ;;  %v363_v11 = vld [vmem:[%s1270_s3 + $0x68] sm:$0xff]  ;;  %v364_v13 = vld [vmem:[%s1270_s3 + $0x70] sm:$0xff]  ;;  %v447_v14 = vld [vmem:[%s1272_s5] sm:$0xff] }
  0x25   :  { %811 = vmatpush3.bf16.msra.mxu0 %v810_v48  ;;  %684 = vmatprep.mubr.msk.f32.mxu0 %vm886_vm0, %v887_v58  ;;  %v837_v12 = vpack.c.bf16 %v363_v11, %v362_v10  ;;  %v448_v15 = vld [vmem:[%s1272_s5 + $0x8] sm:$0xff]  ;;  %v449_v16 = vld [vmem:[%s1272_s5 + $0x10] sm:$0xff]  ;;  %v450_v18 = vld [vmem:[%s1272_s5 + $0x18] sm:$0xff] }
  0x26   :  { %274 = vmatmul.mubr.f32.vlgmr.msra.gmra.mrb[0].mxu1 %v122_v32  ;;  %812 = vmatprep.subr.bf16.mxu0 %v885_v49  ;;  %v840_v17 = vpack.c.bf16 %v448_v15, %v447_v14  ;;  %v843_v19 = vpack.c.bf16 %v450_v18, %v449_v16  ;;  %v451_v20 = vld [vmem:[%s1272_s5 + $0x20] sm:$0xff]  ;;  %v452_v21 = vld [vmem:[%s1272_s5 + $0x28] sm:$0xff]  ;;  %v453_v23 = vld [vmem:[%s1272_s5 + $0x30] sm:$0xff] }
  0x27   :  { %820 = vmatpush3.bf16.msra.mxu1 %v819_v52  ;;  %717 = vmatprep.mubr.msk.f32.mxu1 %vm886_vm0, %v887_v58  ;;  %v846_v22 = vpack.c.bf16 %v452_v21, %v451_v20  ;;  %v454_v24 = vld [vmem:[%s1272_s5 + $0x38] sm:$0xff]  ;;  %v559_v27 = vld [vmem:[%s1269_s2] ss:$0 sm:$0xff]  ;;  %v456_v40 = vld [vmem:[%s1272_s5 + $0x48] sm:$0xff] }
  0x28   :  { %821 = vmatprep.subr.bf16.mxu1 %v885_v49  ;;  %v849_v25 = vpack.c.bf16 %v454_v24, %v453_v23  ;;  %v455_v39 = vld [vmem:[%s1272_s5 + $0x40] sm:$0xff]  ;;  %v457_v42 = vld [vmem:[%s1272_s5 + $0x50] sm:$0xf]  ;;  %s860_s5 = scalar_lea.vmem %s552_s14, 32 }
  0x29   :  { %814 = vmatpush3.bf16.msra.mxu0 %v813_v55  ;;  %v852_v41 = vpack.c.bf16 %v456_v40, %v455_v39  ;;  %v562_v43 = vld [vmem:[%s1271_s4] ss:$0 sm:$0xff]  ;;  %p861_p0 = scmp.ne.s32.totalorder %s552_s14, %s860_s5  ;;  %p866_p2 = scmp.lt.s32.totalorder %s860_s5, %s860_s5 }
  0x2a   :  { %815 = vmatprep.subr.bf16.mxu0 %v885_v49  ;;  %v564_v48 = vld [vmem:[%s1273_s6] ss:$0 sm:$0xff] }
  0x2b   :  { %823 = vmatpush3.bf16.msra.mxu1 %v822_v59  ;;  %p867_p3 = por %p866_p2, %p865_p1 }
  0x2c   :  { %824 = vmatprep.subr.bf16.mxu1 %v885_v49 }
  0x2d   :  { %817 = vmatpush3.bf16.msra.mxu0 %v816_v62  ;;  %p868_p4 = pnand %p867_p3, %p861_p0 }
  0x2e   :  { %839 = vmatprep.subr.bf16.mxu0 %v885_v49 }
  0x2f   :  { %826 = vmatpush3.bf16.msra.mxu1 %v825_v63 }
  0x30   :  { %685 = vmatmul.mubr.msk.f32.vlgmr.msra.gmra.mrb[2].mxu0 %vm136_vm1, %v560_v0  ;;  %827 = vmatprep.subr.bf16.mxu1 %v885_v49 }
  0x31   :  { %742 = vmatprep.mubr.msk.f32.mxu0 %vm886_vm0, %v887_v58  ;;  %841 = vmatpush3.bf16.msra.mxu0 %v840_v17 }
  0x32   :  { %842 = vmatprep.subr.bf16.mxu0 %v885_v49 }
  0x33   :  { %829 = vmatpush3.bf16.msra.mxu1 %v828_v3 }
  0x34   :  { %830 = vmatprep.subr.bf16.mxu1 %v885_v49 }
  0x35   :  { %844 = vmatpush3.bf16.msra.mxu0 %v843_v19 }
  0x36   :  { %845 = vmatprep.subr.bf16.mxu0 %v885_v49 }
  0x37   :  { %832 = vmatpush3.bf16.msra.mxu1 %v831_v6 }
  0x38   :  { %833 = vmatprep.subr.bf16.mxu1 %v885_v49 }
  0x39   :  { %847 = vmatpush3.bf16.msra.mxu0 %v846_v22 }
  0x3a   :  { %848 = vmatprep.subr.bf16.mxu0 %v885_v49 }
  0x3b   :  { %835 = vmatpush3.bf16.msra.mxu1 %v834_v9 }
  0x3c   :  { %836 = vmatprep.subr.bf16.mxu1 %v885_v49 }
  0x3d   :  { %850 = vmatpush3.bf16.msra.mxu0 %v849_v25 }
  0x3e   :  { %851 = vmatprep.subr.bf16.mxu0 %v885_v49 }
  0x3f   :  { %838 = vmatpush3.bf16.msra.mxu1 %v837_v12 }
  0x40   :  { %715 = vmatprep.subr.mxu1 %v887_v58 }
  0x41   :  { %853 = vmatpush3.bf16.msra.mxu0 %v852_v41 }
  0x42   :  { %740 = vmatprep.subr.mxu0 %v887_v58 }
  0x43   :  { %716 = vmatpush3.msra.mxu1 %v364_v13 }
  0x45   :  { %741 = vmatpush3.msk.msra.mxu0 %vm469_vm3, %v457_v42 }
  0xf7   :  { %v599_v26 = vpop.f32.mrb[0].mxu0 }
  0xf8   :  { %v600_v28 = vpop.f32.mrb[1].mxu0 }
  0xf9   :  { %v634_v29 = vpop.f32.mrb[0].mxu1  ;;  %v601_v30 = vadd.f32 %v600_v28, %v599_v26 }
  0xfa   :  { %v635_v31 = vpop.f32.mrb[1].mxu1 }
  0xfb   :  { %v636_v32 = vadd.f32 %v635_v31, %v634_v29  ;;  %v206_v33 = vadd.f32 %v601_v30, %v559_v27 }
  0xfd   :  { %v276_v34 = vadd.f32 %v636_v32, %v206_v33 }
 0x103   :  { %v345_v35 = vpop.f32.mrb[2].mxu0 }
 0x104   :  { %v346_v36 = vadd.f32 %v345_v35, %v276_v34  ;;  %v686_v37 = vpop.f32.mrb[3].mxu0 }
 0x106   :  { %v349_v38 = vmax.f32 %v346_v36, 0.0 }
 0x108   :  { %718 = vmatmul.mubr.msk.f32.vlgmr.msra.gmra.mrb[2].mxu1 %vm372_vm2, %v349_v38 }
 0x1db   :  { %v442_v44 = vpop.f32.mrb[2].mxu1 }
 0x1dc   :  { %v443_v45 = vadd.f32 %v562_v43, %v442_v44  ;;  %v719_v46 = vpop.f32.mrb[3].mxu1 }
 0x1de   :  { %v446_v47 = vmax.f32 %v443_v45, 0.0 }
 0x1e0   :  { %743 = vmatmul.mubr.msk.f32.vlgmr.msra.gmra.mrb[4].mxu0 %vm465_vm4, %v446_v47 }
 0x2b3   :  { %v539_v49 = vpop.f32.mrb[4].mxu0 }
 0x2b4   :  { %v540_v50 = vadd.f32 %v564_v48, %v539_v49  ;;  %v744_v51 = vpop.f32.mrb[5].mxu0 }
 0x2b6   :  { %544 = vst.msk [vmem:[#allocation2] sm:$0x3] %vm543_vm5, %v540_v50 }
 0x2b7   :  { %871 = shalt.err (!%p868_p4)
}
 0x2b8   :  { %s872_s16 = scalar_lea.hbm %s1274_s7, 32 }
 0x2b9   :  { %p873_p5 = scmp.ne.s32.totalorder %s1274_s7, %s872_s16  ;;  %p876_p6 = scmp.lt.u32.totalorder %s872_s16, %s1274_s7 }
 0x2bb   :  { %p878_p7 = pnand %p876_p6, %p873_p5 }
 0x2bd   :  { %881 = shalt.err (!%p878_p7)
}
 0x2be   :  { %554 = dma.vmem_to_hbm [thread:$0]  %s552_s14, 32, %s1274_s7, [#allocation3]  }
 0x2bf   :  { %882 = dma.done.wait [#allocation3], 32  }
 0x2c0   :  { %883 = vsyncadd [#allocation3], 4294967264 }
 0x2c1   :  { %558 = vsyncpa [#allocation3], 1 }

</bundles_post_ra>
